<compile_context>
chip_gen: v6e
topology: v6e:2x2x1
jax: 0.10.0
libtpu: 0.0.40
codegen_flags: <defaults>
</compile_context>

<pallas_src>
import functools
import math

import jax
import jax.numpy as jnp
from jax import lax
from jax.experimental import pallas as pl
from jax.experimental.pallas import tpu as pltpu


# ------------------------------- kernel ------------------------------------

def _layernorm(y, gamma, beta, eps):
    mean = jnp.mean(y, axis=-1, keepdims=True)
    var = jnp.mean(jnp.square(y - mean), axis=-1, keepdims=True)
    return (y - mean) * lax.rsqrt(var + eps) * gamma + beta


def encoder_layer_kernel(x_ref, wq_ref, wk_ref, wv_ref, bq_ref, bk_ref, bv_ref,
                         wo_ref, bo_ref, w1_ref, b1_ref, w2_ref, b2_ref,
                         g1_ref, be1_ref, g2_ref, be2_ref, o_ref,
                         *, num_heads, head_dim, eps):
    # x_ref:  (1, L, D)      activations for one batch element
    # wq/wk/wv_ref: (H, D, hd)   per-head projection weights
    # bq/bk/bv_ref: (H, 1, hd)   per-head projection biases
    # wo_ref: (H, hd, D), bo_ref: (1, D)   output projection
    # w1_ref: (D, F), b1_ref: (1, F), w2_ref: (F, D), b2_ref: (1, D)  FFN
    # g1/be1/g2/be2_ref: (1, D)  LayerNorm affine params
    x = x_ref[0].astype(jnp.float32)                      # (L, D)
    L, D = x.shape
    scale = 1.0 / math.sqrt(head_dim)

    # ---- multi-head self-attention (static, unrolled head loop) -----------
    attn = jnp.zeros((L, D), jnp.float32)
    for h in range(num_heads):
        q = jnp.dot(x, wq_ref[h], preferred_element_type=jnp.float32) + bq_ref[h]
        k = jnp.dot(x, wk_ref[h], preferred_element_type=jnp.float32) + bk_ref[h]
        v = jnp.dot(x, wv_ref[h], preferred_element_type=jnp.float32) + bv_ref[h]
        # scores = (q * scale) @ k^T, contraction over head_dim of both
        s = lax.dot_general(q * scale, k, (((1,), (1,)), ((), ())),
                            preferred_element_type=jnp.float32)        # (L, L)
        s = s - jnp.max(s, axis=-1, keepdims=True)
        e = jnp.exp(s)
        p = e / jnp.sum(e, axis=-1, keepdims=True)
        oh = jnp.dot(p, v, preferred_element_type=jnp.float32)         # (L, hd)
        # accumulate this head's contribution to the output projection
        attn = attn + jnp.dot(oh, wo_ref[h], preferred_element_type=jnp.float32)
    attn = attn + bo_ref[...]

    # residual + LayerNorm1 (post-norm); dropout1 is identity in eval mode
    y1 = _layernorm(x + attn, g1_ref[...], be1_ref[...], eps)

    # ---- feed-forward: linear -> relu -> linear ----------------------------
    hmid = jnp.dot(y1, w1_ref[...], preferred_element_type=jnp.float32) + b1_ref[...]
    hmid = jnp.maximum(hmid, 0.0)
    ff = jnp.dot(hmid, w2_ref[...], preferred_element_type=jnp.float32) + b2_ref[...]

    # residual + LayerNorm2
    y2 = _layernorm(y1 + ff, g2_ref[...], be2_ref[...], eps)
    o_ref[0] = y2.astype(o_ref.dtype)


# ------------------------------ wrapper -------------------------------------

def encoder_trsf_forward(x, params, *, num_heads, eps=1e-5):
    """x: (B, L, d_model) float.  Returns (B, L, d_model) f32."""
    B, L, D = x.shape
    H = num_heads
    assert D % H == 0, "d_model must be divisible by num_heads"
    hd = D // H
    F = params["w1"].shape[1]

    # Per-head weight layout -> the kernel never lane-slices activations.
    wq = params["wq"].reshape(D, H, hd).transpose(1, 0, 2)   # (H, D, hd)
    wk = params["wk"].reshape(D, H, hd).transpose(1, 0, 2)
    wv = params["wv"].reshape(D, H, hd).transpose(1, 0, 2)
    bq = params["bq"].reshape(H, 1, hd)
    bk = params["bk"].reshape(H, 1, hd)
    bv = params["bv"].reshape(H, 1, hd)
    wo = params["wo"].reshape(H, hd, D)                      # (H, hd, D)
    bo = params["bo"].reshape(1, D)
    w1 = params["w1"]                                        # (D, F)
    b1 = params["b1"].reshape(1, F)
    w2 = params["w2"]                                        # (F, D)
    b2 = params["b2"].reshape(1, D)
    g1 = params["g1"].reshape(1, D)
    be1 = params["be1"].reshape(1, D)
    g2 = params["g2"].reshape(1, D)
    be2 = params["be2"].reshape(1, D)

    def full(shape):
        # whole-array, grid-invariant block (weights resident in VMEM)
        return pl.BlockSpec(shape, lambda b, _n=len(shape): (0,) * _n)

    kernel = functools.partial(encoder_layer_kernel,
                               num_heads=H, head_dim=hd, eps=eps)

    out = pl.pallas_call(
        kernel,
        out_shape=jax.ShapeDtypeStruct((B, L, D), jnp.float32),
        grid=(B,),
        in_specs=[
            pl.BlockSpec((1, L, D), lambda b: (b, 0, 0)),    # activations tile
            full((H, D, hd)), full((H, D, hd)), full((H, D, hd)),   # Wq Wk Wv
            full((H, 1, hd)), full((H, 1, hd)), full((H, 1, hd)),   # bq bk bv
            full((H, hd, D)), full((1, D)),                          # Wo bo
            full((D, F)), full((1, F)),                              # W1 b1
            full((F, D)), full((1, D)),                              # W2 b2
            full((1, D)), full((1, D)), full((1, D)), full((1, D)),  # LN params
        ],
        out_specs=pl.BlockSpec((1, L, D), lambda b: (b, 0, 0)),
        compiler_params=pltpu.CompilerParams(
            dimension_semantics=("parallel",),      # shard batch across TCs
            vmem_limit_bytes=48 * 1024 * 1024,      # explicit headroom (v7x: 64 MiB)
        ),
    )(x.astype(jnp.float32), wq, wk, wv, bq, bk, bv, wo, bo,
      w1, b1, w2, b2, g1, be1, g2, be2)
    return out


# ------------------------------ reference -----------------------------------

def encoder_trsf_ref(x, params, *, num_heads, eps=1e-5):
    B, L, D = x.shape
    H = num_heads
    hd = D // H

    def ln(y, g, b):
        m = y.mean(-1, keepdims=True)
        v = ((y - m) ** 2).mean(-1, keepdims=True)
        return (y - m) / jnp.sqrt(v + eps) * g + b

    q = x @ params["wq"] + params["bq"]
    k = x @ params["wk"] + params["bk"]
    v = x @ params["wv"] + params["bv"]
    q = q.reshape(B, L, H, hd).transpose(0, 2, 1, 3) / math.sqrt(hd)
    k = k.reshape(B, L, H, hd).transpose(0, 2, 1, 3)
    vv = v.reshape(B, L, H, hd).transpose(0, 2, 1, 3)
    s = jnp.einsum("bhld,bhmd->bhlm", q, k)
    p = jax.nn.softmax(s, axis=-1)
    o = jnp.einsum("bhlm,bhmd->bhld", p, vv).transpose(0, 2, 1, 3).reshape(B, L, D)
    attn = o @ params["wo"] + params["bo"]
    y1 = ln(x + attn, params["g1"], params["be1"])
    ff = jnp.maximum(y1 @ params["w1"] + params["b1"], 0.0) @ params["w2"] + params["b2"]
    return ln(y1 + ff, params["g2"], params["be2"])


# -------------------------------- main ---------------------------------------

if __name__ == "__main__":
    # Small shapes consistent with the module: batch=2, seq=8, hidden=64,
    # nhead=8 (module default), dim_feedforward=2048 (TransformerEncoderLayer default).
    B, L, D, H, FF = 2, 8, 64, 8, 2048

    key = jax.random.PRNGKey(0)
    ks = jax.random.split(key, 13)

    def init(k, shape, s=0.1):
        return s * jax.random.normal(k, shape, jnp.float32)

    params = dict(
        wq=init(ks[0], (D, D)), bq=init(ks[1], (D,)),
        wk=init(ks[2], (D, D)), bk=init(ks[3], (D,)),
        wv=init(ks[4], (D, D)), bv=init(ks[5], (D,)),
        wo=init(ks[6], (D, D)), bo=init(ks[7], (D,)),
        w1=init(ks[8], (D, FF)), b1=init(ks[9], (FF,)),
        w2=init(ks[10], (FF, D)), b2=init(ks[11], (D,)),
        g1=jnp.ones((D,), jnp.float32), be1=jnp.zeros((D,), jnp.float32),
        g2=jnp.ones((D,), jnp.float32), be2=jnp.zeros((D,), jnp.float32),
    )
    x = jax.random.normal(ks[12], (B, L, D), jnp.float32)

    out = encoder_trsf_forward(x, params, num_heads=H)
    out = jax.block_until_ready(out)

    ref = encoder_trsf_ref(x, params, num_heads=H)
    assert out.shape == (B, L, D)
    err = float(jnp.max(jnp.abs(out - ref)))
    assert jnp.allclose(out, ref, atol=1e-4, rtol=1e-4), err

    print("KERNEL_OK")
</pallas_src>

<mosaic_0001>
module attributes {stable_mosaic.version = 11 : i64} {
  func.func @encoder_layer_kernel(%arg0: i32, %arg1: memref<1x8x64xf32, #tpu.memory_space<vmem>>, %arg2: memref<8x64x8xf32, #tpu.memory_space<vmem>>, %arg3: memref<8x64x8xf32, #tpu.memory_space<vmem>>, %arg4: memref<8x64x8xf32, #tpu.memory_space<vmem>>, %arg5: memref<8x1x8xf32, #tpu.memory_space<vmem>>, %arg6: memref<8x1x8xf32, #tpu.memory_space<vmem>>, %arg7: memref<8x1x8xf32, #tpu.memory_space<vmem>>, %arg8: memref<8x8x64xf32, #tpu.memory_space<vmem>>, %arg9: memref<1x64xf32, #tpu.memory_space<vmem>>, %arg10: memref<64x2048xf32, #tpu.memory_space<vmem>>, %arg11: memref<1x2048xf32, #tpu.memory_space<vmem>>, %arg12: memref<2048x64xf32, #tpu.memory_space<vmem>>, %arg13: memref<1x64xf32, #tpu.memory_space<vmem>>, %arg14: memref<1x64xf32, #tpu.memory_space<vmem>>, %arg15: memref<1x64xf32, #tpu.memory_space<vmem>>, %arg16: memref<1x64xf32, #tpu.memory_space<vmem>>, %arg17: memref<1x64xf32, #tpu.memory_space<vmem>>, %arg18: memref<1x8x64xf32, #tpu.memory_space<vmem>>) attributes {dimension_semantics = [#tpu.dimension_semantics<parallel>], iteration_bounds = array<i64: 2>, scalar_prefetch = 0 : i64, scratch_operands = 0 : i64, tpu.core_type = #tpu.core_type<tc>, window_params = [{transform_indices = @transform_0, window_bounds = array<i64: 1, 8, 64>}, {pipeline_mode = #tpu.pipeline_mode<synchronous>, transform_indices = @transform_1, window_bounds = array<i64: 8, 64, 8>}, {pipeline_mode = #tpu.pipeline_mode<synchronous>, transform_indices = @transform_2, window_bounds = array<i64: 8, 64, 8>}, {pipeline_mode = #tpu.pipeline_mode<synchronous>, transform_indices = @transform_3, window_bounds = array<i64: 8, 64, 8>}, {pipeline_mode = #tpu.pipeline_mode<synchronous>, transform_indices = @transform_4, window_bounds = array<i64: 8, 1, 8>}, {pipeline_mode = #tpu.pipeline_mode<synchronous>, transform_indices = @transform_5, window_bounds = array<i64: 8, 1, 8>}, {pipeline_mode = #tpu.pipeline_mode<synchronous>, transform_indices = @transform_6, window_bounds = array<i64: 8, 1, 8>}, {pipeline_mode = #tpu.pipeline_mode<synchronous>, transform_indices = @transform_7, window_bounds = array<i64: 8, 8, 64>}, {pipeline_mode = #tpu.pipeline_mode<synchronous>, transform_indices = @transform_8, window_bounds = array<i64: 1, 64>}, {pipeline_mode = #tpu.pipeline_mode<synchronous>, transform_indices = @transform_9, window_bounds = array<i64: 64, 2048>}, {pipeline_mode = #tpu.pipeline_mode<synchronous>, transform_indices = @transform_10, window_bounds = array<i64: 1, 2048>}, {pipeline_mode = #tpu.pipeline_mode<synchronous>, transform_indices = @transform_11, window_bounds = array<i64: 2048, 64>}, {pipeline_mode = #tpu.pipeline_mode<synchronous>, transform_indices = @transform_12, window_bounds = array<i64: 1, 64>}, {pipeline_mode = #tpu.pipeline_mode<synchronous>, transform_indices = @transform_13, window_bounds = array<i64: 1, 64>}, {pipeline_mode = #tpu.pipeline_mode<synchronous>, transform_indices = @transform_14, window_bounds = array<i64: 1, 64>}, {pipeline_mode = #tpu.pipeline_mode<synchronous>, transform_indices = @transform_15, window_bounds = array<i64: 1, 64>}, {pipeline_mode = #tpu.pipeline_mode<synchronous>, transform_indices = @transform_16, window_bounds = array<i64: 1, 64>}, {transform_indices = @transform_17, window_bounds = array<i64: 1, 8, 64>}]} {
    %c0 = arith.constant 0 : index
    %c0_0 = arith.constant 0 : index
    %c0_1 = arith.constant 0 : index
    %0 = vector.load %arg1[%c0, %c0_0, %c0_1] : memref<1x8x64xf32, #tpu.memory_space<vmem>>, vector<1x8x64xf32>
    %1 = vector.shape_cast %0 : vector<1x8x64xf32> to vector<8x64xf32>
    %cst = arith.constant 0.000000e+00 : f32
    %2 = vector.broadcast %cst : f32 to vector<8x64xf32>
    %c0_2 = arith.constant 0 : index
    %c0_3 = arith.constant 0 : index
    %c0_4 = arith.constant 0 : index
    %3 = vector.load %arg2[%c0_2, %c0_3, %c0_4] : memref<8x64x8xf32, #tpu.memory_space<vmem>>, vector<1x64x8xf32>
    %4 = vector.shape_cast %3 : vector<1x64x8xf32> to vector<64x8xf32>
    %cst_5 = arith.constant dense<0.000000e+00> : vector<8x8xf32>
    %5 = tpu.matmul %1, %4, %cst_5 {dimension_numbers = #tpu.dot_dimension_numbers<[1], [0], [0], [1], [0, 0, 1, 1], [], []>} : vector<8x64xf32>, vector<64x8xf32>, vector<8x8xf32> -> vector<8x8xf32>
    %c0_6 = arith.constant 0 : index
    %c0_7 = arith.constant 0 : index
    %c0_8 = arith.constant 0 : index
    %6 = vector.load %arg5[%c0_6, %c0_7, %c0_8] : memref<8x1x8xf32, #tpu.memory_space<vmem>>, vector<1x1x8xf32>
    %7 = vector.shape_cast %6 : vector<1x1x8xf32> to vector<1x8xf32>
    %8 = vector.broadcast %7 : vector<1x8xf32> to vector<8x8xf32>
    %9 = arith.addf %5, %8 : vector<8x8xf32>
    %c0_9 = arith.constant 0 : index
    %c0_10 = arith.constant 0 : index
    %c0_11 = arith.constant 0 : index
    %10 = vector.load %arg3[%c0_9, %c0_10, %c0_11] : memref<8x64x8xf32, #tpu.memory_space<vmem>>, vector<1x64x8xf32>
    %11 = vector.shape_cast %10 : vector<1x64x8xf32> to vector<64x8xf32>
    %cst_12 = arith.constant dense<0.000000e+00> : vector<8x8xf32>
    %12 = tpu.matmul %1, %11, %cst_12 {dimension_numbers = #tpu.dot_dimension_numbers<[1], [0], [0], [1], [0, 0, 1, 1], [], []>} : vector<8x64xf32>, vector<64x8xf32>, vector<8x8xf32> -> vector<8x8xf32>
    %c0_13 = arith.constant 0 : index
    %c0_14 = arith.constant 0 : index
    %c0_15 = arith.constant 0 : index
    %13 = vector.load %arg6[%c0_13, %c0_14, %c0_15] : memref<8x1x8xf32, #tpu.memory_space<vmem>>, vector<1x1x8xf32>
    %14 = vector.shape_cast %13 : vector<1x1x8xf32> to vector<1x8xf32>
    %15 = vector.broadcast %14 : vector<1x8xf32> to vector<8x8xf32>
    %16 = arith.addf %12, %15 : vector<8x8xf32>
    %c0_16 = arith.constant 0 : index
    %c0_17 = arith.constant 0 : index
    %c0_18 = arith.constant 0 : index
    %17 = vector.load %arg4[%c0_16, %c0_17, %c0_18] : memref<8x64x8xf32, #tpu.memory_space<vmem>>, vector<1x64x8xf32>
    %18 = vector.shape_cast %17 : vector<1x64x8xf32> to vector<64x8xf32>
    %cst_19 = arith.constant dense<0.000000e+00> : vector<8x8xf32>
    %19 = tpu.matmul %1, %18, %cst_19 {dimension_numbers = #tpu.dot_dimension_numbers<[1], [0], [0], [1], [0, 0, 1, 1], [], []>} : vector<8x64xf32>, vector<64x8xf32>, vector<8x8xf32> -> vector<8x8xf32>
    %c0_20 = arith.constant 0 : index
    %c0_21 = arith.constant 0 : index
    %c0_22 = arith.constant 0 : index
    %20 = vector.load %arg7[%c0_20, %c0_21, %c0_22] : memref<8x1x8xf32, #tpu.memory_space<vmem>>, vector<1x1x8xf32>
    %21 = vector.shape_cast %20 : vector<1x1x8xf32> to vector<1x8xf32>
    %22 = vector.broadcast %21 : vector<1x8xf32> to vector<8x8xf32>
    %23 = arith.addf %19, %22 : vector<8x8xf32>
    %cst_23 = arith.constant 0.353553385 : f32
    %24 = vector.broadcast %cst_23 : f32 to vector<8x8xf32>
    %25 = arith.mulf %9, %24 : vector<8x8xf32>
    %cst_24 = arith.constant dense<0.000000e+00> : vector<8x8xf32>
    %26 = tpu.matmul %25, %16, %cst_24 {dimension_numbers = #tpu.dot_dimension_numbers<[1], [1], [0], [0], [0, 0, 1, 0], [], []>} : vector<8x8xf32>, vector<8x8xf32>, vector<8x8xf32> -> vector<8x8xf32>
    %cst_25 = arith.constant dense<0xFF800000> : vector<8xf32>
    %27 = vector.multi_reduction <maximumf>, %26, %cst_25 [1] : vector<8x8xf32> to vector<8xf32>
    %28 = vector.shape_cast %27 : vector<8xf32> to vector<8x1xf32>
    %29 = vector.broadcast %28 : vector<8x1xf32> to vector<8x8xf32>
    %30 = arith.subf %26, %29 : vector<8x8xf32>
    %31 = math.exp %30 : vector<8x8xf32>
    %cst_26 = arith.constant dense<0.000000e+00> : vector<8xf32>
    %32 = vector.multi_reduction <add>, %31, %cst_26 [1] : vector<8x8xf32> to vector<8xf32>
    %33 = vector.shape_cast %32 : vector<8xf32> to vector<8x1xf32>
    %34 = vector.broadcast %33 : vector<8x1xf32> to vector<8x8xf32>
    %35 = arith.divf %31, %34 : vector<8x8xf32>
    %cst_27 = arith.constant dense<0.000000e+00> : vector<8x8xf32>
    %36 = tpu.matmul %35, %23, %cst_27 {dimension_numbers = #tpu.dot_dimension_numbers<[1], [0], [0], [1], [0, 0, 1, 1], [], []>} : vector<8x8xf32>, vector<8x8xf32>, vector<8x8xf32> -> vector<8x8xf32>
    %c0_28 = arith.constant 0 : index
    %c0_29 = arith.constant 0 : index
    %c0_30 = arith.constant 0 : index
    %37 = vector.load %arg8[%c0_28, %c0_29, %c0_30] : memref<8x8x64xf32, #tpu.memory_space<vmem>>, vector<1x8x64xf32>
    %38 = vector.shape_cast %37 : vector<1x8x64xf32> to vector<8x64xf32>
    %cst_31 = arith.constant dense<0.000000e+00> : vector<8x64xf32>
    %39 = tpu.matmul %36, %38, %cst_31 {dimension_numbers = #tpu.dot_dimension_numbers<[1], [0], [0], [1], [0, 0, 1, 1], [], []>} : vector<8x8xf32>, vector<8x64xf32>, vector<8x64xf32> -> vector<8x64xf32>
    %40 = arith.addf %2, %39 : vector<8x64xf32>
    %c1 = arith.constant 1 : index
    %c0_32 = arith.constant 0 : index
    %c0_33 = arith.constant 0 : index
    %41 = vector.load %arg2[%c1, %c0_32, %c0_33] : memref<8x64x8xf32, #tpu.memory_space<vmem>>, vector<1x64x8xf32>
    %42 = vector.shape_cast %41 : vector<1x64x8xf32> to vector<64x8xf32>
    %cst_34 = arith.constant dense<0.000000e+00> : vector<8x8xf32>
    %43 = tpu.matmul %1, %42, %cst_34 {dimension_numbers = #tpu.dot_dimension_numbers<[1], [0], [0], [1], [0, 0, 1, 1], [], []>} : vector<8x64xf32>, vector<64x8xf32>, vector<8x8xf32> -> vector<8x8xf32>
    %c1_35 = arith.constant 1 : index
    %c0_36 = arith.constant 0 : index
    %c0_37 = arith.constant 0 : index
    %44 = vector.load %arg5[%c1_35, %c0_36, %c0_37] : memref<8x1x8xf32, #tpu.memory_space<vmem>>, vector<1x1x8xf32>
    %45 = vector.shape_cast %44 : vector<1x1x8xf32> to vector<1x8xf32>
    %46 = vector.broadcast %45 : vector<1x8xf32> to vector<8x8xf32>
    %47 = arith.addf %43, %46 : vector<8x8xf32>
    %c1_38 = arith.constant 1 : index
    %c0_39 = arith.constant 0 : index
    %c0_40 = arith.constant 0 : index
    %48 = vector.load %arg3[%c1_38, %c0_39, %c0_40] : memref<8x64x8xf32, #tpu.memory_space<vmem>>, vector<1x64x8xf32>
    %49 = vector.shape_cast %48 : vector<1x64x8xf32> to vector<64x8xf32>
    %cst_41 = arith.constant dense<0.000000e+00> : vector<8x8xf32>
    %50 = tpu.matmul %1, %49, %cst_41 {dimension_numbers = #tpu.dot_dimension_numbers<[1], [0], [0], [1], [0, 0, 1, 1], [], []>} : vector<8x64xf32>, vector<64x8xf32>, vector<8x8xf32> -> vector<8x8xf32>
    %c1_42 = arith.constant 1 : index
    %c0_43 = arith.constant 0 : index
    %c0_44 = arith.constant 0 : index
    %51 = vector.load %arg6[%c1_42, %c0_43, %c0_44] : memref<8x1x8xf32, #tpu.memory_space<vmem>>, vector<1x1x8xf32>
    %52 = vector.shape_cast %51 : vector<1x1x8xf32> to vector<1x8xf32>
    %53 = vector.broadcast %52 : vector<1x8xf32> to vector<8x8xf32>
    %54 = arith.addf %50, %53 : vector<8x8xf32>
    %c1_45 = arith.constant 1 : index
    %c0_46 = arith.constant 0 : index
    %c0_47 = arith.constant 0 : index
    %55 = vector.load %arg4[%c1_45, %c0_46, %c0_47] : memref<8x64x8xf32, #tpu.memory_space<vmem>>, vector<1x64x8xf32>
    %56 = vector.shape_cast %55 : vector<1x64x8xf32> to vector<64x8xf32>
    %cst_48 = arith.constant dense<0.000000e+00> : vector<8x8xf32>
    %57 = tpu.matmul %1, %56, %cst_48 {dimension_numbers = #tpu.dot_dimension_numbers<[1], [0], [0], [1], [0, 0, 1, 1], [], []>} : vector<8x64xf32>, vector<64x8xf32>, vector<8x8xf32> -> vector<8x8xf32>
    %c1_49 = arith.constant 1 : index
    %c0_50 = arith.constant 0 : index
    %c0_51 = arith.constant 0 : index
    %58 = vector.load %arg7[%c1_49, %c0_50, %c0_51] : memref<8x1x8xf32, #tpu.memory_space<vmem>>, vector<1x1x8xf32>
    %59 = vector.shape_cast %58 : vector<1x1x8xf32> to vector<1x8xf32>
    %60 = vector.broadcast %59 : vector<1x8xf32> to vector<8x8xf32>
    %61 = arith.addf %57, %60 : vector<8x8xf32>
    %cst_52 = arith.constant 0.353553385 : f32
    %62 = vector.broadcast %cst_52 : f32 to vector<8x8xf32>
    %63 = arith.mulf %47, %62 : vector<8x8xf32>
    %cst_53 = arith.constant dense<0.000000e+00> : vector<8x8xf32>
    %64 = tpu.matmul %63, %54, %cst_53 {dimension_numbers = #tpu.dot_dimension_numbers<[1], [1], [0], [0], [0, 0, 1, 0], [], []>} : vector<8x8xf32>, vector<8x8xf32>, vector<8x8xf32> -> vector<8x8xf32>
    %cst_54 = arith.constant dense<0xFF800000> : vector<8xf32>
    %65 = vector.multi_reduction <maximumf>, %64, %cst_54 [1] : vector<8x8xf32> to vector<8xf32>
    %66 = vector.shape_cast %65 : vector<8xf32> to vector<8x1xf32>
    %67 = vector.broadcast %66 : vector<8x1xf32> to vector<8x8xf32>
    %68 = arith.subf %64, %67 : vector<8x8xf32>
    %69 = math.exp %68 : vector<8x8xf32>
    %cst_55 = arith.constant dense<0.000000e+00> : vector<8xf32>
    %70 = vector.multi_reduction <add>, %69, %cst_55 [1] : vector<8x8xf32> to vector<8xf32>
    %71 = vector.shape_cast %70 : vector<8xf32> to vector<8x1xf32>
    %72 = vector.broadcast %71 : vector<8x1xf32> to vector<8x8xf32>
    %73 = arith.divf %69, %72 : vector<8x8xf32>
    %cst_56 = arith.constant dense<0.000000e+00> : vector<8x8xf32>
    %74 = tpu.matmul %73, %61, %cst_56 {dimension_numbers = #tpu.dot_dimension_numbers<[1], [0], [0], [1], [0, 0, 1, 1], [], []>} : vector<8x8xf32>, vector<8x8xf32>, vector<8x8xf32> -> vector<8x8xf32>
    %c1_57 = arith.constant 1 : index
    %c0_58 = arith.constant 0 : index
    %c0_59 = arith.constant 0 : index
    %75 = vector.load %arg8[%c1_57, %c0_58, %c0_59] : memref<8x8x64xf32, #tpu.memory_space<vmem>>, vector<1x8x64xf32>
    %76 = vector.shape_cast %75 : vector<1x8x64xf32> to vector<8x64xf32>
    %cst_60 = arith.constant dense<0.000000e+00> : vector<8x64xf32>
    %77 = tpu.matmul %74, %76, %cst_60 {dimension_numbers = #tpu.dot_dimension_numbers<[1], [0], [0], [1], [0, 0, 1, 1], [], []>} : vector<8x8xf32>, vector<8x64xf32>, vector<8x64xf32> -> vector<8x64xf32>
    %78 = arith.addf %40, %77 : vector<8x64xf32>
    %c2 = arith.constant 2 : index
    %c0_61 = arith.constant 0 : index
    %c0_62 = arith.constant 0 : index
    %79 = vector.load %arg2[%c2, %c0_61, %c0_62] : memref<8x64x8xf32, #tpu.memory_space<vmem>>, vector<1x64x8xf32>
    %80 = vector.shape_cast %79 : vector<1x64x8xf32> to vector<64x8xf32>
    %cst_63 = arith.constant dense<0.000000e+00> : vector<8x8xf32>
    %81 = tpu.matmul %1, %80, %cst_63 {dimension_numbers = #tpu.dot_dimension_numbers<[1], [0], [0], [1], [0, 0, 1, 1], [], []>} : vector<8x64xf32>, vector<64x8xf32>, vector<8x8xf32> -> vector<8x8xf32>
    %c2_64 = arith.constant 2 : index
    %c0_65 = arith.constant 0 : index
    %c0_66 = arith.constant 0 : index
    %82 = vector.load %arg5[%c2_64, %c0_65, %c0_66] : memref<8x1x8xf32, #tpu.memory_space<vmem>>, vector<1x1x8xf32>
    %83 = vector.shape_cast %82 : vector<1x1x8xf32> to vector<1x8xf32>
    %84 = vector.broadcast %83 : vector<1x8xf32> to vector<8x8xf32>
    %85 = arith.addf %81, %84 : vector<8x8xf32>
    %c2_67 = arith.constant 2 : index
    %c0_68 = arith.constant 0 : index
    %c0_69 = arith.constant 0 : index
    %86 = vector.load %arg3[%c2_67, %c0_68, %c0_69] : memref<8x64x8xf32, #tpu.memory_space<vmem>>, vector<1x64x8xf32>
    %87 = vector.shape_cast %86 : vector<1x64x8xf32> to vector<64x8xf32>
    %cst_70 = arith.constant dense<0.000000e+00> : vector<8x8xf32>
    %88 = tpu.matmul %1, %87, %cst_70 {dimension_numbers = #tpu.dot_dimension_numbers<[1], [0], [0], [1], [0, 0, 1, 1], [], []>} : vector<8x64xf32>, vector<64x8xf32>, vector<8x8xf32> -> vector<8x8xf32>
    %c2_71 = arith.constant 2 : index
    %c0_72 = arith.constant 0 : index
    %c0_73 = arith.constant 0 : index
    %89 = vector.load %arg6[%c2_71, %c0_72, %c0_73] : memref<8x1x8xf32, #tpu.memory_space<vmem>>, vector<1x1x8xf32>
    %90 = vector.shape_cast %89 : vector<1x1x8xf32> to vector<1x8xf32>
    %91 = vector.broadcast %90 : vector<1x8xf32> to vector<8x8xf32>
    %92 = arith.addf %88, %91 : vector<8x8xf32>
    %c2_74 = arith.constant 2 : index
    %c0_75 = arith.constant 0 : index
    %c0_76 = arith.constant 0 : index
    %93 = vector.load %arg4[%c2_74, %c0_75, %c0_76] : memref<8x64x8xf32, #tpu.memory_space<vmem>>, vector<1x64x8xf32>
    %94 = vector.shape_cast %93 : vector<1x64x8xf32> to vector<64x8xf32>
    %cst_77 = arith.constant dense<0.000000e+00> : vector<8x8xf32>
    %95 = tpu.matmul %1, %94, %cst_77 {dimension_numbers = #tpu.dot_dimension_numbers<[1], [0], [0], [1], [0, 0, 1, 1], [], []>} : vector<8x64xf32>, vector<64x8xf32>, vector<8x8xf32> -> vector<8x8xf32>
    %c2_78 = arith.constant 2 : index
    %c0_79 = arith.constant 0 : index
    %c0_80 = arith.constant 0 : index
    %96 = vector.load %arg7[%c2_78, %c0_79, %c0_80] : memref<8x1x8xf32, #tpu.memory_space<vmem>>, vector<1x1x8xf32>
    %97 = vector.shape_cast %96 : vector<1x1x8xf32> to vector<1x8xf32>
    %98 = vector.broadcast %97 : vector<1x8xf32> to vector<8x8xf32>
    %99 = arith.addf %95, %98 : vector<8x8xf32>
    %cst_81 = arith.constant 0.353553385 : f32
    %100 = vector.broadcast %cst_81 : f32 to vector<8x8xf32>
    %101 = arith.mulf %85, %100 : vector<8x8xf32>
    %cst_82 = arith.constant dense<0.000000e+00> : vector<8x8xf32>
    %102 = tpu.matmul %101, %92, %cst_82 {dimension_numbers = #tpu.dot_dimension_numbers<[1], [1], [0], [0], [0, 0, 1, 0], [], []>} : vector<8x8xf32>, vector<8x8xf32>, vector<8x8xf32> -> vector<8x8xf32>
    %cst_83 = arith.constant dense<0xFF800000> : vector<8xf32>
    %103 = vector.multi_reduction <maximumf>, %102, %cst_83 [1] : vector<8x8xf32> to vector<8xf32>
    %104 = vector.shape_cast %103 : vector<8xf32> to vector<8x1xf32>
    %105 = vector.broadcast %104 : vector<8x1xf32> to vector<8x8xf32>
    %106 = arith.subf %102, %105 : vector<8x8xf32>
    %107 = math.exp %106 : vector<8x8xf32>
    %cst_84 = arith.constant dense<0.000000e+00> : vector<8xf32>
    %108 = vector.multi_reduction <add>, %107, %cst_84 [1] : vector<8x8xf32> to vector<8xf32>
    %109 = vector.shape_cast %108 : vector<8xf32> to vector<8x1xf32>
    %110 = vector.broadcast %109 : vector<8x1xf32> to vector<8x8xf32>
    %111 = arith.divf %107, %110 : vector<8x8xf32>
    %cst_85 = arith.constant dense<0.000000e+00> : vector<8x8xf32>
    %112 = tpu.matmul %111, %99, %cst_85 {dimension_numbers = #tpu.dot_dimension_numbers<[1], [0], [0], [1], [0, 0, 1, 1], [], []>} : vector<8x8xf32>, vector<8x8xf32>, vector<8x8xf32> -> vector<8x8xf32>
    %c2_86 = arith.constant 2 : index
    %c0_87 = arith.constant 0 : index
    %c0_88 = arith.constant 0 : index
    %113 = vector.load %arg8[%c2_86, %c0_87, %c0_88] : memref<8x8x64xf32, #tpu.memory_space<vmem>>, vector<1x8x64xf32>
    %114 = vector.shape_cast %113 : vector<1x8x64xf32> to vector<8x64xf32>
    %cst_89 = arith.constant dense<0.000000e+00> : vector<8x64xf32>
    %115 = tpu.matmul %112, %114, %cst_89 {dimension_numbers = #tpu.dot_dimension_numbers<[1], [0], [0], [1], [0, 0, 1, 1], [], []>} : vector<8x8xf32>, vector<8x64xf32>, vector<8x64xf32> -> vector<8x64xf32>
    %116 = arith.addf %78, %115 : vector<8x64xf32>
    %c3 = arith.constant 3 : index
    %c0_90 = arith.constant 0 : index
    %c0_91 = arith.constant 0 : index
    %117 = vector.load %arg2[%c3, %c0_90, %c0_91] : memref<8x64x8xf32, #tpu.memory_space<vmem>>, vector<1x64x8xf32>
    %118 = vector.shape_cast %117 : vector<1x64x8xf32> to vector<64x8xf32>
    %cst_92 = arith.constant dense<0.000000e+00> : vector<8x8xf32>
    %119 = tpu.matmul %1, %118, %cst_92 {dimension_numbers = #tpu.dot_dimension_numbers<[1], [0], [0], [1], [0, 0, 1, 1], [], []>} : vector<8x64xf32>, vector<64x8xf32>, vector<8x8xf32> -> vector<8x8xf32>
    %c3_93 = arith.constant 3 : index
    %c0_94 = arith.constant 0 : index
    %c0_95 = arith.constant 0 : index
    %120 = vector.load %arg5[%c3_93, %c0_94, %c0_95] : memref<8x1x8xf32, #tpu.memory_space<vmem>>, vector<1x1x8xf32>
    %121 = vector.shape_cast %120 : vector<1x1x8xf32> to vector<1x8xf32>
    %122 = vector.broadcast %121 : vector<1x8xf32> to vector<8x8xf32>
    %123 = arith.addf %119, %122 : vector<8x8xf32>
    %c3_96 = arith.constant 3 : index
    %c0_97 = arith.constant 0 : index
    %c0_98 = arith.constant 0 : index
    %124 = vector.load %arg3[%c3_96, %c0_97, %c0_98] : memref<8x64x8xf32, #tpu.memory_space<vmem>>, vector<1x64x8xf32>
    %125 = vector.shape_cast %124 : vector<1x64x8xf32> to vector<64x8xf32>
    %cst_99 = arith.constant dense<0.000000e+00> : vector<8x8xf32>
    %126 = tpu.matmul %1, %125, %cst_99 {dimension_numbers = #tpu.dot_dimension_numbers<[1], [0], [0], [1], [0, 0, 1, 1], [], []>} : vector<8x64xf32>, vector<64x8xf32>, vector<8x8xf32> -> vector<8x8xf32>
    %c3_100 = arith.constant 3 : index
    %c0_101 = arith.constant 0 : index
    %c0_102 = arith.constant 0 : index
    %127 = vector.load %arg6[%c3_100, %c0_101, %c0_102] : memref<8x1x8xf32, #tpu.memory_space<vmem>>, vector<1x1x8xf32>
    %128 = vector.shape_cast %127 : vector<1x1x8xf32> to vector<1x8xf32>
    %129 = vector.broadcast %128 : vector<1x8xf32> to vector<8x8xf32>
    %130 = arith.addf %126, %129 : vector<8x8xf32>
    %c3_103 = arith.constant 3 : index
    %c0_104 = arith.constant 0 : index
    %c0_105 = arith.constant 0 : index
    %131 = vector.load %arg4[%c3_103, %c0_104, %c0_105] : memref<8x64x8xf32, #tpu.memory_space<vmem>>, vector<1x64x8xf32>
    %132 = vector.shape_cast %131 : vector<1x64x8xf32> to vector<64x8xf32>
    %cst_106 = arith.constant dense<0.000000e+00> : vector<8x8xf32>
    %133 = tpu.matmul %1, %132, %cst_106 {dimension_numbers = #tpu.dot_dimension_numbers<[1], [0], [0], [1], [0, 0, 1, 1], [], []>} : vector<8x64xf32>, vector<64x8xf32>, vector<8x8xf32> -> vector<8x8xf32>
    %c3_107 = arith.constant 3 : index
    %c0_108 = arith.constant 0 : index
    %c0_109 = arith.constant 0 : index
    %134 = vector.load %arg7[%c3_107, %c0_108, %c0_109] : memref<8x1x8xf32, #tpu.memory_space<vmem>>, vector<1x1x8xf32>
    %135 = vector.shape_cast %134 : vector<1x1x8xf32> to vector<1x8xf32>
    %136 = vector.broadcast %135 : vector<1x8xf32> to vector<8x8xf32>
    %137 = arith.addf %133, %136 : vector<8x8xf32>
    %cst_110 = arith.constant 0.353553385 : f32
    %138 = vector.broadcast %cst_110 : f32 to vector<8x8xf32>
    %139 = arith.mulf %123, %138 : vector<8x8xf32>
    %cst_111 = arith.constant dense<0.000000e+00> : vector<8x8xf32>
    %140 = tpu.matmul %139, %130, %cst_111 {dimension_numbers = #tpu.dot_dimension_numbers<[1], [1], [0], [0], [0, 0, 1, 0], [], []>} : vector<8x8xf32>, vector<8x8xf32>, vector<8x8xf32> -> vector<8x8xf32>
    %cst_112 = arith.constant dense<0xFF800000> : vector<8xf32>
    %141 = vector.multi_reduction <maximumf>, %140, %cst_112 [1] : vector<8x8xf32> to vector<8xf32>
    %142 = vector.shape_cast %141 : vector<8xf32> to vector<8x1xf32>
    %143 = vector.broadcast %142 : vector<8x1xf32> to vector<8x8xf32>
    %144 = arith.subf %140, %143 : vector<8x8xf32>
    %145 = math.exp %144 : vector<8x8xf32>
    %cst_113 = arith.constant dense<0.000000e+00> : vector<8xf32>
    %146 = vector.multi_reduction <add>, %145, %cst_113 [1] : vector<8x8xf32> to vector<8xf32>
    %147 = vector.shape_cast %146 : vector<8xf32> to vector<8x1xf32>
    %148 = vector.broadcast %147 : vector<8x1xf32> to vector<8x8xf32>
    %149 = arith.divf %145, %148 : vector<8x8xf32>
    %cst_114 = arith.constant dense<0.000000e+00> : vector<8x8xf32>
    %150 = tpu.matmul %149, %137, %cst_114 {dimension_numbers = #tpu.dot_dimension_numbers<[1], [0], [0], [1], [0, 0, 1, 1], [], []>} : vector<8x8xf32>, vector<8x8xf32>, vector<8x8xf32> -> vector<8x8xf32>
    %c3_115 = arith.constant 3 : index
    %c0_116 = arith.constant 0 : index
    %c0_117 = arith.constant 0 : index
    %151 = vector.load %arg8[%c3_115, %c0_116, %c0_117] : memref<8x8x64xf32, #tpu.memory_space<vmem>>, vector<1x8x64xf32>
    %152 = vector.shape_cast %151 : vector<1x8x64xf32> to vector<8x64xf32>
    %cst_118 = arith.constant dense<0.000000e+00> : vector<8x64xf32>
    %153 = tpu.matmul %150, %152, %cst_118 {dimension_numbers = #tpu.dot_dimension_numbers<[1], [0], [0], [1], [0, 0, 1, 1], [], []>} : vector<8x8xf32>, vector<8x64xf32>, vector<8x64xf32> -> vector<8x64xf32>
    %154 = arith.addf %116, %153 : vector<8x64xf32>
    %c4 = arith.constant 4 : index
    %c0_119 = arith.constant 0 : index
    %c0_120 = arith.constant 0 : index
    %155 = vector.load %arg2[%c4, %c0_119, %c0_120] : memref<8x64x8xf32, #tpu.memory_space<vmem>>, vector<1x64x8xf32>
    %156 = vector.shape_cast %155 : vector<1x64x8xf32> to vector<64x8xf32>
    %cst_121 = arith.constant dense<0.000000e+00> : vector<8x8xf32>
    %157 = tpu.matmul %1, %156, %cst_121 {dimension_numbers = #tpu.dot_dimension_numbers<[1], [0], [0], [1], [0, 0, 1, 1], [], []>} : vector<8x64xf32>, vector<64x8xf32>, vector<8x8xf32> -> vector<8x8xf32>
    %c4_122 = arith.constant 4 : index
    %c0_123 = arith.constant 0 : index
    %c0_124 = arith.constant 0 : index
    %158 = vector.load %arg5[%c4_122, %c0_123, %c0_124] : memref<8x1x8xf32, #tpu.memory_space<vmem>>, vector<1x1x8xf32>
    %159 = vector.shape_cast %158 : vector<1x1x8xf32> to vector<1x8xf32>
    %160 = vector.broadcast %159 : vector<1x8xf32> to vector<8x8xf32>
    %161 = arith.addf %157, %160 : vector<8x8xf32>
    %c4_125 = arith.constant 4 : index
    %c0_126 = arith.constant 0 : index
    %c0_127 = arith.constant 0 : index
    %162 = vector.load %arg3[%c4_125, %c0_126, %c0_127] : memref<8x64x8xf32, #tpu.memory_space<vmem>>, vector<1x64x8xf32>
    %163 = vector.shape_cast %162 : vector<1x64x8xf32> to vector<64x8xf32>
    %cst_128 = arith.constant dense<0.000000e+00> : vector<8x8xf32>
    %164 = tpu.matmul %1, %163, %cst_128 {dimension_numbers = #tpu.dot_dimension_numbers<[1], [0], [0], [1], [0, 0, 1, 1], [], []>} : vector<8x64xf32>, vector<64x8xf32>, vector<8x8xf32> -> vector<8x8xf32>
    %c4_129 = arith.constant 4 : index
    %c0_130 = arith.constant 0 : index
    %c0_131 = arith.constant 0 : index
    %165 = vector.load %arg6[%c4_129, %c0_130, %c0_131] : memref<8x1x8xf32, #tpu.memory_space<vmem>>, vector<1x1x8xf32>
    %166 = vector.shape_cast %165 : vector<1x1x8xf32> to vector<1x8xf32>
    %167 = vector.broadcast %166 : vector<1x8xf32> to vector<8x8xf32>
    %168 = arith.addf %164, %167 : vector<8x8xf32>
    %c4_132 = arith.constant 4 : index
    %c0_133 = arith.constant 0 : index
    %c0_134 = arith.constant 0 : index
    %169 = vector.load %arg4[%c4_132, %c0_133, %c0_134] : memref<8x64x8xf32, #tpu.memory_space<vmem>>, vector<1x64x8xf32>
    %170 = vector.shape_cast %169 : vector<1x64x8xf32> to vector<64x8xf32>
    %cst_135 = arith.constant dense<0.000000e+00> : vector<8x8xf32>
    %171 = tpu.matmul %1, %170, %cst_135 {dimension_numbers = #tpu.dot_dimension_numbers<[1], [0], [0], [1], [0, 0, 1, 1], [], []>} : vector<8x64xf32>, vector<64x8xf32>, vector<8x8xf32> -> vector<8x8xf32>
    %c4_136 = arith.constant 4 : index
    %c0_137 = arith.constant 0 : index
    %c0_138 = arith.constant 0 : index
    %172 = vector.load %arg7[%c4_136, %c0_137, %c0_138] : memref<8x1x8xf32, #tpu.memory_space<vmem>>, vector<1x1x8xf32>
    %173 = vector.shape_cast %172 : vector<1x1x8xf32> to vector<1x8xf32>
    %174 = vector.broadcast %173 : vector<1x8xf32> to vector<8x8xf32>
    %175 = arith.addf %171, %174 : vector<8x8xf32>
    %cst_139 = arith.constant 0.353553385 : f32
    %176 = vector.broadcast %cst_139 : f32 to vector<8x8xf32>
    %177 = arith.mulf %161, %176 : vector<8x8xf32>
    %cst_140 = arith.constant dense<0.000000e+00> : vector<8x8xf32>
    %178 = tpu.matmul %177, %168, %cst_140 {dimension_numbers = #tpu.dot_dimension_numbers<[1], [1], [0], [0], [0, 0, 1, 0], [], []>} : vector<8x8xf32>, vector<8x8xf32>, vector<8x8xf32> -> vector<8x8xf32>
    %cst_141 = arith.constant dense<0xFF800000> : vector<8xf32>
    %179 = vector.multi_reduction <maximumf>, %178, %cst_141 [1] : vector<8x8xf32> to vector<8xf32>
    %180 = vector.shape_cast %179 : vector<8xf32> to vector<8x1xf32>
    %181 = vector.broadcast %180 : vector<8x1xf32> to vector<8x8xf32>
    %182 = arith.subf %178, %181 : vector<8x8xf32>
    %183 = math.exp %182 : vector<8x8xf32>
    %cst_142 = arith.constant dense<0.000000e+00> : vector<8xf32>
    %184 = vector.multi_reduction <add>, %183, %cst_142 [1] : vector<8x8xf32> to vector<8xf32>
    %185 = vector.shape_cast %184 : vector<8xf32> to vector<8x1xf32>
    %186 = vector.broadcast %185 : vector<8x1xf32> to vector<8x8xf32>
    %187 = arith.divf %183, %186 : vector<8x8xf32>
    %cst_143 = arith.constant dense<0.000000e+00> : vector<8x8xf32>
    %188 = tpu.matmul %187, %175, %cst_143 {dimension_numbers = #tpu.dot_dimension_numbers<[1], [0], [0], [1], [0, 0, 1, 1], [], []>} : vector<8x8xf32>, vector<8x8xf32>, vector<8x8xf32> -> vector<8x8xf32>
    %c4_144 = arith.constant 4 : index
    %c0_145 = arith.constant 0 : index
    %c0_146 = arith.constant 0 : index
    %189 = vector.load %arg8[%c4_144, %c0_145, %c0_146] : memref<8x8x64xf32, #tpu.memory_space<vmem>>, vector<1x8x64xf32>
    %190 = vector.shape_cast %189 : vector<1x8x64xf32> to vector<8x64xf32>
    %cst_147 = arith.constant dense<0.000000e+00> : vector<8x64xf32>
    %191 = tpu.matmul %188, %190, %cst_147 {dimension_numbers = #tpu.dot_dimension_numbers<[1], [0], [0], [1], [0, 0, 1, 1], [], []>} : vector<8x8xf32>, vector<8x64xf32>, vector<8x64xf32> -> vector<8x64xf32>
    %192 = arith.addf %154, %191 : vector<8x64xf32>
    %c5 = arith.constant 5 : index
    %c0_148 = arith.constant 0 : index
    %c0_149 = arith.constant 0 : index
    %193 = vector.load %arg2[%c5, %c0_148, %c0_149] : memref<8x64x8xf32, #tpu.memory_space<vmem>>, vector<1x64x8xf32>
    %194 = vector.shape_cast %193 : vector<1x64x8xf32> to vector<64x8xf32>
    %cst_150 = arith.constant dense<0.000000e+00> : vector<8x8xf32>
    %195 = tpu.matmul %1, %194, %cst_150 {dimension_numbers = #tpu.dot_dimension_numbers<[1], [0], [0], [1], [0, 0, 1, 1], [], []>} : vector<8x64xf32>, vector<64x8xf32>, vector<8x8xf32> -> vector<8x8xf32>
    %c5_151 = arith.constant 5 : index
    %c0_152 = arith.constant 0 : index
    %c0_153 = arith.constant 0 : index
    %196 = vector.load %arg5[%c5_151, %c0_152, %c0_153] : memref<8x1x8xf32, #tpu.memory_space<vmem>>, vector<1x1x8xf32>
    %197 = vector.shape_cast %196 : vector<1x1x8xf32> to vector<1x8xf32>
    %198 = vector.broadcast %197 : vector<1x8xf32> to vector<8x8xf32>
    %199 = arith.addf %195, %198 : vector<8x8xf32>
    %c5_154 = arith.constant 5 : index
    %c0_155 = arith.constant 0 : index
    %c0_156 = arith.constant 0 : index
    %200 = vector.load %arg3[%c5_154, %c0_155, %c0_156] : memref<8x64x8xf32, #tpu.memory_space<vmem>>, vector<1x64x8xf32>
    %201 = vector.shape_cast %200 : vector<1x64x8xf32> to vector<64x8xf32>
    %cst_157 = arith.constant dense<0.000000e+00> : vector<8x8xf32>
    %202 = tpu.matmul %1, %201, %cst_157 {dimension_numbers = #tpu.dot_dimension_numbers<[1], [0], [0], [1], [0, 0, 1, 1], [], []>} : vector<8x64xf32>, vector<64x8xf32>, vector<8x8xf32> -> vector<8x8xf32>
    %c5_158 = arith.constant 5 : index
    %c0_159 = arith.constant 0 : index
    %c0_160 = arith.constant 0 : index
    %203 = vector.load %arg6[%c5_158, %c0_159, %c0_160] : memref<8x1x8xf32, #tpu.memory_space<vmem>>, vector<1x1x8xf32>
    %204 = vector.shape_cast %203 : vector<1x1x8xf32> to vector<1x8xf32>
    %205 = vector.broadcast %204 : vector<1x8xf32> to vector<8x8xf32>
    %206 = arith.addf %202, %205 : vector<8x8xf32>
    %c5_161 = arith.constant 5 : index
    %c0_162 = arith.constant 0 : index
    %c0_163 = arith.constant 0 : index
    %207 = vector.load %arg4[%c5_161, %c0_162, %c0_163] : memref<8x64x8xf32, #tpu.memory_space<vmem>>, vector<1x64x8xf32>
    %208 = vector.shape_cast %207 : vector<1x64x8xf32> to vector<64x8xf32>
    %cst_164 = arith.constant dense<0.000000e+00> : vector<8x8xf32>
    %209 = tpu.matmul %1, %208, %cst_164 {dimension_numbers = #tpu.dot_dimension_numbers<[1], [0], [0], [1], [0, 0, 1, 1], [], []>} : vector<8x64xf32>, vector<64x8xf32>, vector<8x8xf32> -> vector<8x8xf32>
    %c5_165 = arith.constant 5 : index
    %c0_166 = arith.constant 0 : index
    %c0_167 = arith.constant 0 : index
    %210 = vector.load %arg7[%c5_165, %c0_166, %c0_167] : memref<8x1x8xf32, #tpu.memory_space<vmem>>, vector<1x1x8xf32>
    %211 = vector.shape_cast %210 : vector<1x1x8xf32> to vector<1x8xf32>
    %212 = vector.broadcast %211 : vector<1x8xf32> to vector<8x8xf32>
    %213 = arith.addf %209, %212 : vector<8x8xf32>
    %cst_168 = arith.constant 0.353553385 : f32
    %214 = vector.broadcast %cst_168 : f32 to vector<8x8xf32>
    %215 = arith.mulf %199, %214 : vector<8x8xf32>
    %cst_169 = arith.constant dense<0.000000e+00> : vector<8x8xf32>
    %216 = tpu.matmul %215, %206, %cst_169 {dimension_numbers = #tpu.dot_dimension_numbers<[1], [1], [0], [0], [0, 0, 1, 0], [], []>} : vector<8x8xf32>, vector<8x8xf32>, vector<8x8xf32> -> vector<8x8xf32>
    %cst_170 = arith.constant dense<0xFF800000> : vector<8xf32>
    %217 = vector.multi_reduction <maximumf>, %216, %cst_170 [1] : vector<8x8xf32> to vector<8xf32>
    %218 = vector.shape_cast %217 : vector<8xf32> to vector<8x1xf32>
    %219 = vector.broadcast %218 : vector<8x1xf32> to vector<8x8xf32>
    %220 = arith.subf %216, %219 : vector<8x8xf32>
    %221 = math.exp %220 : vector<8x8xf32>
    %cst_171 = arith.constant dense<0.000000e+00> : vector<8xf32>
    %222 = vector.multi_reduction <add>, %221, %cst_171 [1] : vector<8x8xf32> to vector<8xf32>
    %223 = vector.shape_cast %222 : vector<8xf32> to vector<8x1xf32>
    %224 = vector.broadcast %223 : vector<8x1xf32> to vector<8x8xf32>
    %225 = arith.divf %221, %224 : vector<8x8xf32>
    %cst_172 = arith.constant dense<0.000000e+00> : vector<8x8xf32>
    %226 = tpu.matmul %225, %213, %cst_172 {dimension_numbers = #tpu.dot_dimension_numbers<[1], [0], [0], [1], [0, 0, 1, 1], [], []>} : vector<8x8xf32>, vector<8x8xf32>, vector<8x8xf32> -> vector<8x8xf32>
    %c5_173 = arith.constant 5 : index
    %c0_174 = arith.constant 0 : index
    %c0_175 = arith.constant 0 : index
    %227 = vector.load %arg8[%c5_173, %c0_174, %c0_175] : memref<8x8x64xf32, #tpu.memory_space<vmem>>, vector<1x8x64xf32>
    %228 = vector.shape_cast %227 : vector<1x8x64xf32> to vector<8x64xf32>
    %cst_176 = arith.constant dense<0.000000e+00> : vector<8x64xf32>
    %229 = tpu.matmul %226, %228, %cst_176 {dimension_numbers = #tpu.dot_dimension_numbers<[1], [0], [0], [1], [0, 0, 1, 1], [], []>} : vector<8x8xf32>, vector<8x64xf32>, vector<8x64xf32> -> vector<8x64xf32>
    %230 = arith.addf %192, %229 : vector<8x64xf32>
    %c6 = arith.constant 6 : index
    %c0_177 = arith.constant 0 : index
    %c0_178 = arith.constant 0 : index
    %231 = vector.load %arg2[%c6, %c0_177, %c0_178] : memref<8x64x8xf32, #tpu.memory_space<vmem>>, vector<1x64x8xf32>
    %232 = vector.shape_cast %231 : vector<1x64x8xf32> to vector<64x8xf32>
    %cst_179 = arith.constant dense<0.000000e+00> : vector<8x8xf32>
    %233 = tpu.matmul %1, %232, %cst_179 {dimension_numbers = #tpu.dot_dimension_numbers<[1], [0], [0], [1], [0, 0, 1, 1], [], []>} : vector<8x64xf32>, vector<64x8xf32>, vector<8x8xf32> -> vector<8x8xf32>
    %c6_180 = arith.constant 6 : index
    %c0_181 = arith.constant 0 : index
    %c0_182 = arith.constant 0 : index
    %234 = vector.load %arg5[%c6_180, %c0_181, %c0_182] : memref<8x1x8xf32, #tpu.memory_space<vmem>>, vector<1x1x8xf32>
    %235 = vector.shape_cast %234 : vector<1x1x8xf32> to vector<1x8xf32>
    %236 = vector.broadcast %235 : vector<1x8xf32> to vector<8x8xf32>
    %237 = arith.addf %233, %236 : vector<8x8xf32>
    %c6_183 = arith.constant 6 : index
    %c0_184 = arith.constant 0 : index
    %c0_185 = arith.constant 0 : index
    %238 = vector.load %arg3[%c6_183, %c0_184, %c0_185] : memref<8x64x8xf32, #tpu.memory_space<vmem>>, vector<1x64x8xf32>
    %239 = vector.shape_cast %238 : vector<1x64x8xf32> to vector<64x8xf32>
    %cst_186 = arith.constant dense<0.000000e+00> : vector<8x8xf32>
    %240 = tpu.matmul %1, %239, %cst_186 {dimension_numbers = #tpu.dot_dimension_numbers<[1], [0], [0], [1], [0, 0, 1, 1], [], []>} : vector<8x64xf32>, vector<64x8xf32>, vector<8x8xf32> -> vector<8x8xf32>
    %c6_187 = arith.constant 6 : index
    %c0_188 = arith.constant 0 : index
    %c0_189 = arith.constant 0 : index
    %241 = vector.load %arg6[%c6_187, %c0_188, %c0_189] : memref<8x1x8xf32, #tpu.memory_space<vmem>>, vector<1x1x8xf32>
    %242 = vector.shape_cast %241 : vector<1x1x8xf32> to vector<1x8xf32>
    %243 = vector.broadcast %242 : vector<1x8xf32> to vector<8x8xf32>
    %244 = arith.addf %240, %243 : vector<8x8xf32>
    %c6_190 = arith.constant 6 : index
    %c0_191 = arith.constant 0 : index
    %c0_192 = arith.constant 0 : index
    %245 = vector.load %arg4[%c6_190, %c0_191, %c0_192] : memref<8x64x8xf32, #tpu.memory_space<vmem>>, vector<1x64x8xf32>
    %246 = vector.shape_cast %245 : vector<1x64x8xf32> to vector<64x8xf32>
    %cst_193 = arith.constant dense<0.000000e+00> : vector<8x8xf32>
    %247 = tpu.matmul %1, %246, %cst_193 {dimension_numbers = #tpu.dot_dimension_numbers<[1], [0], [0], [1], [0, 0, 1, 1], [], []>} : vector<8x64xf32>, vector<64x8xf32>, vector<8x8xf32> -> vector<8x8xf32>
    %c6_194 = arith.constant 6 : index
    %c0_195 = arith.constant 0 : index
    %c0_196 = arith.constant 0 : index
    %248 = vector.load %arg7[%c6_194, %c0_195, %c0_196] : memref<8x1x8xf32, #tpu.memory_space<vmem>>, vector<1x1x8xf32>
    %249 = vector.shape_cast %248 : vector<1x1x8xf32> to vector<1x8xf32>
    %250 = vector.broadcast %249 : vector<1x8xf32> to vector<8x8xf32>
    %251 = arith.addf %247, %250 : vector<8x8xf32>
    %cst_197 = arith.constant 0.353553385 : f32
    %252 = vector.broadcast %cst_197 : f32 to vector<8x8xf32>
    %253 = arith.mulf %237, %252 : vector<8x8xf32>
    %cst_198 = arith.constant dense<0.000000e+00> : vector<8x8xf32>
    %254 = tpu.matmul %253, %244, %cst_198 {dimension_numbers = #tpu.dot_dimension_numbers<[1], [1], [0], [0], [0, 0, 1, 0], [], []>} : vector<8x8xf32>, vector<8x8xf32>, vector<8x8xf32> -> vector<8x8xf32>
    %cst_199 = arith.constant dense<0xFF800000> : vector<8xf32>
    %255 = vector.multi_reduction <maximumf>, %254, %cst_199 [1] : vector<8x8xf32> to vector<8xf32>
    %256 = vector.shape_cast %255 : vector<8xf32> to vector<8x1xf32>
    %257 = vector.broadcast %256 : vector<8x1xf32> to vector<8x8xf32>
    %258 = arith.subf %254, %257 : vector<8x8xf32>
    %259 = math.exp %258 : vector<8x8xf32>
    %cst_200 = arith.constant dense<0.000000e+00> : vector<8xf32>
    %260 = vector.multi_reduction <add>, %259, %cst_200 [1] : vector<8x8xf32> to vector<8xf32>
    %261 = vector.shape_cast %260 : vector<8xf32> to vector<8x1xf32>
    %262 = vector.broadcast %261 : vector<8x1xf32> to vector<8x8xf32>
    %263 = arith.divf %259, %262 : vector<8x8xf32>
    %cst_201 = arith.constant dense<0.000000e+00> : vector<8x8xf32>
    %264 = tpu.matmul %263, %251, %cst_201 {dimension_numbers = #tpu.dot_dimension_numbers<[1], [0], [0], [1], [0, 0, 1, 1], [], []>} : vector<8x8xf32>, vector<8x8xf32>, vector<8x8xf32> -> vector<8x8xf32>
    %c6_202 = arith.constant 6 : index
    %c0_203 = arith.constant 0 : index
    %c0_204 = arith.constant 0 : index
    %265 = vector.load %arg8[%c6_202, %c0_203, %c0_204] : memref<8x8x64xf32, #tpu.memory_space<vmem>>, vector<1x8x64xf32>
    %266 = vector.shape_cast %265 : vector<1x8x64xf32> to vector<8x64xf32>
    %cst_205 = arith.constant dense<0.000000e+00> : vector<8x64xf32>
    %267 = tpu.matmul %264, %266, %cst_205 {dimension_numbers = #tpu.dot_dimension_numbers<[1], [0], [0], [1], [0, 0, 1, 1], [], []>} : vector<8x8xf32>, vector<8x64xf32>, vector<8x64xf32> -> vector<8x64xf32>
    %268 = arith.addf %230, %267 : vector<8x64xf32>
    %c7 = arith.constant 7 : index
    %c0_206 = arith.constant 0 : index
    %c0_207 = arith.constant 0 : index
    %269 = vector.load %arg2[%c7, %c0_206, %c0_207] : memref<8x64x8xf32, #tpu.memory_space<vmem>>, vector<1x64x8xf32>
    %270 = vector.shape_cast %269 : vector<1x64x8xf32> to vector<64x8xf32>
    %cst_208 = arith.constant dense<0.000000e+00> : vector<8x8xf32>
    %271 = tpu.matmul %1, %270, %cst_208 {dimension_numbers = #tpu.dot_dimension_numbers<[1], [0], [0], [1], [0, 0, 1, 1], [], []>} : vector<8x64xf32>, vector<64x8xf32>, vector<8x8xf32> -> vector<8x8xf32>
    %c7_209 = arith.constant 7 : index
    %c0_210 = arith.constant 0 : index
    %c0_211 = arith.constant 0 : index
    %272 = vector.load %arg5[%c7_209, %c0_210, %c0_211] : memref<8x1x8xf32, #tpu.memory_space<vmem>>, vector<1x1x8xf32>
    %273 = vector.shape_cast %272 : vector<1x1x8xf32> to vector<1x8xf32>
    %274 = vector.broadcast %273 : vector<1x8xf32> to vector<8x8xf32>
    %275 = arith.addf %271, %274 : vector<8x8xf32>
    %c7_212 = arith.constant 7 : index
    %c0_213 = arith.constant 0 : index
    %c0_214 = arith.constant 0 : index
    %276 = vector.load %arg3[%c7_212, %c0_213, %c0_214] : memref<8x64x8xf32, #tpu.memory_space<vmem>>, vector<1x64x8xf32>
    %277 = vector.shape_cast %276 : vector<1x64x8xf32> to vector<64x8xf32>
    %cst_215 = arith.constant dense<0.000000e+00> : vector<8x8xf32>
    %278 = tpu.matmul %1, %277, %cst_215 {dimension_numbers = #tpu.dot_dimension_numbers<[1], [0], [0], [1], [0, 0, 1, 1], [], []>} : vector<8x64xf32>, vector<64x8xf32>, vector<8x8xf32> -> vector<8x8xf32>
    %c7_216 = arith.constant 7 : index
    %c0_217 = arith.constant 0 : index
    %c0_218 = arith.constant 0 : index
    %279 = vector.load %arg6[%c7_216, %c0_217, %c0_218] : memref<8x1x8xf32, #tpu.memory_space<vmem>>, vector<1x1x8xf32>
    %280 = vector.shape_cast %279 : vector<1x1x8xf32> to vector<1x8xf32>
    %281 = vector.broadcast %280 : vector<1x8xf32> to vector<8x8xf32>
    %282 = arith.addf %278, %281 : vector<8x8xf32>
    %c7_219 = arith.constant 7 : index
    %c0_220 = arith.constant 0 : index
    %c0_221 = arith.constant 0 : index
    %283 = vector.load %arg4[%c7_219, %c0_220, %c0_221] : memref<8x64x8xf32, #tpu.memory_space<vmem>>, vector<1x64x8xf32>
    %284 = vector.shape_cast %283 : vector<1x64x8xf32> to vector<64x8xf32>
    %cst_222 = arith.constant dense<0.000000e+00> : vector<8x8xf32>
    %285 = tpu.matmul %1, %284, %cst_222 {dimension_numbers = #tpu.dot_dimension_numbers<[1], [0], [0], [1], [0, 0, 1, 1], [], []>} : vector<8x64xf32>, vector<64x8xf32>, vector<8x8xf32> -> vector<8x8xf32>
    %c7_223 = arith.constant 7 : index
    %c0_224 = arith.constant 0 : index
    %c0_225 = arith.constant 0 : index
    %286 = vector.load %arg7[%c7_223, %c0_224, %c0_225] : memref<8x1x8xf32, #tpu.memory_space<vmem>>, vector<1x1x8xf32>
    %287 = vector.shape_cast %286 : vector<1x1x8xf32> to vector<1x8xf32>
    %288 = vector.broadcast %287 : vector<1x8xf32> to vector<8x8xf32>
    %289 = arith.addf %285, %288 : vector<8x8xf32>
    %cst_226 = arith.constant 0.353553385 : f32
    %290 = vector.broadcast %cst_226 : f32 to vector<8x8xf32>
    %291 = arith.mulf %275, %290 : vector<8x8xf32>
    %cst_227 = arith.constant dense<0.000000e+00> : vector<8x8xf32>
    %292 = tpu.matmul %291, %282, %cst_227 {dimension_numbers = #tpu.dot_dimension_numbers<[1], [1], [0], [0], [0, 0, 1, 0], [], []>} : vector<8x8xf32>, vector<8x8xf32>, vector<8x8xf32> -> vector<8x8xf32>
    %cst_228 = arith.constant dense<0xFF800000> : vector<8xf32>
    %293 = vector.multi_reduction <maximumf>, %292, %cst_228 [1] : vector<8x8xf32> to vector<8xf32>
    %294 = vector.shape_cast %293 : vector<8xf32> to vector<8x1xf32>
    %295 = vector.broadcast %294 : vector<8x1xf32> to vector<8x8xf32>
    %296 = arith.subf %292, %295 : vector<8x8xf32>
    %297 = math.exp %296 : vector<8x8xf32>
    %cst_229 = arith.constant dense<0.000000e+00> : vector<8xf32>
    %298 = vector.multi_reduction <add>, %297, %cst_229 [1] : vector<8x8xf32> to vector<8xf32>
    %299 = vector.shape_cast %298 : vector<8xf32> to vector<8x1xf32>
    %300 = vector.broadcast %299 : vector<8x1xf32> to vector<8x8xf32>
    %301 = arith.divf %297, %300 : vector<8x8xf32>
    %cst_230 = arith.constant dense<0.000000e+00> : vector<8x8xf32>
    %302 = tpu.matmul %301, %289, %cst_230 {dimension_numbers = #tpu.dot_dimension_numbers<[1], [0], [0], [1], [0, 0, 1, 1], [], []>} : vector<8x8xf32>, vector<8x8xf32>, vector<8x8xf32> -> vector<8x8xf32>
    %c7_231 = arith.constant 7 : index
    %c0_232 = arith.constant 0 : index
    %c0_233 = arith.constant 0 : index
    %303 = vector.load %arg8[%c7_231, %c0_232, %c0_233] : memref<8x8x64xf32, #tpu.memory_space<vmem>>, vector<1x8x64xf32>
    %304 = vector.shape_cast %303 : vector<1x8x64xf32> to vector<8x64xf32>
    %cst_234 = arith.constant dense<0.000000e+00> : vector<8x64xf32>
    %305 = tpu.matmul %302, %304, %cst_234 {dimension_numbers = #tpu.dot_dimension_numbers<[1], [0], [0], [1], [0, 0, 1, 1], [], []>} : vector<8x8xf32>, vector<8x64xf32>, vector<8x64xf32> -> vector<8x64xf32>
    %306 = arith.addf %268, %305 : vector<8x64xf32>
    %c0_235 = arith.constant 0 : index
    %c0_236 = arith.constant 0 : index
    %307 = vector.load %arg9[%c0_235, %c0_236] : memref<1x64xf32, #tpu.memory_space<vmem>>, vector<1x64xf32>
    %308 = vector.broadcast %307 : vector<1x64xf32> to vector<8x64xf32>
    %309 = arith.addf %306, %308 : vector<8x64xf32>
    %310 = arith.addf %1, %309 : vector<8x64xf32>
    %c0_237 = arith.constant 0 : index
    %c0_238 = arith.constant 0 : index
    %311 = vector.load %arg14[%c0_237, %c0_238] : memref<1x64xf32, #tpu.memory_space<vmem>>, vector<1x64xf32>
    %c0_239 = arith.constant 0 : index
    %c0_240 = arith.constant 0 : index
    %312 = vector.load %arg15[%c0_239, %c0_240] : memref<1x64xf32, #tpu.memory_space<vmem>>, vector<1x64xf32>
    %cst_241 = arith.constant dense<0.000000e+00> : vector<8xf32>
    %313 = vector.multi_reduction <add>, %310, %cst_241 [1] : vector<8x64xf32> to vector<8xf32>
    %314 = vector.shape_cast %313 : vector<8xf32> to vector<8x1xf32>
    %cst_242 = arith.constant 6.400000e+01 : f32
    %315 = vector.broadcast %cst_242 : f32 to vector<8x1xf32>
    %316 = arith.divf %314, %315 : vector<8x1xf32>
    %317 = vector.broadcast %316 : vector<8x1xf32> to vector<8x64xf32>
    %318 = arith.subf %310, %317 : vector<8x64xf32>
    %319 = arith.mulf %318, %318 : vector<8x64xf32>
    %cst_243 = arith.constant dense<0.000000e+00> : vector<8xf32>
    %320 = vector.multi_reduction <add>, %319, %cst_243 [1] : vector<8x64xf32> to vector<8xf32>
    %321 = vector.shape_cast %320 : vector<8xf32> to vector<8x1xf32>
    %cst_244 = arith.constant 6.400000e+01 : f32
    %322 = vector.broadcast %cst_244 : f32 to vector<8x1xf32>
    %323 = arith.divf %321, %322 : vector<8x1xf32>
    %324 = vector.broadcast %316 : vector<8x1xf32> to vector<8x64xf32>
    %325 = arith.subf %310, %324 : vector<8x64xf32>
    %cst_245 = arith.constant 9.99999974E-6 : f32
    %326 = vector.broadcast %cst_245 : f32 to vector<8x1xf32>
    %327 = arith.addf %323, %326 : vector<8x1xf32>
    %328 = math.rsqrt %327 : vector<8x1xf32>
    %329 = vector.broadcast %328 : vector<8x1xf32> to vector<8x64xf32>
    %330 = arith.mulf %325, %329 : vector<8x64xf32>
    %331 = vector.broadcast %311 : vector<1x64xf32> to vector<8x64xf32>
    %332 = arith.mulf %330, %331 : vector<8x64xf32>
    %333 = vector.broadcast %312 : vector<1x64xf32> to vector<8x64xf32>
    %334 = arith.addf %332, %333 : vector<8x64xf32>
    %c0_246 = arith.constant 0 : index
    %c0_247 = arith.constant 0 : index
    %335 = vector.load %arg10[%c0_246, %c0_247] : memref<64x2048xf32, #tpu.memory_space<vmem>>, vector<64x2048xf32>
    %cst_248 = arith.constant dense<0.000000e+00> : vector<8x2048xf32>
    %336 = tpu.matmul %334, %335, %cst_248 {dimension_numbers = #tpu.dot_dimension_numbers<[1], [0], [0], [1], [0, 0, 1, 1], [], []>} : vector<8x64xf32>, vector<64x2048xf32>, vector<8x2048xf32> -> vector<8x2048xf32>
    %c0_249 = arith.constant 0 : index
    %c0_250 = arith.constant 0 : index
    %337 = vector.load %arg11[%c0_249, %c0_250] : memref<1x2048xf32, #tpu.memory_space<vmem>>, vector<1x2048xf32>
    %338 = vector.broadcast %337 : vector<1x2048xf32> to vector<8x2048xf32>
    %339 = arith.addf %336, %338 : vector<8x2048xf32>
    %cst_251 = arith.constant 0.000000e+00 : f32
    %340 = vector.broadcast %cst_251 : f32 to vector<8x2048xf32>
    %341 = arith.maximumf %339, %340 : vector<8x2048xf32>
    %c0_252 = arith.constant 0 : index
    %c0_253 = arith.constant 0 : index
    %342 = vector.load %arg12[%c0_252, %c0_253] : memref<2048x64xf32, #tpu.memory_space<vmem>>, vector<2048x64xf32>
    %cst_254 = arith.constant dense<0.000000e+00> : vector<8x64xf32>
    %343 = tpu.matmul %341, %342, %cst_254 {dimension_numbers = #tpu.dot_dimension_numbers<[1], [0], [0], [1], [0, 0, 1, 1], [], []>} : vector<8x2048xf32>, vector<2048x64xf32>, vector<8x64xf32> -> vector<8x64xf32>
    %c0_255 = arith.constant 0 : index
    %c0_256 = arith.constant 0 : index
    %344 = vector.load %arg13[%c0_255, %c0_256] : memref<1x64xf32, #tpu.memory_space<vmem>>, vector<1x64xf32>
    %345 = vector.broadcast %344 : vector<1x64xf32> to vector<8x64xf32>
    %346 = arith.addf %343, %345 : vector<8x64xf32>
    %347 = arith.addf %334, %346 : vector<8x64xf32>
    %c0_257 = arith.constant 0 : index
    %c0_258 = arith.constant 0 : index
    %348 = vector.load %arg16[%c0_257, %c0_258] : memref<1x64xf32, #tpu.memory_space<vmem>>, vector<1x64xf32>
    %c0_259 = arith.constant 0 : index
    %c0_260 = arith.constant 0 : index
    %349 = vector.load %arg17[%c0_259, %c0_260] : memref<1x64xf32, #tpu.memory_space<vmem>>, vector<1x64xf32>
    %cst_261 = arith.constant dense<0.000000e+00> : vector<8xf32>
    %350 = vector.multi_reduction <add>, %347, %cst_261 [1] : vector<8x64xf32> to vector<8xf32>
    %351 = vector.shape_cast %350 : vector<8xf32> to vector<8x1xf32>
    %cst_262 = arith.constant 6.400000e+01 : f32
    %352 = vector.broadcast %cst_262 : f32 to vector<8x1xf32>
    %353 = arith.divf %351, %352 : vector<8x1xf32>
    %354 = vector.broadcast %353 : vector<8x1xf32> to vector<8x64xf32>
    %355 = arith.subf %347, %354 : vector<8x64xf32>
    %356 = arith.mulf %355, %355 : vector<8x64xf32>
    %cst_263 = arith.constant dense<0.000000e+00> : vector<8xf32>
    %357 = vector.multi_reduction <add>, %356, %cst_263 [1] : vector<8x64xf32> to vector<8xf32>
    %358 = vector.shape_cast %357 : vector<8xf32> to vector<8x1xf32>
    %cst_264 = arith.constant 6.400000e+01 : f32
    %359 = vector.broadcast %cst_264 : f32 to vector<8x1xf32>
    %360 = arith.divf %358, %359 : vector<8x1xf32>
    %361 = vector.broadcast %353 : vector<8x1xf32> to vector<8x64xf32>
    %362 = arith.subf %347, %361 : vector<8x64xf32>
    %cst_265 = arith.constant 9.99999974E-6 : f32
    %363 = vector.broadcast %cst_265 : f32 to vector<8x1xf32>
    %364 = arith.addf %360, %363 : vector<8x1xf32>
    %365 = math.rsqrt %364 : vector<8x1xf32>
    %366 = vector.broadcast %365 : vector<8x1xf32> to vector<8x64xf32>
    %367 = arith.mulf %362, %366 : vector<8x64xf32>
    %368 = vector.broadcast %348 : vector<1x64xf32> to vector<8x64xf32>
    %369 = arith.mulf %367, %368 : vector<8x64xf32>
    %370 = vector.broadcast %349 : vector<1x64xf32> to vector<8x64xf32>
    %371 = arith.addf %369, %370 : vector<8x64xf32>
    %c0_266 = arith.constant 0 : index
    %c0_267 = arith.constant 0 : index
    %c0_268 = arith.constant 0 : index
    %372 = vector.load %arg18[%c0_266, %c0_267, %c0_268] : memref<1x8x64xf32, #tpu.memory_space<vmem>>, vector<1x8x64xf32>
    %373 = vector.shape_cast %372 : vector<1x8x64xf32> to vector<8x64xf32>
    %374 = vector.shape_cast %371 : vector<8x64xf32> to vector<1x8x64xf32>
    tpu.vector_store %arg18[%c0_266, %c0_267, %c0_268], %374 {strides = array<i32>} : memref<1x8x64xf32, #tpu.memory_space<vmem>>, vector<1x8x64xf32>,
    return
  }
  func.func @transform_0(%arg0: i32) -> (i32, i32, i32) {
    %c0_i32 = arith.constant 0 : i32
    %c0_i32_0 = arith.constant 0 : i32
    %c0_i32_1 = arith.constant 0 : i32
    return %arg0, %c0_i32, %c0_i32_0 : i32, i32, i32
  }
  func.func @transform_1(%arg0: i32) -> (i32, i32, i32) {
    %c0_i32 = arith.constant 0 : i32
    %c0_i32_0 = arith.constant 0 : i32
    %c0_i32_1 = arith.constant 0 : i32
    %c0_i32_2 = arith.constant 0 : i32
    return %c0_i32, %c0_i32_0, %c0_i32_1 : i32, i32, i32
  }
  func.func @transform_2(%arg0: i32) -> (i32, i32, i32) {
    %c0_i32 = arith.constant 0 : i32
    %c0_i32_0 = arith.constant 0 : i32
    %c0_i32_1 = arith.constant 0 : i32
    %c0_i32_2 = arith.constant 0 : i32
    return %c0_i32, %c0_i32_0, %c0_i32_1 : i32, i32, i32
  }
  func.func @transform_3(%arg0: i32) -> (i32, i32, i32) {
    %c0_i32 = arith.constant 0 : i32
    %c0_i32_0 = arith.constant 0 : i32
    %c0_i32_1 = arith.constant 0 : i32
    %c0_i32_2 = arith.constant 0 : i32
    return %c0_i32, %c0_i32_0, %c0_i32_1 : i32, i32, i32
  }
  func.func @transform_4(%arg0: i32) -> (i32, i32, i32) {
    %c0_i32 = arith.constant 0 : i32
    %c0_i32_0 = arith.constant 0 : i32
    %c0_i32_1 = arith.constant 0 : i32
    %c0_i32_2 = arith.constant 0 : i32
    return %c0_i32, %c0_i32_0, %c0_i32_1 : i32, i32, i32
  }
  func.func @transform_5(%arg0: i32) -> (i32, i32, i32) {
    %c0_i32 = arith.constant 0 : i32
    %c0_i32_0 = arith.constant 0 : i32
    %c0_i32_1 = arith.constant 0 : i32
    %c0_i32_2 = arith.constant 0 : i32
    return %c0_i32, %c0_i32_0, %c0_i32_1 : i32, i32, i32
  }
  func.func @transform_6(%arg0: i32) -> (i32, i32, i32) {
    %c0_i32 = arith.constant 0 : i32
    %c0_i32_0 = arith.constant 0 : i32
    %c0_i32_1 = arith.constant 0 : i32
    %c0_i32_2 = arith.constant 0 : i32
    return %c0_i32, %c0_i32_0, %c0_i32_1 : i32, i32, i32
  }
  func.func @transform_7(%arg0: i32) -> (i32, i32, i32) {
    %c0_i32 = arith.constant 0 : i32
    %c0_i32_0 = arith.constant 0 : i32
    %c0_i32_1 = arith.constant 0 : i32
    %c0_i32_2 = arith.constant 0 : i32
    return %c0_i32, %c0_i32_0, %c0_i32_1 : i32, i32, i32
  }
  func.func @transform_8(%arg0: i32) -> (i32, i32) {
    %c0_i32 = arith.constant 0 : i32
    %c0_i32_0 = arith.constant 0 : i32
    %c0_i32_1 = arith.constant 0 : i32
    return %c0_i32, %c0_i32_0 : i32, i32
  }
  func.func @transform_9(%arg0: i32) -> (i32, i32) {
    %c0_i32 = arith.constant 0 : i32
    %c0_i32_0 = arith.constant 0 : i32
    %c0_i32_1 = arith.constant 0 : i32
    return %c0_i32, %c0_i32_0 : i32, i32
  }
  func.func @transform_10(%arg0: i32) -> (i32, i32) {
    %c0_i32 = arith.constant 0 : i32
    %c0_i32_0 = arith.constant 0 : i32
    %c0_i32_1 = arith.constant 0 : i32
    return %c0_i32, %c0_i32_0 : i32, i32
  }
  func.func @transform_11(%arg0: i32) -> (i32, i32) {
    %c0_i32 = arith.constant 0 : i32
    %c0_i32_0 = arith.constant 0 : i32
    %c0_i32_1 = arith.constant 0 : i32
    return %c0_i32, %c0_i32_0 : i32, i32
  }
  func.func @transform_12(%arg0: i32) -> (i32, i32) {
    %c0_i32 = arith.constant 0 : i32
    %c0_i32_0 = arith.constant 0 : i32
    %c0_i32_1 = arith.constant 0 : i32
    return %c0_i32, %c0_i32_0 : i32, i32
  }
  func.func @transform_13(%arg0: i32) -> (i32, i32) {
    %c0_i32 = arith.constant 0 : i32
    %c0_i32_0 = arith.constant 0 : i32
    %c0_i32_1 = arith.constant 0 : i32
    return %c0_i32, %c0_i32_0 : i32, i32
  }
  func.func @transform_14(%arg0: i32) -> (i32, i32) {
    %c0_i32 = arith.constant 0 : i32
    %c0_i32_0 = arith.constant 0 : i32
    %c0_i32_1 = arith.constant 0 : i32
    return %c0_i32, %c0_i32_0 : i32, i32
  }
  func.func @transform_15(%arg0: i32) -> (i32, i32) {
    %c0_i32 = arith.constant 0 : i32
    %c0_i32_0 = arith.constant 0 : i32
    %c0_i32_1 = arith.constant 0 : i32
    return %c0_i32, %c0_i32_0 : i32, i32
  }
  func.func @transform_16(%arg0: i32) -> (i32, i32) {
    %c0_i32 = arith.constant 0 : i32
    %c0_i32_0 = arith.constant 0 : i32
    %c0_i32_1 = arith.constant 0 : i32
    return %c0_i32, %c0_i32_0 : i32, i32
  }
  func.func @transform_17(%arg0: i32) -> (i32, i32, i32) {
    %c0_i32 = arith.constant 0 : i32
    %c0_i32_0 = arith.constant 0 : i32
    %c0_i32_1 = arith.constant 0 : i32
    return %arg0, %c0_i32, %c0_i32_0 : i32, i32, i32
  }
}

</mosaic_0001>

<bundles_post_ra>
// kernel: tpu_custom_call.1
= control target key start
LH: loop header
LB: loop body
LE: loop exit
PB: predicated region body
PF: predicated region fallthrough
CT: control target
= control target key end

     0   :  { %s10439_s0 = inlined_call_operand.vmem [shape: f32[2,8,64], index: 0, kind: input, shape index: {}]   ;;  %s10440_s1 = inlined_call_operand.vmem [shape: f32[8,64,8], index: 1, kind: input, shape index: {}]   ;;  %s10441_s2 = inlined_call_operand.vmem [shape: f32[8,64,8], index: 2, kind: input, shape index: {}]   ;;  %s10442_s3 = inlined_call_operand.vmem [shape: f32[8,64,8], index: 3, kind: input, shape index: {}]   ;;  %s10443_s4 = inlined_call_operand.vmem [shape: f32[8,1,8], index: 4, kind: input, shape index: {}]   ;;  %s10444_s5 = inlined_call_operand.vmem [shape: f32[8,1,8], index: 5, kind: input, shape index: {}]   ;;  %s10445_s6 = inlined_call_operand.vmem [shape: f32[8,1,8], index: 6, kind: input, shape index: {}]   ;;  %s10446_s7 = inlined_call_operand.vmem [shape: f32[8,8,64], index: 7, kind: input, shape index: {}]   ;;  %s10447_s8 = inlined_call_operand.vmem [shape: f32[1,64], index: 8, kind: input, shape index: {}]   ;;  %s10448_s9 = inlined_call_operand.vmem [shape: f32[64,2048], index: 9, kind: input, shape index: {}]   ;;  %s10449_s10 = inlined_call_operand.vmem [shape: f32[1,2048], index: 10, kind: input, shape index: {}]   ;;  %s10450_s11 = inlined_call_operand.vmem [shape: f32[2048,64], index: 11, kind: input, shape index: {}]   ;;  %s10451_s12 = inlined_call_operand.vmem [shape: f32[1,64], index: 12, kind: input, shape index: {}]   ;;  %s10452_s13 = inlined_call_operand.vmem [shape: f32[1,64], index: 13, kind: input, shape index: {}]   ;;  %s10453_s14 = inlined_call_operand.vmem [shape: f32[1,64], index: 14, kind: input, shape index: {}]   ;;  %s10454_s15 = inlined_call_operand.vmem [shape: f32[1,64], index: 15, kind: input, shape index: {}]   ;;  %s10455_s16 = inlined_call_operand.vmem [shape: f32[1,64], index: 16, kind: input, shape index: {}]   ;;  %s10456_s17 = inlined_call_operand.hbm [shape: f32[2,8,64], index: 17, kind: output, shape index: {}]  }
   0x1   :  { %10464 = sst [smem:[#allocation11_spill]] %s10439_s0 }
   0x2   :  { %10465 = sst [smem:[#allocation12_spill]] %s10440_s1 }
   0x3   :  { %10466 = sst [smem:[#allocation13_spill]] %s10441_s2 }
   0x4   :  { %10467 = sst [smem:[#allocation14_spill]] %s10442_s3 }
   0x5   :  { %22 = vsyncpa [#allocation3], 0 }
   0x6   :  { %24 = vsyncpa [#allocation3 + $0x1], 0  ;;  %s7943_s24 = smov 0   ;;  %s7945_s25 = smov 0  }
   0x7   :  { %s7947_s26 = smov 0   ;;  %s7949_s27 = smov 0  }
   0x8 LB: > { %10468 = sst [smem:[#allocation5_spill]] %s7836_s24  ;;  %s7964_s28 = sadd.s32 4294967295, %s7848_s27   ;;  %s7848_s27 = sphi %s7949_s27, %s10483_s27   ;;  %s7844_s26 = sphi %s7947_s26, %s10485_s26   ;;  %s7840_s25 = sphi %s7945_s25, %s10487_s25   ;;  %s7836_s24 = sphi %s7943_s24, %s10486_s24  }
   0x9   : > { %10469 = sst [smem:[#allocation6_spill]] %s7844_s26  ;;  %s6290_s29 = sadd.s32 4294967294, %s7848_s27  }
   0xa   : > { %10470 = sst [smem:[#allocation7_spill]] %s7848_s27  ;;  %s7968_s0 = sadd.s32 1, %s7848_s27  }
   0xb   : > { %10471 = sst [smem:[#allocation8_spill]] %s7968_s0  ;;  %s399_s30 = sadd.s32 1, %s7844_s26 }
   0xc   : > { %s396_s18 = ssub.s32 %s7848_s27, %s7968_s0  ;;  %p409_p0 = scmp.ne.s32.totalorder %s7844_s26, %s7840_s25 }
   0xd   : > { %p397_p1 = scmp.eq.s32.totalorder %s396_s18, 0  ;;  %p410_p2 = scmp.eq.s32.totalorder %s7964_s28, 1 }
   0xe   : > { %p415_p3 = scmp.ne.s32.totalorder %s7840_s25, %s7836_s24  ;;  %p416_p4 = scmp.eq.s32.totalorder %s6290_s29, 1 }
   0xf   : > { %s7979_s19 = scalar_select %p397_p1, %s7844_s26, %s399_s30  }
  0x10   : > { %p7981_p5 = por %p410_p2, %p409_p0  ;;  %p7985_p6 = por %p416_p4, %p415_p3 }
  0x11   : > { %10472 = sst [smem:[#allocation9_spill]] %s7979_s19  ;;  %p6293_p7 = scmp.ge.s32.totalorder %s7848_s27, 1 }
  0x12   : > { %s10474_s20 = scalar_select %p7985_p6, 1, 0 }
  0x13   : > { %p489_p8 = scmp.lt.s32.totalorder %s7848_s27, 3 }
  0x14   : > { %10475 = sst [smem:[#allocation10_spill]] %s10474_s20 }
  0x15   : > { %p490_p9 = pnand %p6293_p7, %p489_p8 }
  0x16   : > { %s10476_s23 = sld [smem:[#allocation12_spill]] (!%p490_p9)  ;;  %p540_p10 = scmp.lt.s32.totalorder (!%p490_p9), %s7964_s28, 1 }
  0x17   : > { %493 = sbr.rel (%p490_p9) target bundleno = 8458 (0x210a), region = 88  ;;  %s10477_s2 = sld [smem:[#allocation13_spill]] (!%p490_p9) }
  0x18   : > { %s10478_s19 = sld [smem:[#allocation11_spill]] (!%p490_p9)  ;;  %s537_s20 = sand.u32 (!%p490_p9), 1, %s7840_s25  }
  0x19   : > { %s10479_s3 = sld [smem:[#allocation14_spill]] (!%p490_p9)  ;;  %s6294_s27 = sshll.u32 (!%p490_p9), %s537_s20, 3 }
  0x1a   : > { %s6587_s26 = sshll.u32 (!%p490_p9), %s7964_s28, 7  ;;  %s539_s0 = scalar_lea.vmem (!%p490_p9), [#allocation2], %s6294_s27 }
  0x1b   : > { %s7852_s29 = smov (!%p490_p9), [#allocation2]  }
  0x1c   : > { %v552_v0 = vld [vmem:[%s10476_s23 + $0x38] sm:$0xff]  ;;  %v7850_v2 = vmov 0.0   ;;  %v551_v3 = vld [vmem:[%s10476_s23 + $0x30] sm:$0xff]  ;;  %v550_v5 = vld [vmem:[%s10476_s23 + $0x28] sm:$0xff]  ;;  %s541_s21 = scalar_select %p540_p10, %s7964_s28, 1  ;;  %vm560_vm0 = vcmask 523264  }
  0x1d   : > { %v641_v1 = vld [vmem:[%s10477_s2 + $0x38] sm:$0xff]  ;;  %7134 = vmatprep.subr.mxu0 %v7850_v2  ;;  %7153 = vmatprep.subr.mxu1 %v7850_v2  ;;  %v640_v4 = vld [vmem:[%s10477_s2 + $0x30] sm:$0xff]  ;;  %v639_v6 = vld [vmem:[%s10477_s2 + $0x28] sm:$0xff]  ;;  %vm7851_vm1 = vmmov 0   ;;  %vm805_vm2 = vcmask 64512   ;;  %s7792_s30 = sshll.u32 %s7852_s29, 4  ;;  %s7793_s30 = int_to_ptr.vmem [resolvable:$false] %s7792_s30 }
  0x1e   : > { %7135 = vmatpush3.msra.mxu0 %v552_v0  ;;  %7154 = vmatpush3.msra.mxu1 %v641_v1  ;;  %v549_v7 = vld [vmem:[%s10476_s23 + $0x20] sm:$0xff]  ;;  %v548_v9 = vld [vmem:[%s10476_s23 + $0x18] sm:$0xff]  ;;  %v547_v11 = vld [vmem:[%s10476_s23 + $0x10] sm:$0xff]  ;;  %s6295_s22 = sshll.u32 %s541_s21, 3  ;;  %s7794_s28 = scalar_lea.vmem %s7793_s30, 256 }
  0x1f   : > { %7136 = vmatprep.subr.mxu0 %v7850_v2  ;;  %7155 = vmatprep.subr.mxu1 %v7850_v2  ;;  %v638_v8 = vld [vmem:[%s10477_s2 + $0x20] sm:$0xff]  ;;  %v637_v10 = vld [vmem:[%s10477_s2 + $0x18] sm:$0xff]  ;;  %v636_v12 = vld [vmem:[%s10477_s2 + $0x10] sm:$0xff]  ;;  %s8050_s21 = scalar_lea.vmem %s10478_s19, %s6295_s22  ;;  %s6231_s19 = sshll.u32 %s539_s0, 4  ;;  %s6232_s19 = int_to_ptr.vmem [resolvable:$true] %s6231_s19 }
  0x20   : > { %7137 = vmatpush3.msra.mxu0 %v551_v3  ;;  %7156 = vmatpush3.msra.mxu1 %v640_v4  ;;  %v546_v13 = vld [vmem:[%s10476_s23 + $0x8] sm:$0xff]  ;;  %v545_v15 = vld [vmem:[%s10476_s23] sm:$0xff]  ;;  %v726_v27 = vld [vmem:[%s10479_s3 + $0x38] sm:$0xff]  ;;  %s7788_s22 = scalar_lea.vmem %s6232_s19, 128  ;;  %p7795_p0 = scmp.lt.s32.totalorder %s6232_s19, %s7793_s30 }
  0x21   : > { %7138 = vmatprep.subr.mxu0 %v7850_v2  ;;  %7157 = vmatprep.subr.mxu1 %v7850_v2  ;;  %v635_v14 = vld [vmem:[%s10477_s2 + $0x8] sm:$0xff]  ;;  %v634_v16 = vld [vmem:[%s10477_s2] sm:$0xff]  ;;  %v725_v28 = vld [vmem:[%s10479_s3 + $0x30] sm:$0xff]  ;;  %p7789_p11 = scmp.ne.s32.totalorder %s6232_s19, %s7788_s22  ;;  %p7796_p1 = scmp.lt.s32.totalorder %s7794_s28, %s7788_s22 }
  0x22   : > { %7139 = vmatpush3.msra.mxu0 %v550_v5  ;;  %7158 = vmatpush3.msra.mxu1 %v639_v6  ;;  %v8063_v17 = vld [vmem:[%s8050_s21] sm:$0xff]  ;;  %v724_v29 = vld [vmem:[%s10479_s3 + $0x28] sm:$0xff]  ;;  %v722_v31 = vld [vmem:[%s10479_s3 + $0x18] sm:$0xff] }
  0x23   : > { %7140 = vmatprep.subr.mxu0 %v7850_v2  ;;  %7159 = vmatprep.subr.mxu1 %v7850_v2  ;;  %v6296_v18 = vld [vmem:[%s10443_s4] ss:$0 sm:$0xff]  ;;  %v721_v32 = vld [vmem:[%s10479_s3 + $0x10] sm:$0xff]  ;;  %v720_v33 = vld [vmem:[%s10479_s3 + $0x8] sm:$0xff]  ;;  %p7790_p12 = pnand %p7789_p11, %p7981_p5  ;;  %p7797_p2 = por %p7796_p1, %p7795_p0 }
  0x24   : > { %7141 = vmatpush3.msra.mxu0 %v549_v7  ;;  %7160 = vmatpush3.msra.mxu1 %v638_v8  ;;  %v6298_v19 = vld [vmem:[%s10444_s5] ss:$0 sm:$0xff]  ;;  %v6323_v45 = vld [vmem:[%s10477_s2 + $0x78] sm:$0xff]  ;;  %v6322_v46 = vld [vmem:[%s10477_s2 + $0x70] sm:$0xff] }
  0x25   : > { %7142 = vmatprep.subr.mxu0 %v7850_v2  ;;  %7161 = vmatprep.subr.mxu1 %v7850_v2  ;;  %v723_v30 = vld [vmem:[%s10479_s3 + $0x20] sm:$0xff]  ;;  %v6321_v49 = vld [vmem:[%s10477_s2 + $0x68] sm:$0xff]  ;;  %v6319_v51 = vld [vmem:[%s10477_s2 + $0x58] sm:$0xff]  ;;  %p7791_p13 = pneg %p7790_p12 }
  0x26   : > { %7143 = vmatpush3.msra.mxu0 %v548_v9  ;;  %7162 = vmatpush3.msra.mxu1 %v637_v10  ;;  %v719_v34 = vld [vmem:[%s10479_s3] sm:$0xff]  ;;  %v6318_v52 = vld [vmem:[%s10477_s2 + $0x50] sm:$0xff]  ;;  %v6317_v53 = vld [vmem:[%s10477_s2 + $0x48] sm:$0xff] }
  0x27   : > { %7144 = vmatprep.subr.mxu0 %v7850_v2  ;;  %7163 = vmatprep.subr.mxu1 %v7850_v2  ;;  %v6300_v43 = vld [vmem:[%s10445_s6] ss:$0 sm:$0xff]  ;;  %v6312_v58 = vld [vmem:[%s10476_s23 + $0x78] sm:$0xff]  ;;  %v6311_v59 = vld [vmem:[%s10476_s23 + $0x70] sm:$0xff]  ;;  %p7798_p3 = pnand %p7797_p2, %p7791_p13 }
  0x28   : > { %7145 = vmatpush3.msra.mxu0 %v547_v11  ;;  %7164 = vmatpush3.msra.mxu1 %v636_v12  ;;  %v6320_v50 = vld [vmem:[%s10477_s2 + $0x60] sm:$0xff]  ;;  %v6310_v60 = vld [vmem:[%s10476_s23 + $0x68] sm:$0xff]  ;;  %v6308_v62 = vld [vmem:[%s10476_s23 + $0x58] sm:$0xff] }
  0x29   : > { %7146 = vmatprep.subr.mxu0 %v7850_v2  ;;  %7165 = vmatprep.subr.mxu1 %v7850_v2  ;;  %v6316_v54 = vld [vmem:[%s10477_s2 + $0x40] sm:$0xff]  ;;  %v6307_v63 = vld [vmem:[%s10476_s23 + $0x50] sm:$0xff]  ;;  %v6306_v0 = vld [vmem:[%s10476_s23 + $0x48] sm:$0xff] }
  0x2a   : > { %7147 = vmatpush3.msra.mxu0 %v546_v13  ;;  %7166 = vmatpush3.msra.mxu1 %v635_v14  ;;  %v6309_v61 = vld [vmem:[%s10476_s23 + $0x60] sm:$0xff]  ;;  %v6334_v3 = vld [vmem:[%s10479_s3 + $0x78] sm:$0xff]  ;;  %v6333_v4 = vld [vmem:[%s10479_s3 + $0x70] sm:$0xff] }
  0x2b   : > { %7148 = vmatprep.subr.mxu0 %v7850_v2  ;;  %7167 = vmatprep.subr.mxu1 %v7850_v2  ;;  %v6305_v1 = vld [vmem:[%s10476_s23 + $0x40] sm:$0xff]  ;;  %v6332_v5 = vld [vmem:[%s10479_s3 + $0x68] sm:$0xff]  ;;  %v6330_v7 = vld [vmem:[%s10479_s3 + $0x58] sm:$0xff] }
  0x2c   : > { %7149 = vmatpush3.msra.mxu0 %v545_v15  ;;  %7150 = vmatprep.mubr.msk.f32.mxu0 %vm7851_vm1, %v7850_v2  ;;  %v6331_v6 = vld [vmem:[%s10479_s3 + $0x60] sm:$0xff]  ;;  %v6329_v8 = vld [vmem:[%s10479_s3 + $0x50] sm:$0xff]  ;;  %v6328_v9 = vld [vmem:[%s10479_s3 + $0x48] sm:$0xff] }
  0x2d   : > { %7168 = vmatpush3.msra.mxu1 %v634_v16  ;;  %7169 = vmatprep.mubr.msk.f32.mxu1 %vm7851_vm1, %v7850_v2  ;;  %v6327_v10 = vld [vmem:[%s10479_s3 + $0x40] sm:$0xff] }
  0x2e   : > { %7151 = vmatmul.mubr.msk.f32.vlgmr.msra.gmra.mxu0 %vm560_vm0, %v8063_v17  ;;  %7170 = vmatmul.mubr.msk.f32.vlgmr.msra.gmra.mxu1 %vm560_vm0, %v8063_v17  ;;  %v966_v11 = vld [vmem:[%s10446_s7] sm:$0xff] }
  0x2f   : > { %7191 = vmatprep.subr.mxu1 %v7850_v2  ;;  %7193 = vmatprep.mubr.msk.f32.mxu1 %vm7851_vm1, %v7850_v2  ;;  %v6325_v12 = vld [vmem:[%s10444_s5 + $0x1] ss:$0 sm:$0xff] }
  0x30   : > { %7172 = vmatprep.subr.mxu0 %v7850_v2  ;;  %7188 = vmatprep.mubr.msk.f32.mxu0 %vm7851_vm1, %v7850_v2 }
  0x31   : > { %7173 = vmatpush3.msra.mxu0 %v726_v27 }
  0x32   : > { %7174 = vmatprep.subr.mxu0 %v7850_v2 }
  0x33   : > { %7175 = vmatpush3.msra.mxu0 %v725_v28 }
  0x34   : > { %7176 = vmatprep.subr.mxu0 %v7850_v2 }
  0x35   : > { %7177 = vmatpush3.msra.mxu0 %v724_v29 }
  0x36   : > { %7178 = vmatprep.subr.mxu0 %v7850_v2 }
  0x37   : > { %7179 = vmatpush3.msra.mxu0 %v723_v30 }
  0x38   : > { %7180 = vmatprep.subr.mxu0 %v7850_v2 }
  0x39   : > { %7181 = vmatpush3.msra.mxu0 %v722_v31 }
  0x3a   : > { %7182 = vmatprep.subr.mxu0 %v7850_v2 }
  0x3b   : > { %7183 = vmatpush3.msra.mxu0 %v721_v32 }
  0x3c   : > { %7184 = vmatprep.subr.mxu0 %v7850_v2 }
  0x3d   : > { %7185 = vmatpush3.msra.mxu0 %v720_v33 }
  0x3e   : > { %7186 = vmatprep.subr.mxu0 %v7850_v2 }
  0x3f   : > { %7187 = vmatpush3.msra.mxu0 %v719_v34 }
  0x40   : > { %7189 = vmatmul.mubr.msk.f32.vlgmr.msra.gmra.mxu0 %vm560_vm0, %v8063_v17  ;;  %7220 = vmatprep.subr.mxu0 %v7850_v2 }
  0x41   : > { %7236 = vmatprep.mubr.msk.f32.mxu0 %vm7851_vm1, %v7850_v2  ;;  %7221 = vmatpush3.msra.mxu0 %v6323_v45  ;;  %v6359_v45 = vld [vmem:[%s10477_s2 + $0xa0] sm:$0xff] }
  0x42   : > { %7222 = vmatprep.subr.mxu0 %v7850_v2 }
  0x43   : > { %7223 = vmatpush3.msra.mxu0 %v6322_v46  ;;  %v6358_v46 = vld [vmem:[%s10477_s2 + $0x98] sm:$0xff] }
  0x44   : > { %7224 = vmatprep.subr.mxu0 %v7850_v2 }
  0x45   : > { %7225 = vmatpush3.msra.mxu0 %v6321_v49  ;;  %v6355_v49 = vld [vmem:[%s10477_s2 + $0x80] sm:$0xff] }
  0x46   : > { %7226 = vmatprep.subr.mxu0 %v7850_v2 }
  0x47   : > { %7227 = vmatpush3.msra.mxu0 %v6320_v50  ;;  %v6351_v50 = vld [vmem:[%s10476_s23 + $0xb8] sm:$0xff] }
  0x48   : > { %7228 = vmatprep.subr.mxu0 %v7850_v2 }
  0x49   : > { %7229 = vmatpush3.msra.mxu0 %v6319_v51 }
  0x4a   : > { %7230 = vmatprep.subr.mxu0 %v7850_v2 }
  0x4b   : > { %7231 = vmatpush3.msra.mxu0 %v6318_v52  ;;  %v6350_v52 = vld [vmem:[%s10476_s23 + $0xb0] sm:$0xff] }
  0x4c   : > { %7232 = vmatprep.subr.mxu0 %v7850_v2 }
  0x4d   : > { %7233 = vmatpush3.msra.mxu0 %v6317_v53 }
  0x4e   : > { %7234 = vmatprep.subr.mxu0 %v7850_v2 }
  0x4f   : > { %7235 = vmatpush3.msra.mxu0 %v6316_v54  ;;  %v6349_v54 = vld [vmem:[%s10476_s23 + $0xa8] sm:$0xff] }
  0x50   : > { %7237 = vmatmul.mubr.msk.f32.vlgmr.msra.gmra.mxu0 %vm560_vm0, %v8063_v17  ;;  %7258 = vmatprep.subr.mxu0 %v7850_v2 }
  0x51   : > { %7260 = vmatprep.mubr.msk.f32.mxu0 %vm7851_vm1, %v7850_v2 }
  0xee   : > { %v630_v20 = vpop.f32.mrf.mxu0  ;;  %v715_v21 = vpop.f32.mrf.mxu1 }
  0xef   : > { %v631_v22 = vadd.f32 %v6296_v18, %v630_v20  ;;  %v716_v23 = vadd.f32 %v6298_v19, %v715_v21  ;;  %v6314_v19 = vld [vmem:[%s10443_s4 + $0x1] ss:$0 sm:$0xff] }
  0xf0   : > { %v7152_v24 = vpop.f32.mrf.mxu0  ;;  %v7171_v25 = vpop.f32.mrf.mxu1 }
  0xf1   : > { %v804_v26 = vmul.f32 0.35355338, %v631_v22  ;;  %7192 = vmatpush3.xpose.msk.msra.mxu1 %vm805_vm2, %v716_v23  ;;  %v6336_v24 = vld [vmem:[%s10445_s6 + $0x1] ss:$0 sm:$0xff] }
  0xf2   : > { %7196 = vmatprep.subr.mxu1 %v7850_v2 }
  0xf4   : > { %7194 = vmatmul.mubr.msk.f32.vlgmr.msra.gmra.mxu1 %vm805_vm2, %v804_v26 }
  0xf5   : > { %7198 = vmatprep.mubr.msk.f32.mxu1 %vm7851_vm1, %v7850_v2 }
 0x100   : > { %v800_v44 = vpop.f32.mrf.mxu0 }
 0x101   : > { %v801_v47 = vadd.f32 %v6300_v43, %v800_v44  ;;  %v6361_v43 = vld [vmem:[%s10477_s2 + $0xb0] sm:$0xff]  ;;  %v6360_v44 = vld [vmem:[%s10477_s2 + $0xa8] sm:$0xff] }
 0x102   : > { %v7190_v48 = vpop.f32.mrf.mxu0 }
 0x103   : > { %7197 = vmatpush3.msra.mxu1 %v801_v47  ;;  %v6357_v47 = vld [vmem:[%s10477_s2 + $0x90] sm:$0xff]  ;;  %v6356_v48 = vld [vmem:[%s10477_s2 + $0x88] sm:$0xff] }
 0x104   : > { %7201 = vmatprep.subr.mxu1 %v7850_v2 }
 0x110   : > { %v1137_v13 = vpop.f32.mrf.mxu0 }
 0x111   : > { %v1138_v14 = vadd.f32 %v6325_v12, %v1137_v13  ;;  %v6369_v12 = vld [vmem:[%s10479_s3 + $0x98] sm:$0xff]  ;;  %v6368_v13 = vld [vmem:[%s10479_s3 + $0x90] sm:$0xff] }
 0x112   : > { %v7238_v15 = vpop.f32.mrf.mxu0 }
 0x113   : > { %7259 = vmatpush3.xpose.msk.msra.mxu0 %vm805_vm2, %v1138_v14  ;;  %v6367_v14 = vld [vmem:[%s10479_s3 + $0x88] sm:$0xff]  ;;  %v6366_v15 = vld [vmem:[%s10479_s3 + $0x80] sm:$0xff] }
 0x114   : > { %7263 = vmatprep.subr.mxu0 %v7850_v2 }
 0x1b4   : > { %v878_v35 = vpop.f32.mrf.mxu1 }
 0x1b5   : > { %v882_v36 = vsel %vm805_vm2, %v878_v35, -inf }
 0x1b6   : > { %883 = vmax.xlane.f32.xlu0 %v882_v36  ;;  %v7195_v37 = vpop.f32.mrf.mxu1 }
 0x23f   : > { %v884_v38 = vpop.xlane.xlu0 %883 }
 0x240   : > { %v885_v39 = vsub.f32 %v878_v35, %v884_v38  ;;  %v6362_v38 = vld [vmem:[%s10477_s2 + $0xb8] sm:$0xff] }
 0x242   : > { %v886_v40 = vmul.f32 1.442695, %v885_v39 }
 0x244   : > { %7751 = vpow2.f32 %v886_v40 }
 0x251   : > { %v7752_v41 = vpop.eup %7751 }
 0x252   : > { %v888_v42 = vsel %vm805_vm2, %v7752_v41, 0.0 }
 0x253   : > { %889 = vadd.xlane.f32.xlu0 %v888_v42  ;;  %v6341_v42 = vld [vmem:[%s10446_s7 + $0x8] sm:$0xff] }
 0x2dc   : > { %v890_v55 = vpop.xlane.xlu0 %889 }
 0x2dd   : > { %7753 = vrcp.f32 %v890_v55  ;;  %v6348_v55 = vld [vmem:[%s10476_s23 + $0xa0] sm:$0xff] }
 0x2ea   : > { %v7754_v56 = vpop.eup %7753 }
 0x2eb   : > { %v892_v57 = vmul.f32 %v7754_v56, %v7752_v41  ;;  %v6347_v56 = vld [vmem:[%s10476_s23 + $0x98] sm:$0xff] }
 0x2ed   : > { %7199 = vmatmul.mubr.msk.f32.vlgmr.msra.gmra.mxu1 %vm805_vm2, %v892_v57  ;;  %v6346_v57 = vld [vmem:[%s10476_s23 + $0x90] sm:$0xff] }
 0x2ee   : > { %7202 = vmatpush3.msra.mxu1 %v6312_v58  ;;  %7217 = vmatprep.mubr.msk.f32.mxu1 %vm7851_vm1, %v7850_v2  ;;  %v6345_v58 = vld [vmem:[%s10476_s23 + $0x88] sm:$0xff] }
 0x2ef   : > { %7203 = vmatprep.subr.mxu1 %v7850_v2 }
 0x2f0   : > { %7204 = vmatpush3.msra.mxu1 %v6311_v59  ;;  %v6344_v59 = vld [vmem:[%s10476_s23 + $0x80] sm:$0xff] }
 0x2f1   : > { %7205 = vmatprep.subr.mxu1 %v7850_v2 }
 0x2f2   : > { %7206 = vmatpush3.msra.mxu1 %v6310_v60  ;;  %v6364_v60 = vld [vmem:[%s10444_s5 + $0x2] ss:$0 sm:$0xff] }
 0x2f3   : > { %7207 = vmatprep.subr.mxu1 %v7850_v2 }
 0x2f4   : > { %7208 = vmatpush3.msra.mxu1 %v6309_v61 }
 0x2f5   : > { %7209 = vmatprep.subr.mxu1 %v7850_v2 }
 0x2f6   : > { %7210 = vmatpush3.msra.mxu1 %v6308_v62 }
 0x2f7   : > { %7211 = vmatprep.subr.mxu1 %v7850_v2 }
 0x2f8   : > { %7212 = vmatpush3.msra.mxu1 %v6307_v63 }
 0x2f9   : > { %7213 = vmatprep.subr.mxu1 %v7850_v2 }
 0x2fa   : > { %7214 = vmatpush3.msra.mxu1 %v6306_v0 }
 0x2fb   : > { %7215 = vmatprep.subr.mxu1 %v7850_v2 }
 0x2fc   : > { %7216 = vmatpush3.msra.mxu1 %v6305_v1 }
 0x2fd   : > { %7218 = vmatmul.mubr.msk.f32.vlgmr.msra.gmra.mxu1 %vm560_vm0, %v8063_v17  ;;  %7239 = vmatprep.subr.mxu1 %v7850_v2 }
 0x2fe   : > { %7240 = vmatpush3.msra.mxu1 %v6334_v3  ;;  %7255 = vmatprep.mubr.msk.f32.mxu1 %vm7851_vm1, %v7850_v2  ;;  %v6353_v3 = vld [vmem:[%s10443_s4 + $0x2] ss:$0 sm:$0xff] }
 0x2ff   : > { %7241 = vmatprep.subr.mxu1 %v7850_v2 }
 0x300   : > { %7242 = vmatpush3.msra.mxu1 %v6333_v4 }
 0x301   : > { %7243 = vmatprep.subr.mxu1 %v7850_v2 }
 0x302   : > { %7244 = vmatpush3.msra.mxu1 %v6332_v5 }
 0x303   : > { %7245 = vmatprep.subr.mxu1 %v7850_v2 }
 0x304   : > { %7246 = vmatpush3.msra.mxu1 %v6331_v6 }
 0x305   : > { %7247 = vmatprep.subr.mxu1 %v7850_v2 }
 0x306   : > { %7248 = vmatpush3.msra.mxu1 %v6330_v7 }
 0x307   : > { %7249 = vmatprep.subr.mxu1 %v7850_v2 }
 0x308   : > { %7250 = vmatpush3.msra.mxu1 %v6329_v8  ;;  %v6373_v8 = vld [vmem:[%s10479_s3 + $0xb8] sm:$0xff] }
 0x309   : > { %7251 = vmatprep.subr.mxu1 %v7850_v2 }
 0x30a   : > { %7252 = vmatpush3.msra.mxu1 %v6328_v9  ;;  %v6372_v9 = vld [vmem:[%s10479_s3 + $0xb0] sm:$0xff] }
 0x30b   : > { %7253 = vmatprep.subr.mxu1 %v7850_v2 }
 0x30c   : > { %7254 = vmatpush3.msra.mxu1 %v6327_v10  ;;  %v6371_v10 = vld [vmem:[%s10479_s3 + $0xa8] sm:$0xff] }
 0x30d   : > { %7256 = vmatmul.mubr.msk.f32.vlgmr.msra.gmra.mxu1 %vm560_vm0, %v8063_v17  ;;  %7273 = vmatprep.subr.mxu1 %v7850_v2 }
 0x30e   : > { %7275 = vmatprep.mubr.msk.f32.mxu1 %vm7851_vm1, %v7850_v2  ;;  %7274 = vmatpush3.msra.mxu1 %v966_v11  ;;  %v6370_v11 = vld [vmem:[%s10479_s3 + $0xa0] sm:$0xff] }
 0x30f   : > { %7297 = vmatprep.subr.mxu1 %v7850_v2 }
 0x3ad   : > { %v962_v16 = vpop.f32.mrf.mxu1 }
 0x3ae   : > { %7276 = vmatmul.mubr.msk.f32.vlgmr.msra.gmra.mxu1 %vm805_vm2, %v962_v16 }
 0x3af   : > { %v7200_v18 = vpop.f32.mrf.mxu1  ;;  %7313 = vmatprep.mubr.msk.f32.mxu1 %vm7851_vm1, %v7850_v2  ;;  %7298 = vmatpush3.msra.mxu1 %v6362_v38  ;;  %v6396_v38 = vld [vmem:[%s10477_s2 + $0xd8] sm:$0xff] }
 0x3b0   : > { %7299 = vmatprep.subr.mxu1 %v7850_v2 }
 0x3b1   : > { %7300 = vmatpush3.msra.mxu1 %v6361_v43 }
 0x3b2   : > { %7301 = vmatprep.subr.mxu1 %v7850_v2 }
 0x3b3   : > { %7302 = vmatpush3.msra.mxu1 %v6360_v44  ;;  %v6388_v44 = vld [vmem:[%s10476_s23 + $0xf0] sm:$0xff] }
 0x3b4   : > { %7303 = vmatprep.subr.mxu1 %v7850_v2 }
 0x3b5   : > { %7304 = vmatpush3.msra.mxu1 %v6359_v45 }
 0x3b6   : > { %7305 = vmatprep.subr.mxu1 %v7850_v2 }
 0x3b7   : > { %7306 = vmatpush3.msra.mxu1 %v6358_v46  ;;  %v6387_v46 = vld [vmem:[%s10476_s23 + $0xe8] sm:$0xff] }
 0x3b8   : > { %7307 = vmatprep.subr.mxu1 %v7850_v2 }
 0x3b9   : > { %7308 = vmatpush3.msra.mxu1 %v6357_v47  ;;  %v6386_v47 = vld [vmem:[%s10476_s23 + $0xe0] sm:$0xff] }
 0x3ba   : > { %7309 = vmatprep.subr.mxu1 %v7850_v2 }
 0x3bb   : > { %7310 = vmatpush3.msra.mxu1 %v6356_v48  ;;  %v6385_v48 = vld [vmem:[%s10476_s23 + $0xd8] sm:$0xff] }
 0x3bc   : > { %7311 = vmatprep.subr.mxu1 %v7850_v2 }
 0x3bd   : > { %v1050_v20 = vpop.f32.mrf.mxu1  ;;  %7312 = vmatpush3.msra.mxu1 %v6355_v49  ;;  %v6384_v49 = vld [vmem:[%s10476_s23 + $0xd0] sm:$0xff] }
 0x3be   : > { %v1051_v21 = vadd.f32 %v6314_v19, %v1050_v20  ;;  %7314 = vmatmul.mubr.msk.f32.vlgmr.msra.gmra.mxu1 %vm560_vm0, %v8063_v17  ;;  %7335 = vmatprep.subr.mxu1 %v7850_v2 }
 0x3bf   : > { %v7219_v22 = vpop.f32.mrf.mxu1  ;;  %7337 = vmatprep.mubr.msk.f32.mxu1 %vm7851_vm1, %v7850_v2 }
 0x3c0   : > { %v1228_v23 = vmul.f32 0.35355338, %v1051_v21 }
 0x3c2   : > { %7261 = vmatmul.mubr.msk.f32.vlgmr.msra.gmra.mxu0 %vm805_vm2, %v1228_v23 }
 0x3c3   : > { %7265 = vmatprep.mubr.msk.f32.mxu0 %vm7851_vm1, %v7850_v2 }
 0x3cd   : > { %v1224_v25 = vpop.f32.mrf.mxu1 }
 0x3ce   : > { %v1225_v26 = vadd.f32 %v6336_v24, %v1224_v25  ;;  %v6375_v25 = vld [vmem:[%s10445_s6 + $0x2] ss:$0 sm:$0xff] }
 0x3cf   : > { %v7257_v27 = vpop.f32.mrf.mxu1 }
 0x3d0   : > { %7264 = vmatpush3.msra.mxu0 %v1225_v26 }
 0x3d1   : > { %7268 = vmatprep.subr.mxu0 %v7850_v2 }
 0x46e   : > { %v8265_v28 = vpop.f32.mrf.mxu1 }
 0x470   : > { %v7277_v29 = vpop.f32.mrf.mxu1 }
 0x47e   : > { %v1707_v61 = vpop.f32.mrf.mxu1 }
 0x47f   : > { %v1708_v62 = vadd.f32 %v6364_v60, %v1707_v61  ;;  %v6391_v60 = vld [vmem:[%s10443_s4 + $0x3] ss:$0 sm:$0xff] }
 0x480   : > { %v7315_v63 = vpop.f32.mrf.mxu1 }
 0x481   : > { %7336 = vmatpush3.xpose.msk.msra.mxu1 %vm805_vm2, %v1708_v62 }
 0x482   : > { %v1301_v30 = vpop.f32.mrf.mxu0  ;;  %7340 = vmatprep.subr.mxu1 %v7850_v2 }
 0x483   : > { %v1305_v31 = vsel %vm805_vm2, %v1301_v30, -inf }
 0x484   : > { %1306 = vmax.xlane.f32.xlu1 %v1305_v31  ;;  %v7262_v32 = vpop.f32.mrf.mxu0 }
 0x50d   : > { %v1307_v33 = vpop.xlane.xlu1 %1306 }
 0x50e   : > { %v1308_v34 = vsub.f32 %v1301_v30, %v1307_v33  ;;  %v6400_v30 = vld [vmem:[%s10477_s2 + $0xf8] sm:$0xff] }
 0x510   : > { %v1309_v35 = vmul.f32 1.442695, %v1308_v34  ;;  %v6380_v34 = vld [vmem:[%s10446_s7 + $0x10] sm:$0xff] }
 0x512   : > { %7755 = vpow2.f32 %v1309_v35  ;;  %v6399_v35 = vld [vmem:[%s10477_s2 + $0xf0] sm:$0xff] }
 0x51f   : > { %v7756_v36 = vpop.eup %7755 }
 0x520   : > { %v1311_v37 = vsel %vm805_vm2, %v7756_v36, 0.0 }
 0x521   : > { %1312 = vadd.xlane.f32.xlu1 %v1311_v37  ;;  %v6397_v37 = vld [vmem:[%s10477_s2 + $0xe0] sm:$0xff] }
 0x5aa   : > { %v1313_v39 = vpop.xlane.xlu1 %1312 }
 0x5ab   : > { %7757 = vrcp.f32 %v1313_v39  ;;  %v6395_v39 = vld [vmem:[%s10477_s2 + $0xd0] sm:$0xff] }
 0x5b8   : > { %v7758_v40 = vpop.eup %7757 }
 0x5b9   : > { %v1315_v41 = vmul.f32 %v7758_v40, %v7756_v36  ;;  %v6398_v36 = vld [vmem:[%s10477_s2 + $0xe8] sm:$0xff] }
 0x5ba   : > { %v6394_v40 = vld [vmem:[%s10477_s2 + $0xc8] sm:$0xff] }
 0x5bb   : > { %7266 = vmatmul.mubr.msk.f32.vlgmr.msra.gmra.mxu0 %vm805_vm2, %v1315_v41  ;;  %v6393_v41 = vld [vmem:[%s10477_s2 + $0xc0] sm:$0xff] }
 0x5bc   : > { %7269 = vmatpush3.msra.mxu0 %v6341_v42  ;;  %7270 = vmatprep.mubr.msk.f32.mxu0 %vm7851_vm1, %v7850_v2  ;;  %v6389_v42 = vld [vmem:[%s10476_s23 + $0xf8] sm:$0xff] }
 0x5bd   : > { %7278 = vmatprep.subr.mxu0 %v7850_v2 }
 0x67b   : > { %v1385_v51 = vpop.f32.mrf.mxu0 }
 0x67c   : > { %7271 = vmatmul.mubr.msk.f32.vlgmr.msra.gmra.mxu0 %vm805_vm2, %v1385_v51  ;;  %v6382_v51 = vld [vmem:[%s10476_s23 + $0xc0] sm:$0xff] }
 0x67d   : > { %7279 = vmatpush3.msra.mxu0 %v6351_v50  ;;  %v7267_v53 = vpop.f32.mrf.mxu0  ;;  %7294 = vmatprep.mubr.msk.f32.mxu0 %vm7851_vm1, %v7850_v2  ;;  %v6383_v50 = vld [vmem:[%s10476_s23 + $0xc8] sm:$0xff] }
 0x67e   : > { %7280 = vmatprep.subr.mxu0 %v7850_v2 }
 0x67f   : > { %7281 = vmatpush3.msra.mxu0 %v6350_v52  ;;  %v6402_v52 = vld [vmem:[%s10444_s5 + $0x3] ss:$0 sm:$0xff] }
 0x680   : > { %7282 = vmatprep.subr.mxu0 %v7850_v2 }
 0x681   : > { %7283 = vmatpush3.msra.mxu0 %v6349_v54 }
 0x682   : > { %7284 = vmatprep.subr.mxu0 %v7850_v2 }
 0x683   : > { %7285 = vmatpush3.msra.mxu0 %v6348_v55 }
 0x684   : > { %7286 = vmatprep.subr.mxu0 %v7850_v2 }
 0x685   : > { %7287 = vmatpush3.msra.mxu0 %v6347_v56 }
 0x686   : > { %7288 = vmatprep.subr.mxu0 %v7850_v2 }
 0x687   : > { %7289 = vmatpush3.msra.mxu0 %v6346_v57 }
 0x688   : > { %7290 = vmatprep.subr.mxu0 %v7850_v2 }
 0x689   : > { %7291 = vmatpush3.msra.mxu0 %v6345_v58 }
 0x68a   : > { %7292 = vmatprep.subr.mxu0 %v7850_v2 }
 0x68b   : > { %7293 = vmatpush3.msra.mxu0 %v6344_v59 }
 0x68c   : > { %7295 = vmatmul.mubr.msk.f32.vlgmr.msra.gmra.mxu0 %vm560_vm0, %v8063_v17  ;;  %7316 = vmatprep.subr.mxu0 %v7850_v2 }
 0x68d   : > { %7332 = vmatprep.mubr.msk.f32.mxu0 %vm7851_vm1, %v7850_v2  ;;  %7317 = vmatpush3.msra.mxu0 %v6373_v8  ;;  %v6404_v8 = vld [vmem:[%s10479_s3 + $0xc0] sm:$0xff] }
 0x68e   : > { %7318 = vmatprep.subr.mxu0 %v7850_v2 }
 0x68f   : > { %7319 = vmatpush3.msra.mxu0 %v6372_v9 }
 0x690   : > { %7320 = vmatprep.subr.mxu0 %v7850_v2 }
 0x691   : > { %7321 = vmatpush3.msra.mxu0 %v6371_v10 }
 0x692   : > { %7322 = vmatprep.subr.mxu0 %v7850_v2 }
 0x693   : > { %7323 = vmatpush3.msra.mxu0 %v6370_v11 }
 0x694   : > { %7324 = vmatprep.subr.mxu0 %v7850_v2 }
 0x695   : > { %7325 = vmatpush3.msra.mxu0 %v6369_v12 }
 0x696   : > { %7326 = vmatprep.subr.mxu0 %v7850_v2 }
 0x697   : > { %7327 = vmatpush3.msra.mxu0 %v6368_v13 }
 0x698   : > { %7328 = vmatprep.subr.mxu0 %v7850_v2 }
 0x699   : > { %7329 = vmatpush3.msra.mxu0 %v6367_v14 }
 0x69a   : > { %7330 = vmatprep.subr.mxu0 %v7850_v2 }
 0x69b   : > { %7331 = vmatpush3.msra.mxu0 %v6366_v15 }
 0x69c   : > { %7333 = vmatmul.mubr.msk.f32.vlgmr.msra.gmra.mxu0 %vm560_vm0, %v8063_v17  ;;  %7369 = vmatprep.subr.mxu0 %v7850_v2 }
 0x69d   : > { %7385 = vmatprep.mubr.msk.f32.mxu0 %vm7851_vm1, %v7850_v2  ;;  %7370 = vmatpush3.msra.mxu0 %v6400_v30  ;;  %v6435_v30 = vld [vmem:[%s10477_s2 + $0x120] sm:$0xff] }
 0x69e   : > { %7371 = vmatprep.subr.mxu0 %v7850_v2 }
 0x69f   : > { %7372 = vmatpush3.msra.mxu0 %v6399_v35  ;;  %v6427_v35 = vld [vmem:[%s10476_s23 + $0x138] sm:$0xff] }
 0x6a0   : > { %7373 = vmatprep.subr.mxu0 %v7850_v2 }
 0x6a1   : > { %7374 = vmatpush3.msra.mxu0 %v6398_v36 }
 0x6a2   : > { %7375 = vmatprep.subr.mxu0 %v7850_v2 }
 0x6a3   : > { %7376 = vmatpush3.msra.mxu0 %v6397_v37  ;;  %v6426_v37 = vld [vmem:[%s10476_s23 + $0x130] sm:$0xff] }
 0x6a4   : > { %7377 = vmatprep.subr.mxu0 %v7850_v2 }
 0x6a5   : > { %7378 = vmatpush3.msra.mxu0 %v6396_v38 }
 0x6a6   : > { %7379 = vmatprep.subr.mxu0 %v7850_v2 }
 0x6a7   : > { %7380 = vmatpush3.msra.mxu0 %v6395_v39  ;;  %v6425_v39 = vld [vmem:[%s10476_s23 + $0x128] sm:$0xff] }
 0x6a8   : > { %7381 = vmatprep.subr.mxu0 %v7850_v2 }
 0x6a9   : > { %7382 = vmatpush3.msra.mxu0 %v6394_v40  ;;  %v6424_v40 = vld [vmem:[%s10476_s23 + $0x120] sm:$0xff] }
 0x6aa   : > { %7383 = vmatprep.subr.mxu0 %v7850_v2 }
 0x6ab   : > { %7384 = vmatpush3.msra.mxu0 %v6393_v41  ;;  %v6423_v41 = vld [vmem:[%s10476_s23 + $0x118] sm:$0xff] }
 0x6ac   : > { %7386 = vmatmul.mubr.msk.f32.vlgmr.msra.gmra.mxu0 %vm560_vm0, %v8063_v17  ;;  %7407 = vmatprep.subr.mxu0 %v7850_v2 }
 0x6ad   : > { %7409 = vmatprep.mubr.msk.f32.mxu0 %vm7851_vm1, %v7850_v2 }
 0x73c   : > { %v8356_v0 = vpop.f32.mrf.mxu0 }
 0x73d   : > { %v1534_v56 = vadd.f32 %v8265_v28, %v8356_v0  ;;  %v6411_v28 = vld [vmem:[%s10479_s3 + $0xf8] sm:$0xff]  ;;  %v6410_v0 = vld [vmem:[%s10479_s3 + $0xf0] sm:$0xff] }
 0x73e   : > { %v7272_v1 = vpop.f32.mrf.mxu0 }
 0x74c   : > { %v1620_v4 = vpop.f32.mrf.mxu0 }
 0x74d   : > { %v1621_v5 = vadd.f32 %v6353_v3, %v1620_v4  ;;  %v6409_v3 = vld [vmem:[%s10479_s3 + $0xe8] sm:$0xff]  ;;  %v6408_v4 = vld [vmem:[%s10479_s3 + $0xe0] sm:$0xff] }
 0x74e   : > { %v7296_v6 = vpop.f32.mrf.mxu0 }
 0x74f   : > { %v1798_v7 = vmul.f32 0.35355338, %v1621_v5  ;;  %v6407_v5 = vld [vmem:[%s10479_s3 + $0xd8] sm:$0xff]  ;;  %v6406_v6 = vld [vmem:[%s10479_s3 + $0xd0] sm:$0xff] }
 0x751   : > { %7338 = vmatmul.mubr.msk.f32.vlgmr.msra.gmra.mxu1 %vm805_vm2, %v1798_v7  ;;  %v6405_v7 = vld [vmem:[%s10479_s3 + $0xc8] sm:$0xff] }
 0x752   : > { %7342 = vmatprep.mubr.msk.f32.mxu1 %vm7851_vm1, %v7850_v2 }
 0x75c   : > { %v1794_v26 = vpop.f32.mrf.mxu0 }
 0x75d   : > { %v1795_v27 = vadd.f32 %v6375_v25, %v1794_v26  ;;  %v6418_v26 = vld [vmem:[%s10446_s7 + $0x18] sm:$0xff] }
 0x75e   : > { %v7334_v29 = vpop.f32.mrf.mxu0 }
 0x75f   : > { %7341 = vmatpush3.msra.mxu1 %v1795_v27  ;;  %v6437_v27 = vld [vmem:[%s10477_s2 + $0x130] sm:$0xff]  ;;  %v6436_v29 = vld [vmem:[%s10477_s2 + $0x128] sm:$0xff] }
 0x760   : > { %7345 = vmatprep.subr.mxu1 %v7850_v2 }
 0x76c   : > { %v2205_v53 = vpop.f32.mrf.mxu0 }
 0x76d   : > { %v2206_v54 = vadd.f32 %v6402_v52, %v2205_v53 }
 0x76e   : > { %v7387_v55 = vpop.f32.mrf.mxu0 }
 0x76f   : > { %7408 = vmatpush3.xpose.msk.msra.mxu0 %vm805_vm2, %v2206_v54 }
 0x770   : > { %7412 = vmatprep.subr.mxu0 %v7850_v2 }
 0x811   : > { %v1871_v16 = vpop.f32.mrf.mxu1 }
 0x812   : > { %v1875_v18 = vsel %vm805_vm2, %v1871_v16, -inf }
 0x813   : > { %1876 = vmax.xlane.f32.xlu0 %v1875_v18  ;;  %v7339_v19 = vpop.f32.mrf.mxu1  ;;  %v6413_v18 = vld [vmem:[%s10445_s6 + $0x3] ss:$0 sm:$0xff] }
 0x89c   : > { %v1877_v20 = vpop.xlane.xlu0 %1876 }
 0x89d   : > { %v1878_v21 = vsub.f32 %v1871_v16, %v1877_v20 }
 0x89f   : > { %v1879_v22 = vmul.f32 1.442695, %v1878_v21 }
 0x8a1   : > { %7759 = vpow2.f32 %v1879_v22  ;;  %v6438_v22 = vld [vmem:[%s10477_s2 + $0x138] sm:$0xff] }
 0x8ae   : > { %v7760_v23 = vpop.eup %7759 }
 0x8af   : > { %v1881_v24 = vsel %vm805_vm2, %v7760_v23, 0.0 }
 0x8b0   : > { %1882 = vadd.xlane.f32.xlu1 %v1881_v24 }
 0x939   : > { %v1883_v31 = vpop.xlane.xlu1 %1882 }
 0x93a   : > { %7761 = vrcp.f32 %v1883_v31  ;;  %v6434_v31 = vld [vmem:[%s10477_s2 + $0x118] sm:$0xff] }
 0x947   : > { %v7762_v32 = vpop.eup %7761 }
 0x948   : > { %v1885_v33 = vmul.f32 %v7762_v32, %v7760_v23  ;;  %v6433_v32 = vld [vmem:[%s10477_s2 + $0x110] sm:$0xff] }
 0x94a   : > { %7343 = vmatmul.mubr.msk.f32.vlgmr.msra.gmra.mxu1 %vm805_vm2, %v1885_v33  ;;  %v6432_v33 = vld [vmem:[%s10477_s2 + $0x108] sm:$0xff] }
 0x94b   : > { %7346 = vmatpush3.msra.mxu1 %v6380_v34  ;;  %7347 = vmatprep.mubr.msk.f32.mxu1 %vm7851_vm1, %v7850_v2  ;;  %v6431_v34 = vld [vmem:[%s10477_s2 + $0x100] sm:$0xff] }
 0x94c   : > { %7350 = vmatprep.subr.mxu1 %v7850_v2 }
 0xa0a   : > { %v1955_v43 = vpop.f32.mrf.mxu1 }
 0xa0b   : > { %7348 = vmatmul.mubr.msk.f32.vlgmr.msra.gmra.mxu1 %vm805_vm2, %v1955_v43  ;;  %v6421_v43 = vld [vmem:[%s10476_s23 + $0x108] sm:$0xff] }
 0xa0c   : > { %7351 = vmatpush3.msra.mxu1 %v6389_v42  ;;  %v7344_v45 = vpop.f32.mrf.mxu1  ;;  %7366 = vmatprep.mubr.msk.f32.mxu1 %vm7851_vm1, %v7850_v2  ;;  %v6422_v42 = vld [vmem:[%s10476_s23 + $0x110] sm:$0xff] }
 0xa0d   : > { %7352 = vmatprep.subr.mxu1 %v7850_v2  ;;  %v6440_v45 = vld [vmem:[%s10444_s5 + $0x4] ss:$0 sm:$0xff] }
 0xa0e   : > { %7353 = vmatpush3.msra.mxu1 %v6388_v44  ;;  %v6420_v44 = vld [vmem:[%s10476_s23 + $0x100] sm:$0xff] }
 0xa0f   : > { %7354 = vmatprep.subr.mxu1 %v7850_v2 }
 0xa10   : > { %7355 = vmatpush3.msra.mxu1 %v6387_v46 }
 0xa11   : > { %7356 = vmatprep.subr.mxu1 %v7850_v2 }
 0xa12   : > { %7357 = vmatpush3.msra.mxu1 %v6386_v47 }
 0xa13   : > { %7358 = vmatprep.subr.mxu1 %v7850_v2 }
 0xa14   : > { %7359 = vmatpush3.msra.mxu1 %v6385_v48 }
 0xa15   : > { %7360 = vmatprep.subr.mxu1 %v7850_v2 }
 0xa16   : > { %7361 = vmatpush3.msra.mxu1 %v6384_v49 }
 0xa17   : > { %7362 = vmatprep.subr.mxu1 %v7850_v2 }
 0xa18   : > { %7363 = vmatpush3.msra.mxu1 %v6383_v50 }
 0xa19   : > { %7364 = vmatprep.subr.mxu1 %v7850_v2 }
 0xa1a   : > { %7365 = vmatpush3.msra.mxu1 %v6382_v51  ;;  %v6429_v51 = vld [vmem:[%s10443_s4 + $0x4] ss:$0 sm:$0xff] }
 0xa1b   : > { %7367 = vmatmul.mubr.msk.f32.vlgmr.msra.gmra.mxu1 %vm560_vm0, %v8063_v17  ;;  %7388 = vmatprep.subr.mxu1 %v7850_v2 }
 0xa1c   : > { %7404 = vmatprep.mubr.msk.f32.mxu1 %vm7851_vm1, %v7850_v2  ;;  %7389 = vmatpush3.msra.mxu1 %v6411_v28 }
 0xa1d   : > { %7390 = vmatprep.subr.mxu1 %v7850_v2 }
 0xa1e   : > { %7391 = vmatpush3.msra.mxu1 %v6410_v0 }
 0xa1f   : > { %7392 = vmatprep.subr.mxu1 %v7850_v2 }
 0xa20   : > { %7393 = vmatpush3.msra.mxu1 %v6409_v3 }
 0xa21   : > { %7394 = vmatprep.subr.mxu1 %v7850_v2 }
 0xa22   : > { %7395 = vmatpush3.msra.mxu1 %v6408_v4 }
 0xa23   : > { %7396 = vmatprep.subr.mxu1 %v7850_v2 }
 0xa24   : > { %7397 = vmatpush3.msra.mxu1 %v6407_v5 }
 0xa25   : > { %7398 = vmatprep.subr.mxu1 %v7850_v2 }
 0xa26   : > { %7399 = vmatpush3.msra.mxu1 %v6406_v6 }
 0xa27   : > { %7400 = vmatprep.subr.mxu1 %v7850_v2 }
 0xa28   : > { %7401 = vmatpush3.msra.mxu1 %v6405_v7 }
 0xa29   : > { %7402 = vmatprep.subr.mxu1 %v7850_v2 }
 0xa2a   : > { %7403 = vmatpush3.msra.mxu1 %v6404_v8 }
 0xa2b   : > { %7405 = vmatmul.mubr.msk.f32.vlgmr.msra.gmra.mxu1 %vm560_vm0, %v8063_v17  ;;  %7441 = vmatprep.subr.mxu1 %v7850_v2 }
 0xa2c   : > { %7457 = vmatprep.mubr.msk.f32.mxu1 %vm7851_vm1, %v7850_v2  ;;  %7442 = vmatpush3.msra.mxu1 %v6438_v22  ;;  %v6472_v22 = vld [vmem:[%s10477_s2 + $0x158] sm:$0xff] }
 0xa2d   : > { %7443 = vmatprep.subr.mxu1 %v7850_v2 }
 0xa2e   : > { %7444 = vmatpush3.msra.mxu1 %v6437_v27 }
 0xa2f   : > { %7445 = vmatprep.subr.mxu1 %v7850_v2 }
 0xa30   : > { %7446 = vmatpush3.msra.mxu1 %v6436_v29  ;;  %v6464_v29 = vld [vmem:[%s10476_s23 + $0x170] sm:$0xff] }
 0xa31   : > { %7447 = vmatprep.subr.mxu1 %v7850_v2 }
 0xa32   : > { %7448 = vmatpush3.msra.mxu1 %v6435_v30 }
 0xa33   : > { %7449 = vmatprep.subr.mxu1 %v7850_v2 }
 0xa34   : > { %7450 = vmatpush3.msra.mxu1 %v6434_v31  ;;  %v6463_v31 = vld [vmem:[%s10476_s23 + $0x168] sm:$0xff] }
 0xa35   : > { %7451 = vmatprep.subr.mxu1 %v7850_v2 }
 0xa36   : > { %7452 = vmatpush3.msra.mxu1 %v6433_v32  ;;  %v6462_v32 = vld [vmem:[%s10476_s23 + $0x160] sm:$0xff] }
 0xa37   : > { %7453 = vmatprep.subr.mxu1 %v7850_v2 }
 0xa38   : > { %7454 = vmatpush3.msra.mxu1 %v6432_v33  ;;  %v6461_v33 = vld [vmem:[%s10476_s23 + $0x158] sm:$0xff] }
 0xa39   : > { %7455 = vmatprep.subr.mxu1 %v7850_v2 }
 0xa3a   : > { %7456 = vmatpush3.msra.mxu1 %v6431_v34  ;;  %v6460_v34 = vld [vmem:[%s10476_s23 + $0x150] sm:$0xff] }
 0xa3b   : > { %7458 = vmatmul.mubr.msk.f32.vlgmr.msra.gmra.mxu1 %vm560_vm0, %v8063_v17  ;;  %7479 = vmatprep.subr.mxu1 %v7850_v2 }
 0xa3c   : > { %7481 = vmatprep.mubr.msk.f32.mxu1 %vm7851_vm1, %v7850_v2 }
 0xacb   : > { %v2030_v57 = vpop.f32.mrf.mxu1 }
 0xacc   : > { %v8495_v58 = vadd.f32 %v2030_v57, %v1534_v56  ;;  %v6449_v56 = vld [vmem:[%s10479_s3 + $0x138] sm:$0xff]  ;;  %v6448_v57 = vld [vmem:[%s10479_s3 + $0x130] sm:$0xff] }
 0xacd   : > { %v7349_v59 = vpop.f32.mrf.mxu1 }
 0xace   : > { %v6446_v59 = vld [vmem:[%s10479_s3 + $0x120] sm:$0xff] }
 0xadb   : > { %v2118_v61 = vpop.f32.mrf.mxu1 }
 0xadc   : > { %v2119_v62 = vadd.f32 %v6391_v60, %v2118_v61  ;;  %v6445_v60 = vld [vmem:[%s10479_s3 + $0x118] sm:$0xff]  ;;  %v6444_v61 = vld [vmem:[%s10479_s3 + $0x110] sm:$0xff] }
 0xadd   : > { %v7368_v63 = vpop.f32.mrf.mxu1 }
 0xade   : > { %v2296_v1 = vmul.f32 0.35355338, %v2119_v62  ;;  %v6443_v62 = vld [vmem:[%s10479_s3 + $0x108] sm:$0xff]  ;;  %v6442_v63 = vld [vmem:[%s10479_s3 + $0x100] sm:$0xff] }
 0xae0   : > { %7410 = vmatmul.mubr.msk.f32.vlgmr.msra.gmra.mxu0 %vm805_vm2, %v2296_v1  ;;  %v8673_v1 = vld [vmem:[%s8050_s21] sm:$0xff] }
 0xae1   : > { %7414 = vmatprep.mubr.msk.f32.mxu0 %vm7851_vm1, %v7850_v2 }
 0xaeb   : > { %v2292_v19 = vpop.f32.mrf.mxu1 }
 0xaec   : > { %v2293_v20 = vadd.f32 %v6413_v18, %v2292_v19  ;;  %v6456_v18 = vld [vmem:[%s10446_s7 + $0x20] sm:$0xff]  ;;  %v6475_v19 = vld [vmem:[%s10477_s2 + $0x170] sm:$0xff] }
 0xaed   : > { %v7406_v21 = vpop.f32.mrf.mxu1 }
 0xaee   : > { %7413 = vmatpush3.msra.mxu0 %v2293_v20  ;;  %v6474_v20 = vld [vmem:[%s10477_s2 + $0x168] sm:$0xff]  ;;  %v6473_v21 = vld [vmem:[%s10477_s2 + $0x160] sm:$0xff] }
 0xaef   : > { %7417 = vmatprep.subr.mxu0 %v7850_v2 }
 0xafb   : > { %v2703_v46 = vpop.f32.mrf.mxu1 }
 0xafc   : > { %v2704_v47 = vadd.f32 %v6440_v45, %v2703_v46 }
 0xafd   : > { %v7459_v48 = vpop.f32.mrf.mxu1 }
 0xafe   : > { %7480 = vmatpush3.xpose.msk.msra.mxu1 %vm805_vm2, %v2704_v47 }
 0xaff   : > { %7484 = vmatprep.subr.mxu1 %v7850_v2 }
 0xba0   : > { %v2369_v9 = vpop.f32.mrf.mxu0 }
 0xba1   : > { %v2373_v10 = vsel %vm805_vm2, %v2369_v9, -inf }
 0xba2   : > { %2374 = vmax.xlane.f32.xlu0 %v2373_v10  ;;  %v7411_v11 = vpop.f32.mrf.mxu0 }
 0xc2b   : > { %v2375_v12 = vpop.xlane.xlu0 %2374 }
 0xc2c   : > { %v2376_v13 = vsub.f32 %v2369_v9, %v2375_v12  ;;  %v6451_v9 = vld [vmem:[%s10445_s6 + $0x4] ss:$0 sm:$0xff] }
 0xc2e   : > { %v2377_v14 = vmul.f32 1.442695, %v2376_v13  ;;  %v6476_v13 = vld [vmem:[%s10477_s2 + $0x178] sm:$0xff] }
 0xc30   : > { %7763 = vpow2.f32 %v2377_v14 }
 0xc3d   : > { %v7764_v15 = vpop.eup %7763 }
 0xc3e   : > { %v2379_v16 = vsel %vm805_vm2, %v7764_v15, 0.0 }
 0xc3f   : > { %2380 = vadd.xlane.f32.xlu1 %v2379_v16 }
 0xcc8   : > { %v2381_v23 = vpop.xlane.xlu1 %2380 }
 0xcc9   : > { %7765 = vrcp.f32 %v2381_v23  ;;  %v6471_v23 = vld [vmem:[%s10477_s2 + $0x150] sm:$0xff] }
 0xcd6   : > { %v7766_v24 = vpop.eup %7765 }
 0xcd7   : > { %v2383_v25 = vmul.f32 %v7766_v24, %v7764_v15  ;;  %v6470_v24 = vld [vmem:[%s10477_s2 + $0x148] sm:$0xff] }
 0xcd9   : > { %7415 = vmatmul.mubr.msk.f32.vlgmr.msra.gmra.mxu0 %vm805_vm2, %v2383_v25  ;;  %v6469_v25 = vld [vmem:[%s10477_s2 + $0x140] sm:$0xff] }
 0xcda   : > { %7418 = vmatpush3.msra.mxu0 %v6418_v26  ;;  %7419 = vmatprep.mubr.msk.f32.mxu0 %vm7851_vm1, %v7850_v2  ;;  %v6465_v26 = vld [vmem:[%s10476_s23 + $0x178] sm:$0xff] }
 0xcdb   : > { %7422 = vmatprep.subr.mxu0 %v7850_v2 }
 0xd99   : > { %v2453_v36 = vpop.f32.mrf.mxu0 }
 0xd9a   : > { %7420 = vmatmul.mubr.msk.f32.vlgmr.msra.gmra.mxu0 %vm805_vm2, %v2453_v36  ;;  %v6458_v36 = vld [vmem:[%s10476_s23 + $0x140] sm:$0xff] }
 0xd9b   : > { %7423 = vmatpush3.msra.mxu0 %v6427_v35  ;;  %v7416_v38 = vpop.f32.mrf.mxu0  ;;  %7438 = vmatprep.mubr.msk.f32.mxu0 %vm7851_vm1, %v7850_v2  ;;  %v6459_v35 = vld [vmem:[%s10476_s23 + $0x148] sm:$0xff] }
 0xd9c   : > { %7424 = vmatprep.subr.mxu0 %v7850_v2 }
 0xd9d   : > { %7425 = vmatpush3.msra.mxu0 %v6426_v37  ;;  %v6478_v37 = vld [vmem:[%s10444_s5 + $0x5] ss:$0 sm:$0xff] }
 0xd9e   : > { %7426 = vmatprep.subr.mxu0 %v7850_v2 }
 0xd9f   : > { %7427 = vmatpush3.msra.mxu0 %v6425_v39 }
 0xda0   : > { %7428 = vmatprep.subr.mxu0 %v7850_v2 }
 0xda1   : > { %7429 = vmatpush3.msra.mxu0 %v6424_v40 }
 0xda2   : > { %7430 = vmatprep.subr.mxu0 %v7850_v2 }
 0xda3   : > { %7431 = vmatpush3.msra.mxu0 %v6423_v41 }
 0xda4   : > { %7432 = vmatprep.subr.mxu0 %v7850_v2 }
 0xda5   : > { %7433 = vmatpush3.msra.mxu0 %v6422_v42 }
 0xda6   : > { %7434 = vmatprep.subr.mxu0 %v7850_v2 }
 0xda7   : > { %7435 = vmatpush3.msra.mxu0 %v6421_v43 }
 0xda8   : > { %7436 = vmatprep.subr.mxu0 %v7850_v2 }
 0xda9   : > { %7437 = vmatpush3.msra.mxu0 %v6420_v44  ;;  %v6467_v44 = vld [vmem:[%s10443_s4 + $0x5] ss:$0 sm:$0xff] }
 0xdaa   : > { %7439 = vmatmul.mubr.msk.f32.vlgmr.msra.gmra.mxu0 %vm560_vm0, %v8063_v17  ;;  %7460 = vmatprep.subr.mxu0 %v7850_v2 }
 0xdab   : > { %7476 = vmatprep.mubr.msk.f32.mxu0 %vm7851_vm1, %v7850_v2  ;;  %7461 = vmatpush3.msra.mxu0 %v6449_v56 }
 0xdac   : > { %7462 = vmatprep.subr.mxu0 %v7850_v2 }
 0xdad   : > { %7463 = vmatpush3.msra.mxu0 %v6448_v57 }
 0xdae   : > { %7464 = vmatprep.subr.mxu0 %v7850_v2 }
 0xe5a   : > { %v2528_v49 = vpop.f32.mrf.mxu0 }
 0xe5b   : > { %v8633_v50 = vadd.f32 %v2528_v49, %v8495_v58  ;;  %v6447_v58 = vld [vmem:[%s10479_s3 + $0x128] sm:$0xff]  ;;  %v6487_v49 = vld [vmem:[%s10479_s3 + $0x178] sm:$0xff] }
 0xe5c   : > { %v7421_v17 = vpop.f32.mrf.mxu0  ;;  %7465 = vmatpush3.msra.mxu0 %v6447_v58 }
 0xe5d   : > { %7466 = vmatprep.subr.mxu0 %v7850_v2  ;;  %v6485_v17 = vld [vmem:[%s10479_s3 + $0x168] sm:$0xff] }
 0xe5e   : > { %7467 = vmatpush3.msra.mxu0 %v6446_v59 }
 0xe5f   : > { %7468 = vmatprep.subr.mxu0 %v7850_v2 }
 0xe60   : > { %7469 = vmatpush3.msra.mxu0 %v6445_v60 }
 0xe61   : > { %7470 = vmatprep.subr.mxu0 %v7850_v2 }
 0xe62   : > { %7471 = vmatpush3.msra.mxu0 %v6444_v61 }
 0xe63   : > { %7472 = vmatprep.subr.mxu0 %v7850_v2 }
 0xe64   : > { %7473 = vmatpush3.msra.mxu0 %v6443_v62 }
 0xe65   : > { %7474 = vmatprep.subr.mxu0 %v7850_v2 }
 0xe66   : > { %7475 = vmatpush3.msra.mxu0 %v6442_v63 }
 0xe67   : > { %7477 = vmatmul.mubr.msk.f32.vlgmr.msra.gmra.mxu0 %vm560_vm0, %v8673_v1  ;;  %7513 = vmatprep.subr.mxu0 %v7850_v2 }
 0xe68   : > { %7529 = vmatprep.mubr.msk.f32.mxu0 %vm7851_vm1, %v7850_v2  ;;  %7514 = vmatpush3.msra.mxu0 %v6476_v13  ;;  %v6510_v13 = vld [vmem:[%s10477_s2 + $0x198] sm:$0xff] }
 0xe69   : > { %7515 = vmatprep.subr.mxu0 %v7850_v2 }
 0xe6a   : > { %v2616_v52 = vpop.f32.mrf.mxu0  ;;  %7516 = vmatpush3.msra.mxu0 %v6475_v19 }
 0xe6b   : > { %v2617_v53 = vadd.f32 %v6429_v51, %v2616_v52  ;;  %7517 = vmatprep.subr.mxu0 %v7850_v2  ;;  %v6484_v51 = vld [vmem:[%s10479_s3 + $0x160] sm:$0xff]  ;;  %v6483_v52 = vld [vmem:[%s10479_s3 + $0x158] sm:$0xff] }
 0xe6c   : > { %v7440_v54 = vpop.f32.mrf.mxu0  ;;  %7518 = vmatpush3.msra.mxu0 %v6474_v20  ;;  %v6502_v20 = vld [vmem:[%s10476_s23 + $0x1b0] sm:$0xff] }
 0xe6d   : > { %v2794_v55 = vmul.f32 0.35355338, %v2617_v53  ;;  %7519 = vmatprep.subr.mxu0 %v7850_v2  ;;  %v6482_v53 = vld [vmem:[%s10479_s3 + $0x150] sm:$0xff]  ;;  %v6481_v54 = vld [vmem:[%s10479_s3 + $0x148] sm:$0xff] }
 0xe6e   : > { %7520 = vmatpush3.msra.mxu0 %v6473_v21 }
 0xe6f   : > { %7482 = vmatmul.mubr.msk.f32.vlgmr.msra.gmra.mxu1 %vm805_vm2, %v2794_v55  ;;  %7521 = vmatprep.subr.mxu0 %v7850_v2  ;;  %v6480_v55 = vld [vmem:[%s10479_s3 + $0x140] sm:$0xff] }
 0xe70   : > { %7486 = vmatprep.mubr.msk.f32.mxu1 %vm7851_vm1, %v7850_v2  ;;  %7522 = vmatpush3.msra.mxu0 %v6472_v22  ;;  %v6501_v22 = vld [vmem:[%s10476_s23 + $0x1a8] sm:$0xff] }
 0xe71   : > { %7523 = vmatprep.subr.mxu0 %v7850_v2 }
 0xe72   : > { %7524 = vmatpush3.msra.mxu0 %v6471_v23  ;;  %v6500_v23 = vld [vmem:[%s10476_s23 + $0x1a0] sm:$0xff] }
 0xe73   : > { %7525 = vmatprep.subr.mxu0 %v7850_v2 }
 0xe74   : > { %7526 = vmatpush3.msra.mxu0 %v6470_v24  ;;  %v6499_v24 = vld [vmem:[%s10476_s23 + $0x198] sm:$0xff] }
 0xe75   : > { %7527 = vmatprep.subr.mxu0 %v7850_v2 }
 0xe76   : > { %7528 = vmatpush3.msra.mxu0 %v6469_v25  ;;  %v6498_v25 = vld [vmem:[%s10476_s23 + $0x190] sm:$0xff] }
 0xe77   : > { %7530 = vmatmul.mubr.msk.f32.vlgmr.msra.gmra.mxu0 %vm560_vm0, %v8673_v1  ;;  %7551 = vmatprep.subr.mxu0 %v7850_v2 }
 0xe78   : > { %7553 = vmatprep.mubr.msk.f32.mxu0 %vm7851_vm1, %v7850_v2 }
 0xf27   : > { %v2790_v10 = vpop.f32.mrf.mxu0 }
 0xf28   : > { %v2791_v11 = vadd.f32 %v6451_v9, %v2790_v10  ;;  %v6494_v9 = vld [vmem:[%s10446_s7 + $0x28] sm:$0xff]  ;;  %v6513_v10 = vld [vmem:[%s10477_s2 + $0x1b0] sm:$0xff] }
 0xf29   : > { %v7478_v12 = vpop.f32.mrf.mxu0 }
 0xf2a   : > { %7485 = vmatpush3.msra.mxu1 %v2791_v11  ;;  %v6512_v11 = vld [vmem:[%s10477_s2 + $0x1a8] sm:$0xff]  ;;  %v6511_v12 = vld [vmem:[%s10477_s2 + $0x1a0] sm:$0xff] }
 0xf2b   : > { %7489 = vmatprep.subr.mxu1 %v7850_v2 }
 0xf2f   : > { %v2867_v28 = vpop.f32.mrf.mxu1 }
 0xf30   : > { %v2871_v0 = vsel %vm805_vm2, %v2867_v28, -inf }
 0xf31   : > { %2872 = vmax.xlane.f32.xlu0 %v2871_v0  ;;  %v7483_v3 = vpop.f32.mrf.mxu1 }
 0xf37   : > { %v3201_v38 = vpop.f32.mrf.mxu0 }
 0xf38   : > { %v3202_v39 = vadd.f32 %v6478_v37, %v3201_v38 }
 0xf39   : > { %v7531_v40 = vpop.f32.mrf.mxu0 }
 0xf3a   : > { %7552 = vmatpush3.xpose.msk.msra.mxu0 %vm805_vm2, %v3202_v39 }
 0xf3b   : > { %7556 = vmatprep.subr.mxu0 %v7850_v2 }
 0xfba   : > { %v2873_v4 = vpop.xlane.xlu0 %2872 }
 0xfbb   : > { %v2874_v5 = vsub.f32 %v2867_v28, %v2873_v4  ;;  %v6489_v28 = vld [vmem:[%s10445_s6 + $0x5] ss:$0 sm:$0xff] }
 0xfbd   : > { %v2875_v6 = vmul.f32 1.442695, %v2874_v5  ;;  %v6514_v5 = vld [vmem:[%s10477_s2 + $0x1b8] sm:$0xff] }
 0xfbf   : > { %7767 = vpow2.f32 %v2875_v6 }
 0xfcc   : > { %v7768_v7 = vpop.eup %7767 }
 0xfcd   : > { %v2877_v8 = vsel %vm805_vm2, %v7768_v7, 0.0 }
 0xfce   : > { %2878 = vadd.xlane.f32.xlu1 %v2877_v8 }
0x1057   : > { %v2879_v14 = vpop.xlane.xlu1 %2878 }
0x1058   : > { %7769 = vrcp.f32 %v2879_v14  ;;  %v6509_v14 = vld [vmem:[%s10477_s2 + $0x190] sm:$0xff] }
0x1065   : > { %v7770_v15 = vpop.eup %7769 }
0x1066   : > { %v2881_v16 = vmul.f32 %v7770_v15, %v7768_v7  ;;  %v6508_v15 = vld [vmem:[%s10477_s2 + $0x188] sm:$0xff] }
0x1068   : > { %7487 = vmatmul.mubr.msk.f32.vlgmr.msra.gmra.mxu1 %vm805_vm2, %v2881_v16  ;;  %v6507_v16 = vld [vmem:[%s10477_s2 + $0x180] sm:$0xff] }
0x1069   : > { %7490 = vmatpush3.msra.mxu1 %v6456_v18  ;;  %7491 = vmatprep.mubr.msk.f32.mxu1 %vm7851_vm1, %v7850_v2  ;;  %v6503_v18 = vld [vmem:[%s10476_s23 + $0x1b8] sm:$0xff] }
0x106a   : > { %7494 = vmatprep.subr.mxu1 %v7850_v2 }
0x1128   : > { %v2951_v27 = vpop.f32.mrf.mxu1 }
0x1129   : > { %7492 = vmatmul.mubr.msk.f32.vlgmr.msra.gmra.mxu1 %vm805_vm2, %v2951_v27  ;;  %v6496_v27 = vld [vmem:[%s10476_s23 + $0x180] sm:$0xff] }
0x112a   : > { %7495 = vmatpush3.msra.mxu1 %v6465_v26  ;;  %v7488_v30 = vpop.f32.mrf.mxu1  ;;  %7510 = vmatprep.mubr.msk.f32.mxu1 %vm7851_vm1, %v7850_v2  ;;  %v6497_v26 = vld [vmem:[%s10476_s23 + $0x188] sm:$0xff] }
0x112b   : > { %7496 = vmatprep.subr.mxu1 %v7850_v2 }
0x112c   : > { %7497 = vmatpush3.msra.mxu1 %v6464_v29  ;;  %v6516_v29 = vld [vmem:[%s10444_s5 + $0x6] ss:$0 sm:$0xff] }
0x112d   : > { %7498 = vmatprep.subr.mxu1 %v7850_v2 }
0x112e   : > { %7499 = vmatpush3.msra.mxu1 %v6463_v31 }
0x112f   : > { %7500 = vmatprep.subr.mxu1 %v7850_v2 }
0x1130   : > { %7501 = vmatpush3.msra.mxu1 %v6462_v32 }
0x1131   : > { %7502 = vmatprep.subr.mxu1 %v7850_v2 }
0x1132   : > { %7503 = vmatpush3.msra.mxu1 %v6461_v33 }
0x1133   : > { %7504 = vmatprep.subr.mxu1 %v7850_v2 }
0x1134   : > { %7505 = vmatpush3.msra.mxu1 %v6460_v34 }
0x1135   : > { %7506 = vmatprep.subr.mxu1 %v7850_v2 }
0x1136   : > { %7507 = vmatpush3.msra.mxu1 %v6459_v35 }
0x1137   : > { %7508 = vmatprep.subr.mxu1 %v7850_v2 }
0x1138   : > { %7509 = vmatpush3.msra.mxu1 %v6458_v36  ;;  %v6505_v36 = vld [vmem:[%s10443_s4 + $0x6] ss:$0 sm:$0xff] }
0x1139   : > { %7511 = vmatmul.mubr.msk.f32.vlgmr.msra.gmra.mxu1 %vm560_vm0, %v8673_v1  ;;  %7532 = vmatprep.subr.mxu1 %v7850_v2 }
0x113a   : > { %7548 = vmatprep.mubr.msk.f32.mxu1 %vm7851_vm1, %v7850_v2  ;;  %7533 = vmatpush3.msra.mxu1 %v6487_v49 }
0x113b   : > { %7534 = vmatprep.subr.mxu1 %v7850_v2 }
0x11e9   : > { %v3026_v41 = vpop.f32.mrf.mxu1 }
0x11ea   : > { %v8774_v42 = vadd.f32 %v3026_v41, %v8633_v50  ;;  %v6486_v50 = vld [vmem:[%s10479_s3 + $0x170] sm:$0xff]  ;;  %v6525_v41 = vld [vmem:[%s10479_s3 + $0x1b8] sm:$0xff] }
0x11eb   : > { %v7493_v43 = vpop.f32.mrf.mxu1  ;;  %7535 = vmatpush3.msra.mxu1 %v6486_v50 }
0x11ec   : > { %7536 = vmatprep.subr.mxu1 %v7850_v2  ;;  %v6523_v43 = vld [vmem:[%s10479_s3 + $0x1a8] sm:$0xff] }
0x11ed   : > { %7537 = vmatpush3.msra.mxu1 %v6485_v17 }
0x11ee   : > { %7538 = vmatprep.subr.mxu1 %v7850_v2 }
0x11ef   : > { %7539 = vmatpush3.msra.mxu1 %v6484_v51 }
0x11f0   : > { %7540 = vmatprep.subr.mxu1 %v7850_v2 }
0x11f1   : > { %7541 = vmatpush3.msra.mxu1 %v6483_v52 }
0x11f2   : > { %7542 = vmatprep.subr.mxu1 %v7850_v2 }
0x11f3   : > { %7543 = vmatpush3.msra.mxu1 %v6482_v53 }
0x11f4   : > { %7544 = vmatprep.subr.mxu1 %v7850_v2 }
0x11f5   : > { %7545 = vmatpush3.msra.mxu1 %v6481_v54 }
0x11f6   : > { %7546 = vmatprep.subr.mxu1 %v7850_v2 }
0x11f7   : > { %7547 = vmatpush3.msra.mxu1 %v6480_v55 }
0x11f8   : > { %7549 = vmatmul.mubr.msk.f32.vlgmr.msra.gmra.mxu1 %vm560_vm0, %v8673_v1  ;;  %7585 = vmatprep.subr.mxu1 %v7850_v2 }
0x11f9   : > { %v3114_v45 = vpop.f32.mrf.mxu1  ;;  %7601 = vmatprep.mubr.msk.f32.mxu1 %vm7851_vm1, %v7850_v2  ;;  %7586 = vmatpush3.msra.mxu1 %v6514_v5  ;;  %v6548_v5 = vld [vmem:[%s10477_s2 + $0x1d8] sm:$0xff] }
0x11fa   : > { %v3115_v46 = vadd.f32 %v6467_v44, %v3114_v45  ;;  %7587 = vmatprep.subr.mxu1 %v7850_v2  ;;  %v6522_v44 = vld [vmem:[%s10479_s3 + $0x1a0] sm:$0xff]  ;;  %v6521_v45 = vld [vmem:[%s10479_s3 + $0x198] sm:$0xff] }
0x11fb   : > { %v7512_v47 = vpop.f32.mrf.mxu1  ;;  %7588 = vmatpush3.msra.mxu1 %v6513_v10 }
0x11fc   : > { %v3292_v48 = vmul.f32 0.35355338, %v3115_v46  ;;  %7589 = vmatprep.subr.mxu1 %v7850_v2  ;;  %v6520_v46 = vld [vmem:[%s10479_s3 + $0x190] sm:$0xff]  ;;  %v6519_v47 = vld [vmem:[%s10479_s3 + $0x188] sm:$0xff] }
0x11fd   : > { %7590 = vmatpush3.msra.mxu1 %v6512_v11  ;;  %v6540_v11 = vld [vmem:[%s10476_s23 + $0x1f0] sm:$0xff] }
0x11fe   : > { %7554 = vmatmul.mubr.msk.f32.vlgmr.msra.gmra.mxu0 %vm805_vm2, %v3292_v48  ;;  %7591 = vmatprep.subr.mxu1 %v7850_v2  ;;  %v6518_v48 = vld [vmem:[%s10479_s3 + $0x180] sm:$0xff] }
0x11ff   : > { %7558 = vmatprep.mubr.msk.f32.mxu0 %vm7851_vm1, %v7850_v2  ;;  %7592 = vmatpush3.msra.mxu1 %v6511_v12 }
0x1200   : > { %7593 = vmatprep.subr.mxu1 %v7850_v2 }
0x1201   : > { %7594 = vmatpush3.msra.mxu1 %v6510_v13  ;;  %v6539_v13 = vld [vmem:[%s10476_s23 + $0x1e8] sm:$0xff] }
0x1202   : > { %7595 = vmatprep.subr.mxu1 %v7850_v2 }
0x1203   : > { %7596 = vmatpush3.msra.mxu1 %v6509_v14  ;;  %v6538_v14 = vld [vmem:[%s10476_s23 + $0x1e0] sm:$0xff] }
0x1204   : > { %7597 = vmatprep.subr.mxu1 %v7850_v2 }
0x1205   : > { %7598 = vmatpush3.msra.mxu1 %v6508_v15  ;;  %v6537_v15 = vld [vmem:[%s10476_s23 + $0x1d8] sm:$0xff] }
0x1206   : > { %7599 = vmatprep.subr.mxu1 %v7850_v2 }
0x1207   : > { %7600 = vmatpush3.msra.mxu1 %v6507_v16  ;;  %v6536_v16 = vld [vmem:[%s10476_s23 + $0x1d0] sm:$0xff] }
0x1208   : > { %7602 = vmatmul.mubr.msk.f32.vlgmr.msra.gmra.mxu1 %vm560_vm0, %v8673_v1  ;;  %7623 = vmatprep.subr.mxu1 %v7850_v2 }
0x1209   : > { %7625 = vmatprep.mubr.msk.f32.mxu1 %vm7851_vm1, %v7850_v2 }
0x12b8   : > { %v3288_v0 = vpop.f32.mrf.mxu1 }
0x12b9   : > { %v3289_v3 = vadd.f32 %v6489_v28, %v3288_v0  ;;  %v6532_v28 = vld [vmem:[%s10446_s7 + $0x30] sm:$0xff] }
0x12ba   : > { %v7550_v4 = vpop.f32.mrf.mxu1  ;;  %v6551_v0 = vld [vmem:[%s10477_s2 + $0x1f0] sm:$0xff] }
0x12bb   : > { %7557 = vmatpush3.msra.mxu0 %v3289_v3  ;;  %v6550_v3 = vld [vmem:[%s10477_s2 + $0x1e8] sm:$0xff]  ;;  %v6549_v4 = vld [vmem:[%s10477_s2 + $0x1e0] sm:$0xff] }
0x12bc   : > { %7561 = vmatprep.subr.mxu0 %v7850_v2 }
0x12be   : > { %v3365_v56 = vpop.f32.mrf.mxu0 }
0x12bf   : > { %v3369_v57 = vsel %vm805_vm2, %v3365_v56, -inf }
0x12c0   : > { %3370 = vmax.xlane.f32.xlu0 %v3369_v57  ;;  %v7555_v58 = vpop.f32.mrf.mxu0 }
0x12c8   : > { %v3699_v30 = vpop.f32.mrf.mxu1 }
0x12c9   : > { %v3700_v31 = vadd.f32 %v6516_v29, %v3699_v30 }
0x12ca   : > { %v7603_v32 = vpop.f32.mrf.mxu1 }
0x12cb   : > { %7624 = vmatpush3.xpose.msk.msra.mxu1 %vm805_vm2, %v3700_v31 }
0x12cc   : > { %7628 = vmatprep.subr.mxu1 %v7850_v2 }
0x1349   : > { %v3371_v59 = vpop.xlane.xlu0 %3370 }
0x134a   : > { %v3372_v60 = vsub.f32 %v3365_v56, %v3371_v59  ;;  %v6527_v56 = vld [vmem:[%s10445_s6 + $0x6] ss:$0 sm:$0xff] }
0x134c   : > { %v3373_v61 = vmul.f32 1.442695, %v3372_v60  ;;  %v6552_v60 = vld [vmem:[%s10477_s2 + $0x1f8] sm:$0xff] }
0x134e   : > { %7771 = vpow2.f32 %v3373_v61 }
0x135b   : > { %v7772_v62 = vpop.eup %7771 }
0x135c   : > { %v3375_v63 = vsel %vm805_vm2, %v7772_v62, 0.0 }
0x135d   : > { %3376 = vadd.xlane.f32.xlu1 %v3375_v63 }
0x13e6   : > { %v3377_v6 = vpop.xlane.xlu1 %3376 }
0x13e7   : > { %7773 = vrcp.f32 %v3377_v6  ;;  %v6547_v6 = vld [vmem:[%s10477_s2 + $0x1d0] sm:$0xff] }
0x13f4   : > { %v7774_v7 = vpop.eup %7773 }
0x13f5   : > { %v3379_v8 = vmul.f32 %v7774_v7, %v7772_v62  ;;  %v6546_v7 = vld [vmem:[%s10477_s2 + $0x1c8] sm:$0xff] }
0x13f7   : > { %7559 = vmatmul.mubr.msk.f32.vlgmr.msra.gmra.mxu0 %vm805_vm2, %v3379_v8  ;;  %v6545_v8 = vld [vmem:[%s10477_s2 + $0x1c0] sm:$0xff]  ;;  %s6229_s2 = scalar_lea.hbm %s10456_s17, %s6587_s26 }
0x13f8   : > { %7562 = vmatpush3.msra.mxu0 %v6494_v9  ;;  %7563 = vmatprep.mubr.msk.f32.mxu0 %vm7851_vm1, %v7850_v2  ;;  %v6541_v9 = vld [vmem:[%s10476_s23 + $0x1f8] sm:$0xff] }
0x13f9   : > { %7566 = vmatprep.subr.mxu0 %v7850_v2 }
0x14b7   : > { %v3449_v19 = vpop.f32.mrf.mxu0 }
0x14b8   : > { %7564 = vmatmul.mubr.msk.f32.vlgmr.msra.gmra.mxu0 %vm805_vm2, %v3449_v19  ;;  %v6534_v19 = vld [vmem:[%s10476_s23 + $0x1c0] sm:$0xff] }
0x14b9   : > { %7567 = vmatpush3.msra.mxu0 %v6503_v18  ;;  %v7560_v21 = vpop.f32.mrf.mxu0  ;;  %7582 = vmatprep.mubr.msk.f32.mxu0 %vm7851_vm1, %v7850_v2  ;;  %v6535_v18 = vld [vmem:[%s10476_s23 + $0x1c8] sm:$0xff] }
0x14ba   : > { %7568 = vmatprep.subr.mxu0 %v7850_v2 }
0x14bb   : > { %7569 = vmatpush3.msra.mxu0 %v6502_v20  ;;  %v6554_v20 = vld [vmem:[%s10444_s5 + $0x7] ss:$0 sm:$0xff] }
0x14bc   : > { %7570 = vmatprep.subr.mxu0 %v7850_v2 }
0x14bd   : > { %7571 = vmatpush3.msra.mxu0 %v6501_v22 }
0x14be   : > { %7572 = vmatprep.subr.mxu0 %v7850_v2 }
0x14bf   : > { %7573 = vmatpush3.msra.mxu0 %v6500_v23 }
0x14c0   : > { %7574 = vmatprep.subr.mxu0 %v7850_v2 }
0x14c1   : > { %7575 = vmatpush3.msra.mxu0 %v6499_v24 }
0x14c2   : > { %7576 = vmatprep.subr.mxu0 %v7850_v2 }
0x14c3   : > { %7577 = vmatpush3.msra.mxu0 %v6498_v25 }
0x14c4   : > { %7578 = vmatprep.subr.mxu0 %v7850_v2 }
0x14c5   : > { %7579 = vmatpush3.msra.mxu0 %v6497_v26 }
0x14c6   : > { %7580 = vmatprep.subr.mxu0 %v7850_v2 }
0x14c7   : > { %7581 = vmatpush3.msra.mxu0 %v6496_v27  ;;  %v6543_v27 = vld [vmem:[%s10443_s4 + $0x7] ss:$0 sm:$0xff] }
0x14c8   : > { %7583 = vmatmul.mubr.msk.f32.vlgmr.msra.gmra.mxu0 %vm560_vm0, %v8673_v1  ;;  %7604 = vmatprep.subr.mxu0 %v7850_v2 }
0x14c9   : > { %7620 = vmatprep.mubr.msk.f32.mxu0 %vm7851_vm1, %v7850_v2  ;;  %7605 = vmatpush3.msra.mxu0 %v6525_v41 }
0x14ca   : > { %7606 = vmatprep.subr.mxu0 %v7850_v2 }
0x1578   : > { %v3524_v33 = vpop.f32.mrf.mxu0 }
0x1579   : > { %v8912_v34 = vadd.f32 %v3524_v33, %v8774_v42  ;;  %v6524_v42 = vld [vmem:[%s10479_s3 + $0x1b0] sm:$0xff]  ;;  %v6563_v33 = vld [vmem:[%s10479_s3 + $0x1f8] sm:$0xff] }
0x157a   : > { %v7565_v35 = vpop.f32.mrf.mxu0  ;;  %7607 = vmatpush3.msra.mxu0 %v6524_v42 }
0x157b   : > { %7608 = vmatprep.subr.mxu0 %v7850_v2  ;;  %v6561_v35 = vld [vmem:[%s10479_s3 + $0x1e8] sm:$0xff] }
0x157c   : > { %7609 = vmatpush3.msra.mxu0 %v6523_v43 }
0x157d   : > { %7610 = vmatprep.subr.mxu0 %v7850_v2 }
0x157e   : > { %7611 = vmatpush3.msra.mxu0 %v6522_v44 }
0x157f   : > { %7612 = vmatprep.subr.mxu0 %v7850_v2 }
0x1580   : > { %7613 = vmatpush3.msra.mxu0 %v6521_v45 }
0x1581   : > { %7614 = vmatprep.subr.mxu0 %v7850_v2 }
0x1582   : > { %7615 = vmatpush3.msra.mxu0 %v6520_v46 }
0x1583   : > { %7616 = vmatprep.subr.mxu0 %v7850_v2 }
0x1584   : > { %7617 = vmatpush3.msra.mxu0 %v6519_v47 }
0x1585   : > { %7618 = vmatprep.subr.mxu0 %v7850_v2 }
0x1586   : > { %7619 = vmatpush3.msra.mxu0 %v6518_v48 }
0x1587   : > { %7621 = vmatmul.mubr.msk.f32.vlgmr.msra.gmra.mxu0 %vm560_vm0, %v8673_v1  ;;  %7657 = vmatprep.subr.mxu0 %v7850_v2 }
0x1588   : > { %v3612_v37 = vpop.f32.mrf.mxu0  ;;  %7673 = vmatprep.mubr.msk.f32.mxu0 %vm7851_vm1, %v7850_v2  ;;  %7658 = vmatpush3.msra.mxu0 %v6552_v60 }
0x1589   : > { %v3613_v38 = vadd.f32 %v6505_v36, %v3612_v37  ;;  %7659 = vmatprep.subr.mxu0 %v7850_v2  ;;  %v6560_v36 = vld [vmem:[%s10479_s3 + $0x1e0] sm:$0xff]  ;;  %v6559_v37 = vld [vmem:[%s10479_s3 + $0x1d8] sm:$0xff] }
0x158a   : > { %v7584_v39 = vpop.f32.mrf.mxu0  ;;  %7660 = vmatpush3.msra.mxu0 %v6551_v0 }
0x158b   : > { %v3790_v40 = vmul.f32 0.35355338, %v3613_v38  ;;  %7661 = vmatprep.subr.mxu0 %v7850_v2  ;;  %v6558_v38 = vld [vmem:[%s10479_s3 + $0x1d0] sm:$0xff]  ;;  %v6557_v39 = vld [vmem:[%s10479_s3 + $0x1c8] sm:$0xff] }
0x158c   : > { %7662 = vmatpush3.msra.mxu0 %v6550_v3 }
0x158d   : > { %7626 = vmatmul.mubr.msk.f32.vlgmr.msra.gmra.mxu1 %vm805_vm2, %v3790_v40  ;;  %7663 = vmatprep.subr.mxu0 %v7850_v2  ;;  %v6556_v40 = vld [vmem:[%s10479_s3 + $0x1c0] sm:$0xff] }
0x158e   : > { %7630 = vmatprep.mubr.msk.f32.mxu1 %vm7851_vm1, %v7850_v2  ;;  %7664 = vmatpush3.msra.mxu0 %v6549_v4 }
0x158f   : > { %7665 = vmatprep.subr.mxu0 %v7850_v2 }
0x1590   : > { %7666 = vmatpush3.msra.mxu0 %v6548_v5 }
0x1591   : > { %7667 = vmatprep.subr.mxu0 %v7850_v2 }
0x1592   : > { %7668 = vmatpush3.msra.mxu0 %v6547_v6 }
0x1593   : > { %7669 = vmatprep.subr.mxu0 %v7850_v2 }
0x1594   : > { %7670 = vmatpush3.msra.mxu0 %v6546_v7  ;;  %v4677_v7 = vld [vmem:[%s10448_s9 + $0x388] sm:$0xff] }
0x1595   : > { %7671 = vmatprep.subr.mxu0 %v7850_v2 }
0x1596   : > { %7672 = vmatpush3.msra.mxu0 %v6545_v8  ;;  %v4676_v8 = vld [vmem:[%s10448_s9 + $0x380] sm:$0xff] }
0x1597   : > { %7674 = vmatmul.mubr.msk.f32.vlgmr.msra.gmra.mxu0 %vm560_vm0, %v8673_v1  ;;  %7695 = vmatprep.subr.mxu0 %v7850_v2 }
0x1598   : > { %7697 = vmatprep.mubr.msk.f32.mxu0 %vm7851_vm1, %v7850_v2 }
0x1647   : > { %v3786_v57 = vpop.f32.mrf.mxu0 }
0x1648   : > { %v3787_v58 = vadd.f32 %v6527_v56, %v3786_v57 }
0x1649   : > { %v7622_v59 = vpop.f32.mrf.mxu0 }
0x164a   : > { %7629 = vmatpush3.msra.mxu1 %v3787_v58  ;;  %v6572_v59 = vld [vmem:[%s10447_s8] ss:$0 sm:$0xff] }
0x164b   : > { %7633 = vmatprep.subr.mxu1 %v7850_v2 }
0x164d   : > { %v3863_v49 = vpop.f32.mrf.mxu1 }
0x164e   : > { %v3867_v50 = vsel %vm805_vm2, %v3863_v49, -inf }
0x164f   : > { %3868 = vmax.xlane.f32.xlu0 %v3867_v50  ;;  %v7627_v17 = vpop.f32.mrf.mxu1 }
0x1657   : > { %v4197_v21 = vpop.f32.mrf.mxu0 }
0x1658   : > { %v4198_v22 = vadd.f32 %v6554_v20, %v4197_v21  ;;  %v4631_v20 = vld [vmem:[%s10448_s9 + $0x218] sm:$0xff]  ;;  %v4628_v21 = vld [vmem:[%s10448_s9 + $0x200] sm:$0xff] }
0x1659   : > { %v7675_v23 = vpop.f32.mrf.mxu0 }
0x165a   : > { %7696 = vmatpush3.xpose.msk.msra.mxu0 %vm805_vm2, %v4198_v22  ;;  %v4630_v22 = vld [vmem:[%s10448_s9 + $0x210] sm:$0xff]  ;;  %v4613_v23 = vld [vmem:[%s10448_s9 + $0x188] sm:$0xff] }
0x165b   : > { %7700 = vmatprep.subr.mxu0 %v7850_v2 }
0x16d8   : > { %v3869_v51 = vpop.xlane.xlu0 %3868 }
0x16d9   : > { %v3870_v52 = vsub.f32 %v3863_v49, %v3869_v51  ;;  %v6565_v49 = vld [vmem:[%s10445_s6 + $0x7] ss:$0 sm:$0xff] }
0x16db   : > { %v3871_v53 = vmul.f32 1.442695, %v3870_v52 }
0x16dd   : > { %7775 = vpow2.f32 %v3871_v53 }
0x16ea   : > { %v7776_v54 = vpop.eup %7775 }
0x16eb   : > { %v3873_v55 = vsel %vm805_vm2, %v7776_v54, 0.0 }
0x16ec   : > { %3874 = vadd.xlane.f32.xlu1 %v3873_v55  ;;  %v6570_v55 = vld [vmem:[%s10446_s7 + $0x38] sm:$0xff] }
0x1775   : > { %v3875_v61 = vpop.xlane.xlu1 %3874 }
0x1776   : > { %7777 = vrcp.f32 %v3875_v61 }
0x1783   : > { %v7778_v62 = vpop.eup %7777 }
0x1784   : > { %v3877_v63 = vmul.f32 %v7778_v62, %v7776_v54 }
0x1786   : > { %7631 = vmatmul.mubr.msk.f32.vlgmr.msra.gmra.mxu1 %vm805_vm2, %v3877_v63 }
0x1787   : > { %7634 = vmatpush3.msra.mxu1 %v6532_v28  ;;  %7635 = vmatprep.mubr.msk.f32.mxu1 %vm7851_vm1, %v7850_v2 }
0x1788   : > { %7638 = vmatprep.subr.mxu1 %v7850_v2 }
0x1846   : > { %v3947_v10 = vpop.f32.mrf.mxu1 }
0x1847   : > { %7636 = vmatmul.mubr.msk.f32.vlgmr.msra.gmra.mxu1 %vm805_vm2, %v3947_v10  ;;  %v4661_v10 = vld [vmem:[%s10448_s9 + $0x308] sm:$0xff] }
0x1848   : > { %7639 = vmatpush3.msra.mxu1 %v6541_v9  ;;  %v7632_v12 = vpop.f32.mrf.mxu1  ;;  %7654 = vmatprep.mubr.msk.f32.mxu1 %vm7851_vm1, %v7850_v2  ;;  %v4678_v9 = vld [vmem:[%s10448_s9 + $0x390] sm:$0xff] }
0x1849   : > { %7640 = vmatprep.subr.mxu1 %v7850_v2  ;;  %v4660_v12 = vld [vmem:[%s10448_s9 + $0x300] sm:$0xff] }
0x184a   : > { %7641 = vmatpush3.msra.mxu1 %v6540_v11  ;;  %v4663_v11 = vld [vmem:[%s10448_s9 + $0x318] sm:$0xff] }
0x184b   : > { %7642 = vmatprep.subr.mxu1 %v7850_v2 }
0x184c   : > { %7643 = vmatpush3.msra.mxu1 %v6539_v13  ;;  %v4662_v13 = vld [vmem:[%s10448_s9 + $0x310] sm:$0xff] }
0x184d   : > { %7644 = vmatprep.subr.mxu1 %v7850_v2 }
0x184e   : > { %7645 = vmatpush3.msra.mxu1 %v6538_v14  ;;  %v4645_v14 = vld [vmem:[%s10448_s9 + $0x288] sm:$0xff] }
0x184f   : > { %7646 = vmatprep.subr.mxu1 %v7850_v2 }
0x1850   : > { %7647 = vmatpush3.msra.mxu1 %v6537_v15  ;;  %v4647_v15 = vld [vmem:[%s10448_s9 + $0x298] sm:$0xff] }
0x1851   : > { %7648 = vmatprep.subr.mxu1 %v7850_v2 }
0x1852   : > { %7649 = vmatpush3.msra.mxu1 %v6536_v16  ;;  %v4644_v16 = vld [vmem:[%s10448_s9 + $0x280] sm:$0xff] }
0x1853   : > { %7650 = vmatprep.subr.mxu1 %v7850_v2 }
0x1854   : > { %7651 = vmatpush3.msra.mxu1 %v6535_v18  ;;  %v4646_v18 = vld [vmem:[%s10448_s9 + $0x290] sm:$0xff] }
0x1855   : > { %7652 = vmatprep.subr.mxu1 %v7850_v2 }
0x1856   : > { %7653 = vmatpush3.msra.mxu1 %v6534_v19  ;;  %v4629_v19 = vld [vmem:[%s10448_s9 + $0x208] sm:$0xff] }
0x1857   : > { %7655 = vmatmul.mubr.msk.f32.vlgmr.msra.gmra.mxu1 %vm560_vm0, %v8673_v1  ;;  %7676 = vmatprep.subr.mxu1 %v7850_v2 }
0x1858   : > { %7692 = vmatprep.mubr.msk.f32.mxu1 %vm7851_vm1, %v7850_v2  ;;  %7677 = vmatpush3.msra.mxu1 %v6563_v33  ;;  %v4583_v33 = vld [vmem:[%s10448_s9 + $0x98] sm:$0xff] }
0x1859   : > { %7678 = vmatprep.subr.mxu1 %v7850_v2 }
0x1907   : > { %v4022_v24 = vpop.f32.mrf.mxu1 }
0x1908   : > { %v9050_v25 = vadd.f32 %v4022_v24, %v8912_v34  ;;  %v6562_v34 = vld [vmem:[%s10479_s3 + $0x1f0] sm:$0xff]  ;;  %v4615_v24 = vld [vmem:[%s10448_s9 + $0x198] sm:$0xff]  ;;  %s6218_s3 = scalar_lea.sflag [#allocation3], %s537_s20 }
0x1909   : > { %v7637_v26 = vpop.f32.mrf.mxu1  ;;  %7679 = vmatpush3.msra.mxu1 %v6562_v34  ;;  %v4580_v34 = vld [vmem:[%s10448_s9 + $0x80] sm:$0xff] }
0x190a   : > { %7680 = vmatprep.subr.mxu1 %v7850_v2  ;;  %v4614_v26 = vld [vmem:[%s10448_s9 + $0x190] sm:$0xff] }
0x190b   : > { %7681 = vmatpush3.msra.mxu1 %v6561_v35  ;;  %v4582_v35 = vld [vmem:[%s10448_s9 + $0x90] sm:$0xff] }
0x190c   : > { %7682 = vmatprep.subr.mxu1 %v7850_v2 }
0x190d   : > { %7683 = vmatpush3.msra.mxu1 %v6560_v36  ;;  %v4565_v36 = vld [vmem:[%s10448_s9 + $0x8] sm:$0xff] }
0x190e   : > { %7684 = vmatprep.subr.mxu1 %v7850_v2 }
0x190f   : > { %7685 = vmatpush3.msra.mxu1 %v6559_v37  ;;  %v4567_v37 = vld [vmem:[%s10448_s9 + $0x18] sm:$0xff] }
0x1910   : > { %7686 = vmatprep.subr.mxu1 %v7850_v2 }
0x1911   : > { %7687 = vmatpush3.msra.mxu1 %v6558_v38  ;;  %v4564_v38 = vld [vmem:[%s10448_s9] sm:$0xff] }
0x1912   : > { %7688 = vmatprep.subr.mxu1 %v7850_v2 }
0x1913   : > { %7689 = vmatpush3.msra.mxu1 %v6557_v39  ;;  %v4566_v39 = vld [vmem:[%s10448_s9 + $0x10] sm:$0xff] }
0x1914   : > { %7690 = vmatprep.subr.mxu1 %v7850_v2 }
0x1915   : > { %7691 = vmatpush3.msra.mxu1 %v6556_v40  ;;  %v4681_v40 = vld [vmem:[%s10448_s9 + $0x3a8] sm:$0xff] }
0x1916   : > { %7693 = vmatmul.mubr.msk.f32.vlgmr.msra.gmra.mxu1 %vm560_vm0, %v8673_v1 }
0x1917   : > { %v4110_v29 = vpop.f32.mrf.mxu1  ;;  %4914 = vmatprep.mubr.f32.mxu1 %v7850_v2 }
0x1918   : > { %v4111_v30 = vadd.f32 %v6543_v27, %v4110_v29  ;;  %v4597_v27 = vld [vmem:[%s10448_s9 + $0x108] sm:$0xff]  ;;  %v4599_v29 = vld [vmem:[%s10448_s9 + $0x118] sm:$0xff] }
0x1919   : > { %v7656_v31 = vpop.f32.mrf.mxu1 }
0x191a   : > { %v4288_v32 = vmul.f32 0.35355338, %v4111_v30  ;;  %v4596_v30 = vld [vmem:[%s10448_s9 + $0x100] sm:$0xff]  ;;  %v4598_v31 = vld [vmem:[%s10448_s9 + $0x110] sm:$0xff] }
0x191c   : > { %7698 = vmatmul.mubr.msk.f32.vlgmr.msra.gmra.mxu0 %vm805_vm2, %v4288_v32  ;;  %v4581_v32 = vld [vmem:[%s10448_s9 + $0x88] sm:$0xff] }
0x191d   : > { %7702 = vmatprep.mubr.msk.f32.mxu0 %vm7851_vm1, %v7850_v2 }
0x19d6   : > { %v4284_v50 = vpop.f32.mrf.mxu1 }
0x19d7   : > { %v4285_v17 = vadd.f32 %v6565_v49, %v4284_v50 }
0x19d8   : > { %v7694_v51 = vpop.f32.mrf.mxu1 }
0x19d9   : > { %7701 = vmatpush3.msra.mxu0 %v4285_v17  ;;  %v4680_v17 = vld [vmem:[%s10448_s9 + $0x3a0] sm:$0xff]  ;;  %v4682_v51 = vld [vmem:[%s10448_s9 + $0x3b0] sm:$0xff] }
0x19da   : > { %7705 = vmatprep.subr.mxu0 %v7850_v2 }
0x19dc   : > { %v4361_v41 = vpop.f32.mrf.mxu0 }
0x19dd   : > { %v4365_v42 = vsel %vm805_vm2, %v4361_v41, -inf }
0x19de   : > { %4366 = vmax.xlane.f32.xlu0 %v4365_v42  ;;  %v7699_v43 = vpop.f32.mrf.mxu0 }
0x1a67   : > { %v4367_v44 = vpop.xlane.xlu0 %4366 }
0x1a68   : > { %v4368_v45 = vsub.f32 %v4361_v41, %v4367_v44  ;;  %v4683_v41 = vld [vmem:[%s10448_s9 + $0x3b8] sm:$0xff] }
0x1a6a   : > { %v4369_v46 = vmul.f32 1.442695, %v4368_v45 }
0x1a6c   : > { %7779 = vpow2.f32 %v4369_v46  ;;  %v6573_v46 = vld [vmem:[%s10452_s13] ss:$0 sm:$0xff] }
0x1a79   : > { %v7780_v47 = vpop.eup %7779 }
0x1a7a   : > { %v4371_v48 = vsel %vm805_vm2, %v7780_v47, 0.0 }
0x1a7b   : > { %4372 = vadd.xlane.f32.xlu1 %v4371_v48  ;;  %v6574_v48 = vld [vmem:[%s10453_s14] ss:$0 sm:$0xff] }
0x1b04   : > { %v4373_v52 = vpop.xlane.xlu1 %4372 }
0x1b05   : > { %7781 = vrcp.f32 %v4373_v52  ;;  %v4665_v52 = vld [vmem:[%s10448_s9 + $0x328] sm:$0xff] }
0x1b12   : > { %v7782_v53 = vpop.eup %7781 }
0x1b13   : > { %v4375_v54 = vmul.f32 %v7782_v53, %v7780_v47  ;;  %v4667_v53 = vld [vmem:[%s10448_s9 + $0x338] sm:$0xff] }
0x1b15   : > { %7703 = vmatmul.mubr.msk.f32.vlgmr.msra.gmra.mxu0 %vm805_vm2, %v4375_v54  ;;  %v4664_v54 = vld [vmem:[%s10448_s9 + $0x320] sm:$0xff] }
0x1b16   : > { %7706 = vmatpush3.msra.mxu0 %v6570_v55  ;;  %7707 = vmatprep.mubr.msk.f32.mxu0 %vm7851_vm1, %v7850_v2  ;;  %v4666_v55 = vld [vmem:[%s10448_s9 + $0x330] sm:$0xff] }
0x1b17   : > { %4795 = vmatprep.subr.mxu0 %v4677_v7  ;;  %v4600_v7 = vld [vmem:[%s10448_s9 + $0x120] sm:$0xff] }
0x1bd5   : > { %v4445_v56 = vpop.f32.mrf.mxu0 }
0x1bd6   : > { %7708 = vmatmul.mubr.msk.f32.vlgmr.msra.gmra.mxu0 %vm805_vm2, %v4445_v56  ;;  %v4649_v56 = vld [vmem:[%s10448_s9 + $0x2a8] sm:$0xff] }
0x1bd7   : > { %v7704_v57 = vpop.f32.mrf.mxu0  ;;  %4843 = vmatprep.mubr.f32.mxu0 %v7850_v2  ;;  %4796 = vmatpush1.msra.mxu0 %v4676_v8  ;;  %v4585_v8 = vld [vmem:[%s10448_s9 + $0xa8] sm:$0xff] }
0x1bd8   : > { %4797 = vmatprep.subr.mxu0 %v4661_v10  ;;  %v4651_v57 = vld [vmem:[%s10448_s9 + $0x2b8] sm:$0xff]  ;;  %v4584_v10 = vld [vmem:[%s10448_s9 + $0xa0] sm:$0xff] }
0x1bd9   : > { %4798 = vmatpush1.msra.mxu0 %v4660_v12  ;;  %v4569_v12 = vld [vmem:[%s10448_s9 + $0x28] sm:$0xff] }
0x1bda   : > { %4799 = vmatprep.subr.mxu0 %v4645_v14  ;;  %v4568_v14 = vld [vmem:[%s10448_s9 + $0x20] sm:$0xff] }
0x1bdb   : > { %4800 = vmatpush1.msra.mxu0 %v4644_v16  ;;  %v4685_v16 = vld [vmem:[%s10448_s9 + $0x3c8] sm:$0xff] }
0x1bdc   : > { %4801 = vmatprep.subr.mxu0 %v4629_v19  ;;  %v4684_v19 = vld [vmem:[%s10448_s9 + $0x3c0] sm:$0xff] }
0x1bdd   : > { %4802 = vmatpush1.msra.mxu0 %v4628_v21  ;;  %v4669_v21 = vld [vmem:[%s10448_s9 + $0x348] sm:$0xff] }
0x1bde   : > { %4803 = vmatprep.subr.mxu0 %v4613_v23  ;;  %v4668_v23 = vld [vmem:[%s10448_s9 + $0x340] sm:$0xff] }
0x1c96   : > { %v4520_v58 = vpop.f32.mrf.mxu0 }
0x1c97   : > { %v4524_v60 = vadd.f32 %v4520_v58, %v9050_v25  ;;  %v4612_v25 = vld [vmem:[%s10448_s9 + $0x180] sm:$0xff] }
0x1c98   : > { %v7709_v61 = vpop.f32.mrf.mxu0  ;;  %4804 = vmatpush1.msra.mxu0 %v4612_v25  ;;  %v4648_v58 = vld [vmem:[%s10448_s9 + $0x2a0] sm:$0xff]  ;;  %v4653_v25 = vld [vmem:[%s10448_s9 + $0x2c8] sm:$0xff] }
0x1c99   : > { %v4532_v62 = vadd.f32 %v6572_v59, %v4524_v60  ;;  %4805 = vmatprep.subr.mxu0 %v4597_v27  ;;  %v4650_v59 = vld [vmem:[%s10448_s9 + $0x2b0] sm:$0xff]  ;;  %v4633_v60 = vld [vmem:[%s10448_s9 + $0x228] sm:$0xff]  ;;  %v4635_v61 = vld [vmem:[%s10448_s9 + $0x238] sm:$0xff] }
0x1c9a   : > { %4806 = vmatpush1.msra.mxu0 %v4596_v30  ;;  %v4652_v27 = vld [vmem:[%s10448_s9 + $0x2c0] sm:$0xff]  ;;  %v4637_v30 = vld [vmem:[%s10448_s9 + $0x248] sm:$0xff] }
0x1c9b   : > { %v4533_v63 = vadd.f32 %v8673_v1, %v4532_v62  ;;  %v4679_v1 = vld [vmem:[%s10448_s9 + $0x398] sm:$0xff]  ;;  %4807 = vmatprep.subr.mxu0 %v4581_v32  ;;  %v4632_v62 = vld [vmem:[%s10448_s9 + $0x220] sm:$0xff] }
0x1c9c   : > { %4866 = vmatprep.subr.mxu1 %v4679_v1  ;;  %4808 = vmatpush1.msra.mxu0 %v4580_v34  ;;  %v4602_v1 = vld [vmem:[%s10448_s9 + $0x130] sm:$0xff]  ;;  %v4636_v32 = vld [vmem:[%s10448_s9 + $0x240] sm:$0xff]  ;;  %v4621_v34 = vld [vmem:[%s10448_s9 + $0x1c8] sm:$0xff] }
0x1c9d   : > { %v4536_v28 = vsel %vm560_vm0, %v4533_v63, 0.0  ;;  %4867 = vmatpush1.msra.mxu1 %v4678_v9  ;;  %4809 = vmatprep.subr.mxu0 %v4565_v36  ;;  %v4587_v9 = vld [vmem:[%s10448_s9 + $0xb8] sm:$0xff]  ;;  %v4620_v36 = vld [vmem:[%s10448_s9 + $0x1c0] sm:$0xff] }
0x1c9e   : > { %4537 = vadd.xlane.f32.xlu0 %v4536_v28  ;;  %4868 = vmatprep.subr.mxu1 %v4663_v11  ;;  %v4617_v28 = vld [vmem:[%s10448_s9 + $0x1a8] sm:$0xff]  ;;  %v4586_v11 = vld [vmem:[%s10448_s9 + $0xb0] sm:$0xff] }
0x1c9f   : > { %4869 = vmatpush1.msra.mxu1 %v4662_v13  ;;  %4810 = vmatpush1.msra.mxu0 %v4564_v38  ;;  %v4571_v13 = vld [vmem:[%s10448_s9 + $0x38] sm:$0xff]  ;;  %v4605_v38 = vld [vmem:[%s10448_s9 + $0x148] sm:$0xff] }
0x1ca0   : > { %4870 = vmatprep.subr.mxu1 %v4647_v15  ;;  %4937 = vmatprep.subr.mxu0 %v4681_v40  ;;  %v4570_v15 = vld [vmem:[%s10448_s9 + $0x30] sm:$0xff]  ;;  %v4604_v40 = vld [vmem:[%s10448_s9 + $0x140] sm:$0xff] }
0x1ca1   : > { %4871 = vmatpush1.msra.mxu1 %v4646_v18  ;;  %v4687_v18 = vld [vmem:[%s10448_s9 + $0x3d8] sm:$0xff] }
0x1ca2   : > { %4872 = vmatprep.subr.mxu1 %v4631_v20  ;;  %v4686_v20 = vld [vmem:[%s10448_s9 + $0x3d0] sm:$0xff] }
0x1ca3   : > { %4873 = vmatpush1.msra.mxu1 %v4630_v22  ;;  %v4671_v22 = vld [vmem:[%s10448_s9 + $0x358] sm:$0xff] }
0x1ca4   : > { %4874 = vmatprep.subr.mxu1 %v4615_v24  ;;  %v4670_v24 = vld [vmem:[%s10448_s9 + $0x350] sm:$0xff] }
0x1ca5   : > { %4875 = vmatpush1.msra.mxu1 %v4614_v26  ;;  %v4655_v26 = vld [vmem:[%s10448_s9 + $0x2d8] sm:$0xff] }
0x1ca6   : > { %4876 = vmatprep.subr.mxu1 %v4599_v29  ;;  %v4654_v29 = vld [vmem:[%s10448_s9 + $0x2d0] sm:$0xff] }
0x1ca7   : > { %4877 = vmatpush1.msra.mxu1 %v4598_v31  ;;  %v4639_v31 = vld [vmem:[%s10448_s9 + $0x258] sm:$0xff] }
0x1ca8   : > { %4878 = vmatprep.subr.mxu1 %v4583_v33  ;;  %v4638_v33 = vld [vmem:[%s10448_s9 + $0x250] sm:$0xff] }
0x1ca9   : > { %4879 = vmatpush1.msra.mxu1 %v4582_v35  ;;  %v4623_v35 = vld [vmem:[%s10448_s9 + $0x1d8] sm:$0xff] }
0x1caa   : > { %4880 = vmatprep.subr.mxu1 %v4567_v37  ;;  %v4622_v37 = vld [vmem:[%s10448_s9 + $0x1d0] sm:$0xff] }
0x1cab   : > { %4881 = vmatpush1.msra.mxu1 %v4566_v39  ;;  %v4607_v39 = vld [vmem:[%s10448_s9 + $0x158] sm:$0xff] }
0x1cac   : > { %5008 = vmatprep.subr.mxu1 %v4683_v41  ;;  %v4606_v41 = vld [vmem:[%s10448_s9 + $0x150] sm:$0xff] }
0x1d27   : > { %v4538_v0 = vpop.xlane.xlu0 %4537 }
0x1d28   : > { %v4540_v3 = vmul.f32 0.015625, %v4538_v0  ;;  %v4619_v0 = vld [vmem:[%s10448_s9 + $0x1b8] sm:$0xff] }
0x1d2a   : > { %v9112_v4 = vsub.f32 %v4533_v63, %v4540_v3  ;;  %v4634_v63 = vld [vmem:[%s10448_s9 + $0x230] sm:$0xff]  ;;  %v4616_v3 = vld [vmem:[%s10448_s9 + $0x1a0] sm:$0xff] }
0x1d2c   : > { %v4542_v5 = vmul.f32 %v9112_v4, %v9112_v4 }
0x1d2e   : > { %v4543_v6 = vsel %vm560_vm0, %v4542_v5, 0.0  ;;  %v4601_v5 = vld [vmem:[%s10448_s9 + $0x128] sm:$0xff] }
0x1d2f   : > { %4544 = vadd.xlane.f32.xlu1 %v4543_v6  ;;  %v4603_v6 = vld [vmem:[%s10448_s9 + $0x138] sm:$0xff] }
0x1db8   : > { %v4545_v42 = vpop.xlane.xlu1 %4544 }
0x1db9   : > { %v4546_v43 = vmul.f32 0.015625, %v4545_v42  ;;  %v4589_v42 = vld [vmem:[%s10448_s9 + $0xc8] sm:$0xff] }
0x1dbb   : > { %v4547_v44 = vadd.f32 1e-05, %v4546_v43  ;;  %v4591_v43 = vld [vmem:[%s10448_s9 + $0xd8] sm:$0xff] }
0x1dbd   : > { %7783 = vrsqrt.f32 %v4547_v44  ;;  %v4588_v44 = vld [vmem:[%s10448_s9 + $0xc0] sm:$0xff] }
0x1dca   : > { %v7784_v45 = vpop.eup %7783 }
0x1dcb   : > { %v4549_v47 = vmul.f32 %v7784_v45, %v9112_v4  ;;  %v4618_v4 = vld [vmem:[%s10448_s9 + $0x1b0] sm:$0xff] }
0x1dcc   : > { %v4590_v45 = vld [vmem:[%s10448_s9 + $0xd0] sm:$0xff] }
0x1dcd   : > { %v4556_v49 = vmul.f32 %v6573_v46, %v4549_v47  ;;  %v4573_v46 = vld [vmem:[%s10448_s9 + $0x48] sm:$0xff]  ;;  %v4575_v47 = vld [vmem:[%s10448_s9 + $0x58] sm:$0xff] }
0x1dcf   : > { %v9226_v50 = vadd.f32 %v6574_v48, %v4556_v49  ;;  %v4572_v48 = vld [vmem:[%s10448_s9 + $0x40] sm:$0xff]  ;;  %v4574_v49 = vld [vmem:[%s10448_s9 + $0x50] sm:$0xff] }
0x1dd1   : > { %6575 = vmatmul.mubr.msk.f32.vlgmr.msra.gmra.mxu0 %vm560_vm0, %v9226_v50  ;;  %6576 = vmatmul.mubr.msk.f32.vlgmr.msra.gmra.mxu1 %vm560_vm0, %v9226_v50 }
0x1dd2   : > { %4938 = vmatpush1.msra.mxu0 %v4680_v17  ;;  %5009 = vmatpush1.msra.mxu1 %v4682_v51  ;;  %v4689_v17 = vld [vmem:[%s10448_s9 + $0x3e8] sm:$0xff]  ;;  %v4691_v51 = vld [vmem:[%s10448_s9 + $0x3f8] sm:$0xff] }
0x1dd3   : > { %4939 = vmatprep.subr.mxu0 %v4665_v52  ;;  %5010 = vmatprep.subr.mxu1 %v4667_v53  ;;  %v4688_v52 = vld [vmem:[%s10448_s9 + $0x3e0] sm:$0xff]  ;;  %v4690_v53 = vld [vmem:[%s10448_s9 + $0x3f0] sm:$0xff] }
0x1dd4   : > { %4940 = vmatpush1.msra.mxu0 %v4664_v54  ;;  %5011 = vmatpush1.msra.mxu1 %v4666_v55  ;;  %v4673_v54 = vld [vmem:[%s10448_s9 + $0x368] sm:$0xff]  ;;  %v4675_v55 = vld [vmem:[%s10448_s9 + $0x378] sm:$0xff] }
0x1dd5   : > { %4941 = vmatprep.subr.mxu0 %v4649_v56  ;;  %5012 = vmatprep.subr.mxu1 %v4651_v57  ;;  %v4672_v56 = vld [vmem:[%s10448_s9 + $0x360] sm:$0xff]  ;;  %v4674_v57 = vld [vmem:[%s10448_s9 + $0x370] sm:$0xff] }
0x1dd6   : > { %4942 = vmatpush1.msra.mxu0 %v4648_v58  ;;  %5013 = vmatpush1.msra.mxu1 %v4650_v59  ;;  %v4657_v58 = vld [vmem:[%s10448_s9 + $0x2e8] sm:$0xff]  ;;  %v4659_v59 = vld [vmem:[%s10448_s9 + $0x2f8] sm:$0xff] }
0x1dd7   : > { %4943 = vmatprep.subr.mxu0 %v4633_v60  ;;  %5014 = vmatprep.subr.mxu1 %v4635_v61  ;;  %v4656_v60 = vld [vmem:[%s10448_s9 + $0x2e0] sm:$0xff]  ;;  %v4658_v61 = vld [vmem:[%s10448_s9 + $0x2f0] sm:$0xff] }
0x1dd8   : > { %4944 = vmatpush1.msra.mxu0 %v4632_v62  ;;  %5015 = vmatpush1.msra.mxu1 %v4634_v63  ;;  %v4641_v62 = vld [vmem:[%s10448_s9 + $0x268] sm:$0xff]  ;;  %v4643_v63 = vld [vmem:[%s10448_s9 + $0x278] sm:$0xff] }
0x1dd9   : > { %4945 = vmatprep.subr.mxu0 %v4617_v28  ;;  %5016 = vmatprep.subr.mxu1 %v4619_v0  ;;  %v4640_v28 = vld [vmem:[%s10448_s9 + $0x260] sm:$0xff]  ;;  %v4642_v0 = vld [vmem:[%s10448_s9 + $0x270] sm:$0xff] }
0x1dda   : > { %4946 = vmatpush1.msra.mxu0 %v4616_v3  ;;  %5017 = vmatpush1.msra.mxu1 %v4618_v4  ;;  %v4625_v3 = vld [vmem:[%s10448_s9 + $0x1e8] sm:$0xff]  ;;  %v4627_v4 = vld [vmem:[%s10448_s9 + $0x1f8] sm:$0xff] }
0x1ddb   : > { %4947 = vmatprep.subr.mxu0 %v4601_v5  ;;  %5018 = vmatprep.subr.mxu1 %v4603_v6  ;;  %v4624_v5 = vld [vmem:[%s10448_s9 + $0x1e0] sm:$0xff]  ;;  %v4626_v6 = vld [vmem:[%s10448_s9 + $0x1f0] sm:$0xff] }
0x1ddc   : > { %4948 = vmatpush1.msra.mxu0 %v4600_v7  ;;  %5019 = vmatpush1.msra.mxu1 %v4602_v1  ;;  %v4609_v7 = vld [vmem:[%s10448_s9 + $0x168] sm:$0xff]  ;;  %v4611_v1 = vld [vmem:[%s10448_s9 + $0x178] sm:$0xff] }
0x1ddd   : > { %4949 = vmatprep.subr.mxu0 %v4585_v8  ;;  %5020 = vmatprep.subr.mxu1 %v4587_v9  ;;  %v4608_v8 = vld [vmem:[%s10448_s9 + $0x160] sm:$0xff]  ;;  %v4610_v9 = vld [vmem:[%s10448_s9 + $0x170] sm:$0xff] }
0x1dde   : > { %4950 = vmatpush1.msra.mxu0 %v4584_v10  ;;  %5021 = vmatpush1.msra.mxu1 %v4586_v11  ;;  %v4593_v10 = vld [vmem:[%s10448_s9 + $0xe8] sm:$0xff]  ;;  %v4595_v11 = vld [vmem:[%s10448_s9 + $0xf8] sm:$0xff] }
0x1ddf   : > { %4951 = vmatprep.subr.mxu0 %v4569_v12  ;;  %5022 = vmatprep.subr.mxu1 %v4571_v13  ;;  %v4592_v12 = vld [vmem:[%s10448_s9 + $0xe0] sm:$0xff]  ;;  %v4594_v13 = vld [vmem:[%s10448_s9 + $0xf0] sm:$0xff] }
0x1de0   : > { %4952 = vmatpush1.msra.mxu0 %v4568_v14  ;;  %4985 = vmatprep.mubr.f32.mxu0 %v7850_v2  ;;  %v4577_v14 = vld [vmem:[%s10448_s9 + $0x68] sm:$0xff] }
0x1de1   : > { %5023 = vmatpush1.msra.mxu1 %v4570_v15  ;;  %5056 = vmatprep.mubr.f32.mxu1 %v7850_v2  ;;  %v4579_v15 = vld [vmem:[%s10448_s9 + $0x78] sm:$0xff] }
0x1de2   : > { %6577 = vmatmul.mubr.msk.f32.vlgmr.msra.gmra.mxu0 %vm560_vm0, %v9226_v50  ;;  %6578 = vmatmul.mubr.msk.f32.vlgmr.msra.gmra.mxu1 %vm560_vm0, %v9226_v50 }
0x1de3   : > { %5079 = vmatprep.subr.mxu0 %v4685_v16  ;;  %5150 = vmatprep.subr.mxu1 %v4687_v18  ;;  %v4576_v16 = vld [vmem:[%s10448_s9 + $0x60] sm:$0xff]  ;;  %v4578_v18 = vld [vmem:[%s10448_s9 + $0x70] sm:$0xff] }
0x1de4   : > { %5080 = vmatpush1.msra.mxu0 %v4684_v19  ;;  %5151 = vmatpush1.msra.mxu1 %v4686_v20  ;;  %v5394_v19 = vld [vmem:[%s10450_s11 + $0xf8] sm:$0xff] }
0x1de5   : > { %5081 = vmatprep.subr.mxu0 %v4669_v21  ;;  %5152 = vmatprep.subr.mxu1 %v4671_v22  ;;  %v5426_v20 = vld [vmem:[%s10450_s11 + $0x1f8] sm:$0xff] }
0x1de6   : > { %5082 = vmatpush1.msra.mxu0 %v4668_v23  ;;  %5153 = vmatpush1.msra.mxu1 %v4670_v24  ;;  %v5378_v21 = vld [vmem:[%s10450_s11 + $0x78] sm:$0xff]  ;;  %v5393_v23 = vld [vmem:[%s10450_s11 + $0xf0] sm:$0xff] }
0x1de7   : > { %5083 = vmatprep.subr.mxu0 %v4653_v25  ;;  %5154 = vmatprep.subr.mxu1 %v4655_v26  ;;  %v5410_v22 = vld [vmem:[%s10450_s11 + $0x178] sm:$0xff]  ;;  %v5377_v24 = vld [vmem:[%s10450_s11 + $0x70] sm:$0xff]  ;;  %v5392_v26 = vld [vmem:[%s10450_s11 + $0xe8] sm:$0xff] }
0x1de8   : > { %5084 = vmatpush1.msra.mxu0 %v4652_v27  ;;  %5155 = vmatpush1.msra.mxu1 %v4654_v29  ;;  %v5409_v25 = vld [vmem:[%s10450_s11 + $0x170] sm:$0xff]  ;;  %v5424_v27 = vld [vmem:[%s10450_s11 + $0x1e8] sm:$0xff] }
0x1de9   : > { %5085 = vmatprep.subr.mxu0 %v4637_v30  ;;  %5156 = vmatprep.subr.mxu1 %v4639_v31  ;;  %v5376_v29 = vld [vmem:[%s10450_s11 + $0x68] sm:$0xff]  ;;  %v5391_v31 = vld [vmem:[%s10450_s11 + $0xe0] sm:$0xff] }
0x1dea   : > { %5086 = vmatpush1.msra.mxu0 %v4636_v32  ;;  %5157 = vmatpush1.msra.mxu1 %v4638_v33  ;;  %v5408_v30 = vld [vmem:[%s10450_s11 + $0x168] sm:$0xff]  ;;  %v5423_v32 = vld [vmem:[%s10450_s11 + $0x1e0] sm:$0xff] }
0x1deb   : > { %5087 = vmatprep.subr.mxu0 %v4621_v34  ;;  %5158 = vmatprep.subr.mxu1 %v4623_v35  ;;  %v5375_v33 = vld [vmem:[%s10450_s11 + $0x60] sm:$0xff]  ;;  %v5390_v35 = vld [vmem:[%s10450_s11 + $0xd8] sm:$0xff] }
0x1dec   : > { %5088 = vmatpush1.msra.mxu0 %v4620_v36  ;;  %5159 = vmatpush1.msra.mxu1 %v4622_v37  ;;  %v5407_v34 = vld [vmem:[%s10450_s11 + $0x160] sm:$0xff]  ;;  %v5422_v36 = vld [vmem:[%s10450_s11 + $0x1d8] sm:$0xff] }
0x1ded   : > { %5089 = vmatprep.subr.mxu0 %v4605_v38  ;;  %5160 = vmatprep.subr.mxu1 %v4607_v39  ;;  %v5374_v37 = vld [vmem:[%s10450_s11 + $0x58] sm:$0xff]  ;;  %v5389_v39 = vld [vmem:[%s10450_s11 + $0xd0] sm:$0xff] }
0x1dee   : > { %5090 = vmatpush1.msra.mxu0 %v4604_v40  ;;  %5161 = vmatpush1.msra.mxu1 %v4606_v41  ;;  %v5406_v38 = vld [vmem:[%s10450_s11 + $0x158] sm:$0xff]  ;;  %v5421_v40 = vld [vmem:[%s10450_s11 + $0x1d0] sm:$0xff] }
0x1def   : > { %5091 = vmatprep.subr.mxu0 %v4589_v42  ;;  %5162 = vmatprep.subr.mxu1 %v4591_v43  ;;  %v5373_v41 = vld [vmem:[%s10450_s11 + $0x50] sm:$0xff]  ;;  %v5388_v43 = vld [vmem:[%s10450_s11 + $0xc8] sm:$0xff] }
0x1df0   : > { %5092 = vmatpush1.msra.mxu0 %v4588_v44  ;;  %5163 = vmatpush1.msra.mxu1 %v4590_v45  ;;  %v5405_v42 = vld [vmem:[%s10450_s11 + $0x150] sm:$0xff]  ;;  %v5420_v44 = vld [vmem:[%s10450_s11 + $0x1c8] sm:$0xff] }
0x1df1   : > { %5093 = vmatprep.subr.mxu0 %v4573_v46  ;;  %5164 = vmatprep.subr.mxu1 %v4575_v47  ;;  %v5372_v45 = vld [vmem:[%s10450_s11 + $0x48] sm:$0xff]  ;;  %v5387_v47 = vld [vmem:[%s10450_s11 + $0xc0] sm:$0xff] }
0x1df2   : > { %5094 = vmatpush1.msra.mxu0 %v4572_v48  ;;  %5127 = vmatprep.mubr.f32.mxu0 %v7850_v2  ;;  %v5404_v46 = vld [vmem:[%s10450_s11 + $0x148] sm:$0xff]  ;;  %v5419_v48 = vld [vmem:[%s10450_s11 + $0x1c0] sm:$0xff] }
0x1df3   : > { %5165 = vmatpush1.msra.mxu1 %v4574_v49  ;;  %5198 = vmatprep.mubr.f32.mxu1 %v7850_v2  ;;  %v5371_v49 = vld [vmem:[%s10450_s11 + $0x40] sm:$0xff] }
0x1df4   : > { %6579 = vmatmul.mubr.msk.f32.vlgmr.msra.gmra.mxu0 %vm560_vm0, %v9226_v50  ;;  %6580 = vmatmul.mubr.msk.f32.vlgmr.msra.gmra.mxu1 %vm560_vm0, %v9226_v50 }
0x1df5   : > { %5221 = vmatprep.subr.mxu0 %v4689_v17  ;;  %5292 = vmatprep.subr.mxu1 %v4691_v51  ;;  %v5403_v17 = vld [vmem:[%s10450_s11 + $0x140] sm:$0xff]  ;;  %v5386_v51 = vld [vmem:[%s10450_s11 + $0xb8] sm:$0xff] }
0x1df6   : > { %5222 = vmatpush1.msra.mxu0 %v4688_v52  ;;  %5293 = vmatpush1.msra.mxu1 %v4690_v53  ;;  %v5418_v52 = vld [vmem:[%s10450_s11 + $0x1b8] sm:$0xff] }
0x1df7   : > { %5223 = vmatprep.subr.mxu0 %v4673_v54  ;;  %5294 = vmatprep.subr.mxu1 %v4675_v55  ;;  %v5370_v53 = vld [vmem:[%s10450_s11 + $0x38] sm:$0xff]  ;;  %v5385_v55 = vld [vmem:[%s10450_s11 + $0xb0] sm:$0xff] }
0x1df8   : > { %5224 = vmatpush1.msra.mxu0 %v4672_v56  ;;  %5295 = vmatpush1.msra.mxu1 %v4674_v57  ;;  %v5402_v54 = vld [vmem:[%s10450_s11 + $0x138] sm:$0xff]  ;;  %v5417_v56 = vld [vmem:[%s10450_s11 + $0x1b0] sm:$0xff] }
0x1df9   : > { %5225 = vmatprep.subr.mxu0 %v4657_v58  ;;  %5296 = vmatprep.subr.mxu1 %v4659_v59  ;;  %v5369_v57 = vld [vmem:[%s10450_s11 + $0x30] sm:$0xff]  ;;  %v5384_v59 = vld [vmem:[%s10450_s11 + $0xa8] sm:$0xff] }
0x1dfa   : > { %5226 = vmatpush1.msra.mxu0 %v4656_v60  ;;  %5297 = vmatpush1.msra.mxu1 %v4658_v61  ;;  %v5401_v58 = vld [vmem:[%s10450_s11 + $0x130] sm:$0xff]  ;;  %v5416_v60 = vld [vmem:[%s10450_s11 + $0x1a8] sm:$0xff] }
0x1dfb   : > { %5227 = vmatprep.subr.mxu0 %v4641_v62  ;;  %5298 = vmatprep.subr.mxu1 %v4643_v63  ;;  %v5368_v61 = vld [vmem:[%s10450_s11 + $0x28] sm:$0xff]  ;;  %v5383_v63 = vld [vmem:[%s10450_s11 + $0xa0] sm:$0xff] }
0x1dfc   : > { %5228 = vmatpush1.msra.mxu0 %v4640_v28  ;;  %5299 = vmatpush1.msra.mxu1 %v4642_v0  ;;  %v5400_v62 = vld [vmem:[%s10450_s11 + $0x128] sm:$0xff]  ;;  %v5415_v28 = vld [vmem:[%s10450_s11 + $0x1a0] sm:$0xff] }
0x1dfd   : > { %5229 = vmatprep.subr.mxu0 %v4625_v3  ;;  %5300 = vmatprep.subr.mxu1 %v4627_v4  ;;  %v5367_v0 = vld [vmem:[%s10450_s11 + $0x20] sm:$0xff]  ;;  %v5382_v4 = vld [vmem:[%s10450_s11 + $0x98] sm:$0xff] }
0x1dfe   : > { %5230 = vmatpush1.msra.mxu0 %v4624_v5  ;;  %5301 = vmatpush1.msra.mxu1 %v4626_v6  ;;  %v5399_v3 = vld [vmem:[%s10450_s11 + $0x120] sm:$0xff]  ;;  %v5414_v5 = vld [vmem:[%s10450_s11 + $0x198] sm:$0xff] }
0x1dff   : > { %5231 = vmatprep.subr.mxu0 %v4609_v7  ;;  %5302 = vmatprep.subr.mxu1 %v4611_v1  ;;  %v5366_v6 = vld [vmem:[%s10450_s11 + $0x18] sm:$0xff]  ;;  %v5381_v1 = vld [vmem:[%s10450_s11 + $0x90] sm:$0xff] }
0x1e00   : > { %5232 = vmatpush1.msra.mxu0 %v4608_v8  ;;  %5303 = vmatpush1.msra.mxu1 %v4610_v9  ;;  %v5398_v7 = vld [vmem:[%s10450_s11 + $0x118] sm:$0xff]  ;;  %v5413_v8 = vld [vmem:[%s10450_s11 + $0x190] sm:$0xff] }
0x1e01   : > { %5233 = vmatprep.subr.mxu0 %v4593_v10  ;;  %5304 = vmatprep.subr.mxu1 %v4595_v11  ;;  %v5365_v9 = vld [vmem:[%s10450_s11 + $0x10] sm:$0xff]  ;;  %v5380_v11 = vld [vmem:[%s10450_s11 + $0x88] sm:$0xff] }
0x1e02   : > { %5234 = vmatpush1.msra.mxu0 %v4592_v12  ;;  %5305 = vmatpush1.msra.mxu1 %v4594_v13  ;;  %v5397_v10 = vld [vmem:[%s10450_s11 + $0x110] sm:$0xff]  ;;  %v5412_v12 = vld [vmem:[%s10450_s11 + $0x188] sm:$0xff] }
0x1e03   : > { %5235 = vmatprep.subr.mxu0 %v4577_v14  ;;  %5306 = vmatprep.subr.mxu1 %v4579_v15  ;;  %v5364_v13 = vld [vmem:[%s10450_s11 + $0x8] sm:$0xff]  ;;  %v5379_v15 = vld [vmem:[%s10450_s11 + $0x80] sm:$0xff] }
0x1e04   : > { %5236 = vmatpush1.msra.mxu0 %v4576_v16  ;;  %5269 = vmatprep.mubr.f32.mxu0 %v7850_v2  ;;  %v5396_v14 = vld [vmem:[%s10450_s11 + $0x108] sm:$0xff]  ;;  %v5411_v16 = vld [vmem:[%s10450_s11 + $0x180] sm:$0xff] }
0x1e05   : > { %5307 = vmatpush1.msra.mxu1 %v4578_v18  ;;  %5340 = vmatprep.mubr.f32.mxu1 %v7850_v2  ;;  %v5425_v2 = vld [vmem:[%s10450_s11 + $0x1f0] sm:$0xff]  ;;  %v5363_v18 = vld [vmem:[%s10450_s11] sm:$0xff] }
0x1e06   : > { %6581 = vmatmul.mubr.msk.f32.vlgmr.msra.gmra.mxu0 %vm560_vm0, %v9226_v50  ;;  %6582 = vmatmul.mubr.msk.f32.vlgmr.msra.gmra.mxu1 %vm560_vm0, %v9226_v50 }
0x1e07   : > { %6854 = vmatprep.subr.mxu0 %v5394_v19  ;;  %6889 = vmatprep.subr.mxu1 %v5426_v20  ;;  %v5395_v19 = vld [vmem:[%s10450_s11 + $0x100] sm:$0xff]  ;;  %v5458_v20 = vld [vmem:[%s10450_s11 + $0x2f8] sm:$0xff] }
0x1e08   : > { %6855 = vmatpush3.msra.mxu0 %v5378_v21  ;;  %6890 = vmatpush3.msra.mxu1 %v5410_v22  ;;  %v5490_v21 = vld [vmem:[%s10450_s11 + $0x3f8] sm:$0xff]  ;;  %v4696_v22 = vlaneseq }
0x1e09   : > { %6856 = vmatprep.subr.mxu0 %v5393_v23  ;;  %6891 = vmatprep.subr.mxu1 %v5425_v2 }
0x1e0a   : > { %6857 = vmatpush3.msra.mxu0 %v5377_v24  ;;  %6892 = vmatpush3.msra.mxu1 %v5409_v25  ;;  %v9730_v23 = vshrl.u32 %v4696_v22, 7  ;;  %v9736_v24 = vld [vmem:[%s10449_s10 + $0x8] sm:$0xff]  ;;  %v5483_v22 = vld [vmem:[%s10450_s11 + $0x3c0] sm:$0xff] }
0x1e0b   : > { %6858 = vmatprep.subr.mxu0 %v5392_v26  ;;  %6893 = vmatprep.subr.mxu1 %v5424_v27 }
0x1e0c   : > { %6859 = vmatpush3.msra.mxu0 %v5376_v29  ;;  %6894 = vmatpush3.msra.mxu1 %v5408_v30  ;;  %v4714_v2 = vsub.s32 4, %v9730_v23  ;;  %v4722_v25 = vsub.s32 6, %v9730_v23  ;;  %v4698_v29 = vsub.s32 0, %v9730_v23  ;;  %v4706_v30 = vsub.s32 2, %v9730_v23 }
0x1e0d   : > { %6860 = vmatprep.subr.mxu0 %v5391_v31  ;;  %6895 = vmatprep.subr.mxu1 %v5423_v32  ;;  %v9754_v31 = vld [vmem:[%s10449_s10] sm:$0xff]  ;;  %v4702_v32 = vsub.s32 1, %v9730_v23 }
0x1e0e   : > { %6861 = vmatpush3.msra.mxu0 %v5375_v33  ;;  %6896 = vmatpush3.msra.mxu1 %v5407_v34  ;;  %v9742_v26 = vrot.slane %v9736_v24, %v4714_v2  ;;  %v9747_v27 = vrot.slane %v9736_v24, %v4722_v25  ;;  %v4710_v33 = vsub.s32 3, %v9730_v23  ;;  %v4699_v34 = vrot.slane %v9754_v31, %v4698_v29 }
0x1e0f   : > { %6862 = vmatprep.subr.mxu0 %v5390_v35  ;;  %6897 = vmatprep.subr.mxu1 %v5422_v36  ;;  %v4707_v35 = vrot.slane %v9754_v31, %v4706_v30  ;;  %v4703_v36 = vrot.slane %v9754_v31, %v4702_v32 }
0x1e10   : > { %6863 = vmatpush3.msra.mxu0 %v5374_v37  ;;  %6898 = vmatpush3.msra.mxu1 %v5406_v38  ;;  %v4711_v37 = vrot.slane %v9754_v31, %v4710_v33 }
0x1e11   : > { %6864 = vmatprep.subr.mxu0 %v5389_v39  ;;  %6899 = vmatprep.subr.mxu1 %v5421_v40 }
0x1e12   : > { %6865 = vmatpush3.msra.mxu0 %v5373_v41  ;;  %6900 = vmatpush3.msra.mxu1 %v5405_v42 }
0x1e13   : > { %6866 = vmatprep.subr.mxu0 %v5388_v43  ;;  %6901 = vmatprep.subr.mxu1 %v5420_v44 }
0x1e14   : > { %6867 = vmatpush3.msra.mxu0 %v5372_v45  ;;  %6902 = vmatpush3.msra.mxu1 %v5404_v46 }
0x1e15   : > { %6868 = vmatprep.subr.mxu0 %v5387_v47  ;;  %6903 = vmatprep.subr.mxu1 %v5419_v48 }
0x1e16   : > { %6869 = vmatpush3.msra.mxu0 %v5371_v49  ;;  %6904 = vmatpush3.msra.mxu1 %v5403_v17  ;;  %v5442_v17 = vld [vmem:[%s10450_s11 + $0x278] sm:$0xff] }
0x1e17   : > { %6870 = vmatprep.subr.mxu0 %v5386_v51  ;;  %6905 = vmatprep.subr.mxu1 %v5418_v52  ;;  %v5474_v51 = vld [vmem:[%s10450_s11 + $0x378] sm:$0xff]  ;;  %v5457_v52 = vld [vmem:[%s10450_s11 + $0x2f0] sm:$0xff] }
0x1e18   : > { %6871 = vmatpush3.msra.mxu0 %v5370_v53  ;;  %6906 = vmatpush3.msra.mxu1 %v5402_v54  ;;  %v5489_v53 = vld [vmem:[%s10450_s11 + $0x3f0] sm:$0xff] }
0x1e19   : > { %6872 = vmatprep.subr.mxu0 %v5385_v55  ;;  %6907 = vmatprep.subr.mxu1 %v5417_v56  ;;  %v5441_v54 = vld [vmem:[%s10450_s11 + $0x270] sm:$0xff]  ;;  %v5456_v56 = vld [vmem:[%s10450_s11 + $0x2e8] sm:$0xff] }
0x1e1a   : > { %6873 = vmatpush3.msra.mxu0 %v5369_v57  ;;  %6908 = vmatpush3.msra.mxu1 %v5401_v58  ;;  %v5473_v55 = vld [vmem:[%s10450_s11 + $0x370] sm:$0xff]  ;;  %v5488_v57 = vld [vmem:[%s10450_s11 + $0x3e8] sm:$0xff] }
0x1e1b   : > { %6874 = vmatprep.subr.mxu0 %v5384_v59  ;;  %6909 = vmatprep.subr.mxu1 %v5416_v60  ;;  %v5440_v58 = vld [vmem:[%s10450_s11 + $0x268] sm:$0xff]  ;;  %v5455_v60 = vld [vmem:[%s10450_s11 + $0x2e0] sm:$0xff] }
0x1e1c   : > { %6875 = vmatpush3.msra.mxu0 %v5368_v61  ;;  %6910 = vmatpush3.msra.mxu1 %v5400_v62  ;;  %v5472_v59 = vld [vmem:[%s10450_s11 + $0x368] sm:$0xff]  ;;  %v5487_v61 = vld [vmem:[%s10450_s11 + $0x3e0] sm:$0xff] }
0x1e1d   : > { %6876 = vmatprep.subr.mxu0 %v5383_v63  ;;  %6911 = vmatprep.subr.mxu1 %v5415_v28  ;;  %v5439_v62 = vld [vmem:[%s10450_s11 + $0x260] sm:$0xff]  ;;  %v4718_v28 = vsub.s32 5, %v9730_v23 }
0x1e1e   : > { %6877 = vmatpush3.msra.mxu0 %v5367_v0  ;;  %6912 = vmatpush3.msra.mxu1 %v5399_v3  ;;  %v5471_v63 = vld [vmem:[%s10450_s11 + $0x360] sm:$0xff]  ;;  %v4726_v0 = vsub.s32 7, %v9730_v23  ;;  %v5454_v3 = vld [vmem:[%s10450_s11 + $0x2d8] sm:$0xff]  ;;  %v5492_v23 = vld [vmem:[%s10450_s11 + $0x408] sm:$0xff] }
0x1e1f   : > { %6878 = vmatprep.subr.mxu0 %v5382_v4  ;;  %6913 = vmatprep.subr.mxu1 %v5414_v5  ;;  %v5486_v4 = vld [vmem:[%s10450_s11 + $0x3d8] sm:$0xff] }
0x1e20   : > { %6879 = vmatpush3.msra.mxu0 %v5366_v6  ;;  %6914 = vmatpush3.msra.mxu1 %v5398_v7  ;;  %v5438_v5 = vld [vmem:[%s10450_s11 + $0x258] sm:$0xff]  ;;  %v5453_v7 = vld [vmem:[%s10450_s11 + $0x2d0] sm:$0xff] }
0x1e21   : > { %6880 = vmatprep.subr.mxu0 %v5381_v1  ;;  %6915 = vmatprep.subr.mxu1 %v5413_v8  ;;  %v5470_v6 = vld [vmem:[%s10450_s11 + $0x358] sm:$0xff]  ;;  %v5485_v1 = vld [vmem:[%s10450_s11 + $0x3d0] sm:$0xff]  ;;  %v4719_v8 = vrot.slane %v9754_v31, %v4718_v28 }
0x1e22   : > { %6881 = vmatpush3.msra.mxu0 %v5365_v9  ;;  %6916 = vmatpush3.msra.mxu1 %v5397_v10  ;;  %v4727_v9 = vrot.slane %v9754_v31, %v4726_v0  ;;  %v5437_v10 = vld [vmem:[%s10450_s11 + $0x250] sm:$0xff] }
0x1e23   : > { %6882 = vmatprep.subr.mxu0 %v5380_v11  ;;  %6917 = vmatprep.subr.mxu1 %v5412_v12  ;;  %v5469_v11 = vld [vmem:[%s10450_s11 + $0x350] sm:$0xff] }
0x1e24   : > { %6883 = vmatpush3.msra.mxu0 %v5364_v13  ;;  %6918 = vmatpush3.msra.mxu1 %v5396_v14  ;;  %v5452_v14 = vld [vmem:[%s10450_s11 + $0x2c8] sm:$0xff] }
0x1e25   : > { %6884 = vmatprep.subr.mxu0 %v5379_v15  ;;  %6919 = vmatprep.subr.mxu1 %v5411_v16  ;;  %v5484_v15 = vld [vmem:[%s10450_s11 + $0x3c8] sm:$0xff] }
0x1e26   : > { %6885 = vmatpush3.msra.mxu0 %v5363_v18  ;;  %6920 = vmatpush3.msra.mxu1 %v5395_v19  ;;  %v5436_v16 = vld [vmem:[%s10450_s11 + $0x248] sm:$0xff] }
0x1e27   : > { %6924 = vmatprep.subr.mxu0 %v5458_v20  ;;  %6959 = vmatprep.subr.mxu1 %v5490_v21  ;;  %v5468_v18 = vld [vmem:[%s10450_s11 + $0x348] sm:$0xff]  ;;  %v5451_v21 = vld [vmem:[%s10450_s11 + $0x2c0] sm:$0xff] }
0x1e91   : > { %v4845_v38 = vpop.f32.mrf.mxu0  ;;  %v4916_v39 = vpop.f32.mrf.mxu1 }
0x1e92   : > { %v4846_v40 = vadd.f32 %v4845_v38, %v4699_v34  ;;  %v4917_v41 = vadd.f32 %v4916_v39, %v4707_v35 }
0x1e93   : > { %v4847_v42 = vpop.f32.mrf.mxu0  ;;  %v4918_v43 = vpop.f32.mrf.mxu1 }
0x1e94   : > { %v4848_v44 = vadd.f32 %v4847_v42, %v4703_v36  ;;  %v4919_v45 = vadd.f32 %v4918_v43, %v4711_v37  ;;  %v5347_v48 = vmax.f32 %v4846_v40, 0.0  ;;  %v5349_v49 = vmax.f32 %v4917_v41, 0.0  ;;  %v5435_v36 = vld [vmem:[%s10450_s11 + $0x240] sm:$0xff]  ;;  %v5450_v40 = vld [vmem:[%s10450_s11 + $0x2b8] sm:$0xff] }
0x1e95   : > { %v5467_v37 = vld [vmem:[%s10450_s11 + $0x340] sm:$0xff]  ;;  %v5482_v41 = vld [vmem:[%s10450_s11 + $0x3b8] sm:$0xff] }
0x1e96   : > { %v5348_v46 = vmax.f32 %v4848_v44, 0.0  ;;  %v5350_v47 = vmax.f32 %v4919_v45, 0.0  ;;  %v5434_v42 = vld [vmem:[%s10450_s11 + $0x238] sm:$0xff]  ;;  %v5449_v44 = vld [vmem:[%s10450_s11 + $0x2b0] sm:$0xff] }
0x1e97   : > { %v5466_v43 = vld [vmem:[%s10450_s11 + $0x338] sm:$0xff]  ;;  %v5481_v45 = vld [vmem:[%s10450_s11 + $0x3b0] sm:$0xff] }
0x1e98   : > { %5690 = vmatprep.mubr.f32.mxu0 %v5348_v46  ;;  %5760 = vmatprep.mubr.f32.mxu1 %v5350_v47  ;;  %v5433_v46 = vld [vmem:[%s10450_s11 + $0x230] sm:$0xff] }
0x1e99   : > { %5691 = vmatmul.mubr.f32.vlgmr.msra.gmra.mxu0 %v5347_v48  ;;  %5761 = vmatmul.mubr.f32.vlgmr.msra.gmra.mxu1 %v5349_v49  ;;  %v5465_v47 = vld [vmem:[%s10450_s11 + $0x330] sm:$0xff]  ;;  %v5448_v48 = vld [vmem:[%s10450_s11 + $0x2a8] sm:$0xff] }
0x1e9a   : > { %6925 = vmatpush3.msra.mxu0 %v5442_v17  ;;  %6960 = vmatpush3.msra.mxu1 %v5474_v51  ;;  %v5480_v49 = vld [vmem:[%s10450_s11 + $0x3a8] sm:$0xff] }
0x1e9b   : > { %6926 = vmatprep.subr.mxu0 %v5457_v52  ;;  %6961 = vmatprep.subr.mxu1 %v5489_v53  ;;  %v5432_v17 = vld [vmem:[%s10450_s11 + $0x228] sm:$0xff]  ;;  %v5447_v52 = vld [vmem:[%s10450_s11 + $0x2a0] sm:$0xff] }
0x1e9c   : > { %6927 = vmatpush3.msra.mxu0 %v5441_v54  ;;  %6962 = vmatpush3.msra.mxu1 %v5473_v55  ;;  %v5464_v51 = vld [vmem:[%s10450_s11 + $0x328] sm:$0xff]  ;;  %v5479_v53 = vld [vmem:[%s10450_s11 + $0x3a0] sm:$0xff] }
0x1e9d   : > { %6928 = vmatprep.subr.mxu0 %v5456_v56  ;;  %6963 = vmatprep.subr.mxu1 %v5488_v57  ;;  %v5431_v54 = vld [vmem:[%s10450_s11 + $0x220] sm:$0xff]  ;;  %v5446_v56 = vld [vmem:[%s10450_s11 + $0x298] sm:$0xff] }
0x1e9e   : > { %6929 = vmatpush3.msra.mxu0 %v5440_v58  ;;  %6964 = vmatpush3.msra.mxu1 %v5472_v59  ;;  %v5463_v55 = vld [vmem:[%s10450_s11 + $0x320] sm:$0xff]  ;;  %v5478_v57 = vld [vmem:[%s10450_s11 + $0x398] sm:$0xff]  ;;  %v4715_v58 = vrot.slane %v9754_v31, %v4714_v2  ;;  %v4723_v59 = vrot.slane %v9754_v31, %v4722_v25  ;;  %v5445_v2 = vld [vmem:[%s10450_s11 + $0x290] sm:$0xff] }
0x1e9f   : > { %6930 = vmatprep.subr.mxu0 %v5455_v60  ;;  %6965 = vmatprep.subr.mxu1 %v5487_v61  ;;  %v5430_v60 = vld [vmem:[%s10450_s11 + $0x218] sm:$0xff]  ;;  %v5477_v25 = vld [vmem:[%s10450_s11 + $0x390] sm:$0xff] }
0x1ea0   : > { %6931 = vmatpush3.msra.mxu0 %v5439_v62  ;;  %6966 = vmatpush3.msra.mxu1 %v5471_v63  ;;  %v5462_v61 = vld [vmem:[%s10450_s11 + $0x318] sm:$0xff]  ;;  %v5429_v31 = vld [vmem:[%s10450_s11 + $0x210] sm:$0xff]  ;;  %v4735_v63 = vrot.slane %v9736_v24, %v4702_v32  ;;  %v5428_v32 = vld [vmem:[%s10450_s11 + $0x208] sm:$0xff] }
0x1ea1   : > { %6932 = vmatprep.subr.mxu0 %v5454_v3  ;;  %6967 = vmatprep.subr.mxu1 %v5486_v4  ;;  %v5461_v62 = vld [vmem:[%s10450_s11 + $0x310] sm:$0xff]  ;;  %v4743_v3 = vrot.slane %v9736_v24, %v4710_v33  ;;  %v5444_v4 = vld [vmem:[%s10450_s11 + $0x288] sm:$0xff] }
0x1ea2   : > { %v9844_v12 = vpop.f32.mrf.mxu0  ;;  %v9846_v13 = vpop.f32.mrf.mxu1  ;;  %6933 = vmatpush3.msra.mxu0 %v5438_v5  ;;  %6968 = vmatpush3.msra.mxu1 %v5470_v6  ;;  %v5476_v5 = vld [vmem:[%s10450_s11 + $0x388] sm:$0xff] }
0x1ea3   : > { %6934 = vmatprep.subr.mxu0 %v5453_v7  ;;  %6969 = vmatprep.subr.mxu1 %v5485_v1  ;;  %v4988_v6 = vadd.f32 %v9844_v12, %v4715_v58  ;;  %v5059_v7 = vadd.f32 %v9846_v13, %v4723_v59  ;;  %v5460_v33 = vld [vmem:[%s10450_s11 + $0x308] sm:$0xff]  ;;  %v5427_v13 = vld [vmem:[%s10450_s11 + $0x200] sm:$0xff] }
0x1ea4   : > { %v4989_v19 = vpop.f32.mrf.mxu0  ;;  %v5060_v20 = vpop.f32.mrf.mxu1  ;;  %6935 = vmatpush3.msra.mxu0 %v5437_v10  ;;  %6970 = vmatpush3.msra.mxu1 %v5469_v11  ;;  %v5475_v10 = vld [vmem:[%s10450_s11 + $0x380] sm:$0xff]  ;;  %v5548_v58 = vld [vmem:[%s10450_s11 + $0x5c8] sm:$0xff] }
0x1ea5   : > { %v4990_v34 = vadd.f32 %v4989_v19, %v4719_v8  ;;  %v5061_v35 = vadd.f32 %v5060_v20, %v4727_v9  ;;  %6936 = vmatprep.subr.mxu0 %v5452_v14  ;;  %6971 = vmatprep.subr.mxu1 %v5484_v15  ;;  %v5443_v9 = vld [vmem:[%s10450_s11 + $0x280] sm:$0xff]  ;;  %v5353_v19 = vmax.f32 %v5059_v7, 0.0  ;;  %v5522_v20 = vld [vmem:[%s10450_s11 + $0x4f8] sm:$0xff]  ;;  %v5500_v59 = vld [vmem:[%s10450_s11 + $0x448] sm:$0xff] }
0x1ea6   : > { %6937 = vmatpush3.msra.mxu0 %v5436_v16  ;;  %6972 = vmatpush3.msra.mxu1 %v5468_v18  ;;  %v5459_v14 = vld [vmem:[%s10450_s11 + $0x300] sm:$0xff]  ;;  %v5351_v18 = vmax.f32 %v4988_v6, 0.0  ;;  %v5545_v6 = vld [vmem:[%s10450_s11 + $0x5b0] sm:$0xff] }
0x1ea7   : > { %v5352_v38 = vmax.f32 %v4990_v34, 0.0  ;;  %v5354_v39 = vmax.f32 %v5061_v35, 0.0  ;;  %6938 = vmatprep.subr.mxu0 %v5451_v21  ;;  %6973 = vmatprep.subr.mxu1 %v5483_v22  ;;  %v5554_v21 = vld [vmem:[%s10450_s11 + $0x5f8] sm:$0xff]  ;;  %v5497_v7 = vld [vmem:[%s10450_s11 + $0x430] sm:$0xff] }
0x1ea8   : > { %6939 = vmatpush3.msra.mxu0 %v5435_v36  ;;  %6974 = vmatpush3.msra.mxu1 %v5467_v37  ;;  %v5506_v22 = vld [vmem:[%s10450_s11 + $0x478] sm:$0xff]  ;;  %v5521_v37 = vld [vmem:[%s10450_s11 + $0x4f0] sm:$0xff] }
0x1ea9   : > { %5830 = vmatprep.mubr.f32.mxu0 %v5352_v38  ;;  %5900 = vmatprep.mubr.f32.mxu1 %v5354_v39  ;;  %v5538_v35 = vld [vmem:[%s10450_s11 + $0x578] sm:$0xff]  ;;  %v5553_v38 = vld [vmem:[%s10450_s11 + $0x5f0] sm:$0xff] }
0x1eaa   : > { %6940 = vmatprep.subr.mxu0 %v5450_v40  ;;  %6975 = vmatprep.subr.mxu1 %v5482_v41  ;;  %v5505_v39 = vld [vmem:[%s10450_s11 + $0x470] sm:$0xff]  ;;  %v5520_v41 = vld [vmem:[%s10450_s11 + $0x4e8] sm:$0xff] }
0x1eab   : > { %6941 = vmatpush3.msra.mxu0 %v5434_v42  ;;  %6976 = vmatpush3.msra.mxu1 %v5466_v43  ;;  %v5537_v40 = vld [vmem:[%s10450_s11 + $0x570] sm:$0xff]  ;;  %v5552_v42 = vld [vmem:[%s10450_s11 + $0x5e8] sm:$0xff] }
0x1eac   : > { %6942 = vmatprep.subr.mxu0 %v5449_v44  ;;  %6977 = vmatprep.subr.mxu1 %v5481_v45  ;;  %v5504_v43 = vld [vmem:[%s10450_s11 + $0x468] sm:$0xff]  ;;  %v5519_v45 = vld [vmem:[%s10450_s11 + $0x4e0] sm:$0xff] }
0x1ead   : > { %6943 = vmatpush3.msra.mxu0 %v5433_v46  ;;  %6978 = vmatpush3.msra.mxu1 %v5465_v47  ;;  %v5536_v44 = vld [vmem:[%s10450_s11 + $0x568] sm:$0xff]  ;;  %v5551_v46 = vld [vmem:[%s10450_s11 + $0x5e0] sm:$0xff] }
0x1eae   : > { %6944 = vmatprep.subr.mxu0 %v5448_v48  ;;  %6979 = vmatprep.subr.mxu1 %v5480_v49  ;;  %v5503_v47 = vld [vmem:[%s10450_s11 + $0x460] sm:$0xff]  ;;  %v5518_v49 = vld [vmem:[%s10450_s11 + $0x4d8] sm:$0xff] }
0x1eaf   : > { %6945 = vmatpush3.msra.mxu0 %v5432_v17  ;;  %6980 = vmatpush3.msra.mxu1 %v5464_v51  ;;  %v5535_v48 = vld [vmem:[%s10450_s11 + $0x560] sm:$0xff]  ;;  %v5550_v17 = vld [vmem:[%s10450_s11 + $0x5d8] sm:$0xff] }
0x1eb0   : > { %6946 = vmatprep.subr.mxu0 %v5447_v52  ;;  %6981 = vmatprep.subr.mxu1 %v5479_v53  ;;  %v5502_v51 = vld [vmem:[%s10450_s11 + $0x458] sm:$0xff]  ;;  %v5517_v53 = vld [vmem:[%s10450_s11 + $0x4d0] sm:$0xff] }
0x1eb1   : > { %6947 = vmatpush3.msra.mxu0 %v5431_v54  ;;  %6982 = vmatpush3.msra.mxu1 %v5463_v55  ;;  %v5534_v52 = vld [vmem:[%s10450_s11 + $0x558] sm:$0xff]  ;;  %v5549_v54 = vld [vmem:[%s10450_s11 + $0x5d0] sm:$0xff] }
0x1eb2   : > { %6948 = vmatprep.subr.mxu0 %v5446_v56  ;;  %6983 = vmatprep.subr.mxu1 %v5478_v57  ;;  %v5501_v55 = vld [vmem:[%s10450_s11 + $0x450] sm:$0xff]  ;;  %v5516_v57 = vld [vmem:[%s10450_s11 + $0x4c8] sm:$0xff] }
0x1eb3   : > { %6949 = vmatpush3.msra.mxu0 %v5430_v60  ;;  %6984 = vmatpush3.msra.mxu1 %v5462_v61  ;;  %v5533_v56 = vld [vmem:[%s10450_s11 + $0x550] sm:$0xff]  ;;  %v5532_v60 = vld [vmem:[%s10450_s11 + $0x548] sm:$0xff]  ;;  %v5515_v61 = vld [vmem:[%s10450_s11 + $0x4c0] sm:$0xff] }
0x1eb4   : > { %v9964_v1 = vpop.f32.mrf.mxu0  ;;  %v9966_v8 = vpop.f32.mrf.mxu1  ;;  %6950 = vmatprep.subr.mxu0 %v5445_v2  ;;  %6985 = vmatprep.subr.mxu1 %v5477_v25  ;;  %v5547_v2 = vld [vmem:[%s10450_s11 + $0x5c0] sm:$0xff] }
0x1eb5   : > { %6951 = vmatpush3.msra.mxu0 %v5429_v31  ;;  %6986 = vmatpush3.msra.mxu1 %v5461_v62  ;;  %v5499_v25 = vld [vmem:[%s10450_s11 + $0x440] sm:$0xff]  ;;  %v5514_v62 = vld [vmem:[%s10450_s11 + $0x4b8] sm:$0xff] }
0x1eb6   : > { %v5131_v11 = vpop.f32.mrf.mxu0  ;;  %v5202_v12 = vpop.f32.mrf.mxu1  ;;  %6952 = vmatprep.subr.mxu0 %v5444_v4  ;;  %6987 = vmatprep.subr.mxu1 %v5476_v5  ;;  %v5531_v31 = vld [vmem:[%s10450_s11 + $0x540] sm:$0xff]  ;;  %v5530_v4 = vld [vmem:[%s10450_s11 + $0x538] sm:$0xff]  ;;  %v5513_v5 = vld [vmem:[%s10450_s11 + $0x4b0] sm:$0xff] }
0x1eb7   : > { %v5132_v15 = vadd.f32 %v5131_v11, %v4735_v63  ;;  %v5203_v16 = vadd.f32 %v5202_v12, %v4743_v3  ;;  %6953 = vmatpush3.msra.mxu0 %v5428_v32  ;;  %6988 = vmatpush3.msra.mxu1 %v5460_v33  ;;  %v5546_v63 = vld [vmem:[%s10450_s11 + $0x5b8] sm:$0xff]  ;;  %v5529_v32 = vld [vmem:[%s10450_s11 + $0x530] sm:$0xff]  ;;  %v5512_v33 = vld [vmem:[%s10450_s11 + $0x4a8] sm:$0xff] }
0x1eb8   : > { %6954 = vmatprep.subr.mxu0 %v5443_v9  ;;  %6989 = vmatprep.subr.mxu1 %v5475_v10  ;;  %v5498_v3 = vld [vmem:[%s10450_s11 + $0x438] sm:$0xff]  ;;  %v5544_v9 = vld [vmem:[%s10450_s11 + $0x5a8] sm:$0xff]  ;;  %v5511_v12 = vld [vmem:[%s10450_s11 + $0x4a0] sm:$0xff] }
0x1eb9   : > { %6955 = vmatpush3.msra.mxu0 %v5427_v13  ;;  %6990 = vmatpush3.msra.mxu1 %v5459_v14  ;;  %v5356_v34 = vmax.f32 %v5132_v15, 0.0  ;;  %v5358_v36 = vmax.f32 %v5203_v16, 0.0  ;;  %v5496_v10 = vld [vmem:[%s10450_s11 + $0x428] sm:$0xff]  ;;  %v5543_v13 = vld [vmem:[%s10450_s11 + $0x5a0] sm:$0xff] }
0x1eba   : > { %5831 = vmatmul.mubr.f32.vlgmr.msra.gmra.mxu0 %v5351_v18  ;;  %5901 = vmatmul.mubr.f32.vlgmr.msra.gmra.mxu1 %v5353_v19  ;;  %v5528_v11 = vld [vmem:[%s10450_s11 + $0x528] sm:$0xff]  ;;  %v5495_v14 = vld [vmem:[%s10450_s11 + $0x420] sm:$0xff]  ;;  %v5510_v18 = vld [vmem:[%s10450_s11 + $0x498] sm:$0xff] }
0x1ebb   : > { %6994 = vmatprep.subr.mxu0 %v5522_v20  ;;  %7029 = vmatprep.subr.mxu1 %v5554_v21  ;;  %v5527_v15 = vld [vmem:[%s10450_s11 + $0x520] sm:$0xff]  ;;  %v5542_v19 = vld [vmem:[%s10450_s11 + $0x598] sm:$0xff]  ;;  %v4731_v20 = vrot.slane %v9736_v24, %v4698_v29  ;;  %v4739_v21 = vrot.slane %v9736_v24, %v4706_v30  ;;  %v5509_v29 = vld [vmem:[%s10450_s11 + $0x490] sm:$0xff] }
0x1ebc   : > { %6995 = vmatpush3.msra.mxu0 %v5506_v22  ;;  %5970 = vmatprep.mubr.f32.mxu0 %v5356_v34  ;;  %v5494_v34 = vld [vmem:[%s10450_s11 + $0x418] sm:$0xff]  ;;  %v5541_v30 = vld [vmem:[%s10450_s11 + $0x590] sm:$0xff] }
0x1ebd   : > { %7030 = vmatpush3.msra.mxu1 %v5538_v35  ;;  %6040 = vmatprep.mubr.f32.mxu1 %v5358_v36  ;;  %v5526_v35 = vld [vmem:[%s10450_s11 + $0x518] sm:$0xff]  ;;  %v4751_v36 = vrot.slane %v9736_v24, %v4718_v28  ;;  %v5508_v28 = vld [vmem:[%s10450_s11 + $0x488] sm:$0xff] }
0x1ebe   : > { %6996 = vmatprep.subr.mxu0 %v5521_v37  ;;  %7031 = vmatprep.subr.mxu1 %v5553_v38  ;;  %v5493_v37 = vld [vmem:[%s10450_s11 + $0x410] sm:$0xff] }
0x1ebf   : > { %6997 = vmatpush3.msra.mxu0 %v5505_v39  ;;  %7032 = vmatpush3.msra.mxu1 %v5537_v40  ;;  %v5525_v38 = vld [vmem:[%s10450_s11 + $0x510] sm:$0xff]  ;;  %v4759_v40 = vrot.slane %v9736_v24, %v4726_v0  ;;  %v5524_v24 = vld [vmem:[%s10450_s11 + $0x508] sm:$0xff]  ;;  %v5507_v0 = vld [vmem:[%s10450_s11 + $0x480] sm:$0xff] }
0x1ec0   : > { %6998 = vmatprep.subr.mxu0 %v5520_v41  ;;  %7033 = vmatprep.subr.mxu1 %v5552_v42  ;;  %v5540_v41 = vld [vmem:[%s10450_s11 + $0x588] sm:$0xff]  ;;  %v5130_v42 = vadd.f32 %v9964_v1, %v4731_v20  ;;  %v5539_v1 = vld [vmem:[%s10450_s11 + $0x580] sm:$0xff] }
0x1ec1   : > { %6999 = vmatpush3.msra.mxu0 %v5504_v43  ;;  %7034 = vmatpush3.msra.mxu1 %v5536_v44  ;;  %v5201_v43 = vadd.f32 %v9966_v8, %v4739_v21  ;;  %v5595_v20 = vld [vmem:[%s10450_s11 + $0x740] sm:$0xff]  ;;  %v5578_v21 = vld [vmem:[%s10450_s11 + $0x6b8] sm:$0xff] }
0x1ec2   : > { %7000 = vmatprep.subr.mxu0 %v5519_v45  ;;  %7035 = vmatprep.subr.mxu1 %v5551_v46  ;;  %v5491_v45 = vld [vmem:[%s10450_s11 + $0x400] sm:$0xff] }
0x1ec3   : > { %7001 = vmatpush3.msra.mxu0 %v5503_v47  ;;  %7036 = vmatpush3.msra.mxu1 %v5535_v48  ;;  %v5523_v46 = vld [vmem:[%s10450_s11 + $0x500] sm:$0xff]  ;;  %v5355_v48 = vmax.f32 %v5130_v42, 0.0 }
0x1ec4   : > { %7002 = vmatprep.subr.mxu0 %v5518_v49  ;;  %7037 = vmatprep.subr.mxu1 %v5550_v17  ;;  %v5357_v49 = vmax.f32 %v5201_v43, 0.0  ;;  %v5586_v17 = vld [vmem:[%s10450_s11 + $0x6f8] sm:$0xff]  ;;  %v5575_v42 = vld [vmem:[%s10450_s11 + $0x6a0] sm:$0xff] }
0x1ec5   : > { %7003 = vmatpush3.msra.mxu0 %v5502_v51  ;;  %7038 = vmatpush3.msra.mxu1 %v5534_v52  ;;  %v5618_v51 = vld [vmem:[%s10450_s11 + $0x7f8] sm:$0xff]  ;;  %v5607_v43 = vld [vmem:[%s10450_s11 + $0x7a0] sm:$0xff] }
0x1ec6   : > { %7004 = vmatprep.subr.mxu0 %v5517_v53  ;;  %7039 = vmatprep.subr.mxu1 %v5549_v54  ;;  %v10130_v16 = vpop.f32.mrf.mxu0  ;;  %v10144_v22 = vpop.f32.mrf.mxu1  ;;  %v5570_v52 = vld [vmem:[%s10450_s11 + $0x678] sm:$0xff] }
0x1ec7   : > { %7005 = vmatpush3.msra.mxu0 %v5501_v55  ;;  %7040 = vmatpush3.msra.mxu1 %v5533_v56  ;;  %v5602_v54 = vld [vmem:[%s10450_s11 + $0x778] sm:$0xff]  ;;  %v5585_v56 = vld [vmem:[%s10450_s11 + $0x6f0] sm:$0xff] }
0x1ec8   : > { %7006 = vmatprep.subr.mxu0 %v5516_v57  ;;  %7041 = vmatprep.subr.mxu1 %v5548_v58  ;;  %v5273_v39 = vpop.f32.mrf.mxu0  ;;  %v5344_v44 = vpop.f32.mrf.mxu1  ;;  %v5617_v57 = vld [vmem:[%s10450_s11 + $0x7f0] sm:$0xff] }
0x1ec9   : > { %7007 = vmatpush3.msra.mxu0 %v5500_v59  ;;  %7042 = vmatpush3.msra.mxu1 %v5532_v60  ;;  %v5274_v8 = vadd.f32 %v5273_v39, %v4751_v36  ;;  %v5345_v47 = vadd.f32 %v5344_v44, %v4759_v40  ;;  %v5569_v58 = vld [vmem:[%s10450_s11 + $0x670] sm:$0xff]  ;;  %v5584_v60 = vld [vmem:[%s10450_s11 + $0x6e8] sm:$0xff]  ;;  %v5559_v44 = vld [vmem:[%s10450_s11 + $0x620] sm:$0xff] }
0x1eca   : > { %7008 = vmatprep.subr.mxu0 %v5515_v61  ;;  %7043 = vmatprep.subr.mxu1 %v5547_v2  ;;  %v5601_v59 = vld [vmem:[%s10450_s11 + $0x770] sm:$0xff]  ;;  %v5616_v61 = vld [vmem:[%s10450_s11 + $0x7e8] sm:$0xff] }
0x1ecb   : > { %7009 = vmatpush3.msra.mxu0 %v5499_v25  ;;  %7044 = vmatpush3.msra.mxu1 %v5531_v31  ;;  %v5360_v53 = vmax.f32 %v5274_v8, 0.0  ;;  %v5362_v55 = vmax.f32 %v5345_v47, 0.0  ;;  %v5568_v2 = vld [vmem:[%s10450_s11 + $0x668] sm:$0xff]  ;;  %v5583_v31 = vld [vmem:[%s10450_s11 + $0x6e0] sm:$0xff]  ;;  %v5609_v36 = vld [vmem:[%s10450_s11 + $0x7b0] sm:$0xff] }
0x1ecc   : > { %7010 = vmatprep.subr.mxu0 %v5514_v62  ;;  %7045 = vmatprep.subr.mxu1 %v5546_v63  ;;  %v5600_v25 = vld [vmem:[%s10450_s11 + $0x768] sm:$0xff]  ;;  %v5615_v62 = vld [vmem:[%s10450_s11 + $0x7e0] sm:$0xff]  ;;  %v5590_v8 = vld [vmem:[%s10450_s11 + $0x718] sm:$0xff] }
0x1ecd   : > { %7011 = vmatpush3.msra.mxu0 %v5498_v3  ;;  %7046 = vmatpush3.msra.mxu1 %v5530_v4  ;;  %v5567_v63 = vld [vmem:[%s10450_s11 + $0x660] sm:$0xff]  ;;  %v5582_v4 = vld [vmem:[%s10450_s11 + $0x6d8] sm:$0xff]  ;;  %v5576_v39 = vld [vmem:[%s10450_s11 + $0x6a8] sm:$0xff] }
0x1ece   : > { %7012 = vmatprep.subr.mxu0 %v5513_v5  ;;  %7047 = vmatprep.subr.mxu1 %v5545_v6  ;;  %v5599_v3 = vld [vmem:[%s10450_s11 + $0x760] sm:$0xff]  ;;  %v5614_v5 = vld [vmem:[%s10450_s11 + $0x7d8] sm:$0xff]  ;;  %v5608_v40 = vld [vmem:[%s10450_s11 + $0x7a8] sm:$0xff] }
0x1ecf   : > { %7013 = vmatpush3.msra.mxu0 %v5497_v7  ;;  %7048 = vmatpush3.msra.mxu1 %v5529_v32  ;;  %v5566_v6 = vld [vmem:[%s10450_s11 + $0x658] sm:$0xff]  ;;  %v5581_v32 = vld [vmem:[%s10450_s11 + $0x6d0] sm:$0xff] }
0x1ed0   : > { %7014 = vmatprep.subr.mxu0 %v5512_v33  ;;  %7049 = vmatprep.subr.mxu1 %v5544_v9  ;;  %v5598_v7 = vld [vmem:[%s10450_s11 + $0x758] sm:$0xff]  ;;  %v5613_v33 = vld [vmem:[%s10450_s11 + $0x7d0] sm:$0xff] }
0x1ed1   : > { %7015 = vmatpush3.msra.mxu0 %v5496_v10  ;;  %7050 = vmatpush3.msra.mxu1 %v5528_v11  ;;  %v5565_v9 = vld [vmem:[%s10450_s11 + $0x650] sm:$0xff]  ;;  %v5580_v11 = vld [vmem:[%s10450_s11 + $0x6c8] sm:$0xff] }
0x1ed2   : > { %7016 = vmatprep.subr.mxu0 %v5511_v12  ;;  %7051 = vmatprep.subr.mxu1 %v5543_v13  ;;  %v5597_v10 = vld [vmem:[%s10450_s11 + $0x750] sm:$0xff]  ;;  %v5612_v12 = vld [vmem:[%s10450_s11 + $0x7c8] sm:$0xff] }
0x1ed3   : > { %7017 = vmatpush3.msra.mxu0 %v5495_v14  ;;  %7052 = vmatpush3.msra.mxu1 %v5527_v15  ;;  %v5564_v13 = vld [vmem:[%s10450_s11 + $0x648] sm:$0xff]  ;;  %v5579_v15 = vld [vmem:[%s10450_s11 + $0x6c0] sm:$0xff]  ;;  %v5557_v47 = vld [vmem:[%s10450_s11 + $0x610] sm:$0xff] }
0x1ed4   : > { %7018 = vmatprep.subr.mxu0 %v5510_v18  ;;  %7053 = vmatprep.subr.mxu1 %v5542_v19  ;;  %v5596_v14 = vld [vmem:[%s10450_s11 + $0x748] sm:$0xff]  ;;  %v5611_v18 = vld [vmem:[%s10450_s11 + $0x7c0] sm:$0xff] }
0x1ed5   : > { %7019 = vmatpush3.msra.mxu0 %v5494_v34  ;;  %7054 = vmatpush3.msra.mxu1 %v5526_v35  ;;  %v5563_v19 = vld [vmem:[%s10450_s11 + $0x640] sm:$0xff]  ;;  %v5610_v34 = vld [vmem:[%s10450_s11 + $0x7b8] sm:$0xff] }
0x1ed6   : > { %7020 = vmatprep.subr.mxu0 %v5509_v29  ;;  %7055 = vmatprep.subr.mxu1 %v5541_v30  ;;  %v5562_v35 = vld [vmem:[%s10450_s11 + $0x638] sm:$0xff]  ;;  %v5577_v30 = vld [vmem:[%s10450_s11 + $0x6b0] sm:$0xff] }
0x1ed7   : > { %7021 = vmatpush3.msra.mxu0 %v5493_v37  ;;  %7056 = vmatpush3.msra.mxu1 %v5525_v38  ;;  %v5594_v29 = vld [vmem:[%s10450_s11 + $0x738] sm:$0xff]  ;;  %v5561_v37 = vld [vmem:[%s10450_s11 + $0x630] sm:$0xff] }
0x1ed8   : > { %7022 = vmatprep.subr.mxu0 %v5508_v28  ;;  %7057 = vmatprep.subr.mxu1 %v5540_v41  ;;  %v5593_v38 = vld [vmem:[%s10450_s11 + $0x730] sm:$0xff]  ;;  %v5560_v28 = vld [vmem:[%s10450_s11 + $0x628] sm:$0xff] }
0x1ed9   : > { %7023 = vmatpush3.msra.mxu0 %v5492_v23  ;;  %7058 = vmatpush3.msra.mxu1 %v5524_v24  ;;  %v5592_v41 = vld [vmem:[%s10450_s11 + $0x728] sm:$0xff]  ;;  %v5591_v23 = vld [vmem:[%s10450_s11 + $0x720] sm:$0xff]  ;;  %v5574_v24 = vld [vmem:[%s10450_s11 + $0x698] sm:$0xff] }
0x1eda   : > { %7024 = vmatprep.subr.mxu0 %v5507_v0  ;;  %7059 = vmatprep.subr.mxu1 %v5539_v1  ;;  %v5606_v0 = vld [vmem:[%s10450_s11 + $0x798] sm:$0xff] }
0x1edb   : > { %7025 = vmatpush3.msra.mxu0 %v5491_v45  ;;  %7060 = vmatpush3.msra.mxu1 %v5523_v46  ;;  %v5558_v1 = vld [vmem:[%s10450_s11 + $0x618] sm:$0xff]  ;;  %v5573_v45 = vld [vmem:[%s10450_s11 + $0x690] sm:$0xff] }
0x1edc   : > { %5971 = vmatmul.mubr.f32.vlgmr.msra.gmra.mxu0 %v5355_v48  ;;  %6041 = vmatmul.mubr.f32.vlgmr.msra.gmra.mxu1 %v5357_v49  ;;  %v5605_v46 = vld [vmem:[%s10450_s11 + $0x790] sm:$0xff]  ;;  %v5572_v49 = vld [vmem:[%s10450_s11 + $0x688] sm:$0xff] }
0x1edd   : > { %7064 = vmatprep.subr.mxu0 %v5586_v17  ;;  %7099 = vmatprep.subr.mxu1 %v5618_v51  ;;  %v5589_v48 = vld [vmem:[%s10450_s11 + $0x710] sm:$0xff]  ;;  %v5604_v17 = vld [vmem:[%s10450_s11 + $0x788] sm:$0xff]  ;;  %v5272_v51 = vadd.f32 %v10130_v16, %v9742_v26  ;;  %v5603_v26 = vld [vmem:[%s10450_s11 + $0x780] sm:$0xff] }
0x1ede   : > { %7065 = vmatpush3.msra.mxu0 %v5570_v52  ;;  %6110 = vmatprep.mubr.f32.mxu0 %v5360_v53  ;;  %v5343_v52 = vadd.f32 %v10144_v22, %v9747_v27  ;;  %v5556_v53 = vld [vmem:[%s10450_s11 + $0x608] sm:$0xff]  ;;  %v5555_v27 = vld [vmem:[%s10450_s11 + $0x600] sm:$0xff] }
0x1edf   : > { %7100 = vmatpush3.msra.mxu1 %v5602_v54  ;;  %6180 = vmatprep.mubr.f32.mxu1 %v5362_v55  ;;  %v5588_v54 = vld [vmem:[%s10450_s11 + $0x708] sm:$0xff]  ;;  %v5571_v55 = vld [vmem:[%s10450_s11 + $0x680] sm:$0xff]  ;;  %v5359_v22 = vmax.f32 %v5272_v51, 0.0 }
0x1ee0   : > { %7066 = vmatprep.subr.mxu0 %v5585_v56  ;;  %7101 = vmatprep.subr.mxu1 %v5617_v57  ;;  %v5587_v16 = vld [vmem:[%s10450_s11 + $0x700] sm:$0xff]  ;;  %v5361_v56 = vmax.f32 %v5343_v52, 0.0 }
0x1ee1   : > { %7067 = vmatpush3.msra.mxu0 %v5569_v58  ;;  %7102 = vmatpush3.msra.mxu1 %v5601_v59 }
0x1ee2   : > { %7068 = vmatprep.subr.mxu0 %v5584_v60  ;;  %7103 = vmatprep.subr.mxu1 %v5616_v61 }
0x1ee3   : > { %7069 = vmatpush3.msra.mxu0 %v5568_v2  ;;  %7104 = vmatpush3.msra.mxu1 %v5600_v25  ;;  %v6583_v2 = vld [vmem:[%s10451_s12] ss:$0 sm:$0xff] }
0x1ee4   : > { %7070 = vmatprep.subr.mxu0 %v5583_v31  ;;  %7105 = vmatprep.subr.mxu1 %v5615_v62 }
0x1ee5   : > { %7071 = vmatpush3.msra.mxu0 %v5567_v63  ;;  %7106 = vmatpush3.msra.mxu1 %v5599_v3 }
0x1ee6   : > { %7072 = vmatprep.subr.mxu0 %v5582_v4  ;;  %7107 = vmatprep.subr.mxu1 %v5614_v5 }
0x1ee7   : > { %7073 = vmatpush3.msra.mxu0 %v5566_v6  ;;  %7108 = vmatpush3.msra.mxu1 %v5598_v7 }
0x1ee8   : > { %7074 = vmatprep.subr.mxu0 %v5581_v32  ;;  %7109 = vmatprep.subr.mxu1 %v5613_v33 }
0x1ee9   : > { %7075 = vmatpush3.msra.mxu0 %v5565_v9  ;;  %7110 = vmatpush3.msra.mxu1 %v5597_v10 }
0x1eea   : > { %7076 = vmatprep.subr.mxu0 %v5580_v11  ;;  %7111 = vmatprep.subr.mxu1 %v5612_v12 }
0x1eeb   : > { %7077 = vmatpush3.msra.mxu0 %v5564_v13  ;;  %7112 = vmatpush3.msra.mxu1 %v5596_v14 }
0x1eec   : > { %7078 = vmatprep.subr.mxu0 %v5579_v15  ;;  %7113 = vmatprep.subr.mxu1 %v5611_v18 }
0x1eed   : > { %7079 = vmatpush3.msra.mxu0 %v5563_v19  ;;  %7114 = vmatpush3.msra.mxu1 %v5595_v20 }
0x1eee   : > { %7080 = vmatprep.subr.mxu0 %v5578_v21  ;;  %7115 = vmatprep.subr.mxu1 %v5610_v34 }
0x1eef   : > { %7081 = vmatpush3.msra.mxu0 %v5562_v35  ;;  %7116 = vmatpush3.msra.mxu1 %v5594_v29 }
0x1ef0   : > { %7082 = vmatprep.subr.mxu0 %v5577_v30  ;;  %7117 = vmatprep.subr.mxu1 %v5609_v36 }
0x1ef1   : > { %7083 = vmatpush3.msra.mxu0 %v5561_v37  ;;  %7118 = vmatpush3.msra.mxu1 %v5593_v38 }
0x1ef2   : > { %7084 = vmatprep.subr.mxu0 %v5576_v39  ;;  %7119 = vmatprep.subr.mxu1 %v5608_v40 }
0x1ef3   : > { %7085 = vmatpush3.msra.mxu0 %v5560_v28  ;;  %7120 = vmatpush3.msra.mxu1 %v5592_v41 }
0x1ef4   : > { %7086 = vmatprep.subr.mxu0 %v5575_v42  ;;  %7121 = vmatprep.subr.mxu1 %v5607_v43 }
0x1ef5   : > { %7087 = vmatpush3.msra.mxu0 %v5559_v44  ;;  %7122 = vmatpush3.msra.mxu1 %v5591_v23 }
0x1ef6   : > { %7088 = vmatprep.subr.mxu0 %v5574_v24  ;;  %7123 = vmatprep.subr.mxu1 %v5606_v0 }
0x1ef7   : > { %7089 = vmatpush3.msra.mxu0 %v5558_v1  ;;  %7124 = vmatpush3.msra.mxu1 %v5590_v8  ;;  %v6585_v1 = vld [vmem:[%s10455_s16] ss:$0 sm:$0xff] }
0x1ef8   : > { %7090 = vmatprep.subr.mxu0 %v5573_v45  ;;  %7125 = vmatprep.subr.mxu1 %v5605_v46 }
0x1ef9   : > { %7091 = vmatpush3.msra.mxu0 %v5557_v47  ;;  %7126 = vmatpush3.msra.mxu1 %v5589_v48 }
0x1efa   : > { %7092 = vmatprep.subr.mxu0 %v5572_v49  ;;  %7127 = vmatprep.subr.mxu1 %v5604_v17 }
0x1efb   : > { %7093 = vmatpush3.msra.mxu0 %v5556_v53  ;;  %7128 = vmatpush3.msra.mxu1 %v5588_v54 }
0x1efc   : > { %7094 = vmatprep.subr.mxu0 %v5571_v55  ;;  %7129 = vmatprep.subr.mxu1 %v5603_v26 }
0x1efd   : > { %7095 = vmatpush3.msra.mxu0 %v5555_v27  ;;  %7130 = vmatpush3.msra.mxu1 %v5587_v16 }
0x1efe   : > { %6111 = vmatmul.mubr.f32.vlgmr.msra.gmra.mxu0 %v5359_v22  ;;  %6181 = vmatmul.mubr.f32.vlgmr.msra.gmra.mxu1 %v5361_v56 }
0x1f59   : > { %v6886_v57 = vpop.f32.mrf.mxu0  ;;  %v6921_v59 = vpop.f32.mrf.mxu1 }
0x1f5b   : > { %v6887_v58 = vpop.f32.mrf.mxu0  ;;  %v6922_v25 = vpop.f32.mrf.mxu1 }
0x1f5c   : > { %v6888_v61 = vadd.f32 %v6887_v58, %v6886_v57  ;;  %v6923_v4 = vadd.f32 %v6922_v25, %v6921_v59 }
0x1f5e   : > { %v5693_v62 = vadd.f32 %v6888_v61, %v6583_v2 }
0x1f60   : > { %v5763_v6 = vadd.f32 %v6923_v4, %v5693_v62 }
0x1f7a   : > { %v6956_v60 = vpop.f32.mrf.mxu0  ;;  %v6991_v63 = vpop.f32.mrf.mxu1 }
0x1f7c   : > { %v6957_v31 = vpop.f32.mrf.mxu0  ;;  %v6992_v7 = vpop.f32.mrf.mxu1 }
0x1f7d   : > { %v6958_v5 = vadd.f32 %v6957_v31, %v6956_v60  ;;  %v6993_v10 = vadd.f32 %v6992_v7, %v6991_v63 }
0x1f7f   : > { %v5833_v33 = vadd.f32 %v6958_v5, %v5763_v6 }
0x1f81   : > { %v5903_v12 = vadd.f32 %v6993_v10, %v5833_v33 }
0x1f9c   : > { %v7026_v3 = vpop.f32.mrf.mxu0  ;;  %v7061_v9 = vpop.f32.mrf.mxu1 }
0x1f9e   : > { %v7027_v32 = vpop.f32.mrf.mxu0  ;;  %v7062_v13 = vpop.f32.mrf.mxu1 }
0x1f9f   : > { %v7028_v11 = vadd.f32 %v7027_v32, %v7026_v3  ;;  %v7063_v19 = vadd.f32 %v7062_v13, %v7061_v9 }
0x1fa1   : > { %v5973_v14 = vadd.f32 %v7028_v11, %v5903_v12 }
0x1fa3   : > { %v6043_v34 = vadd.f32 %v7063_v19, %v5973_v14 }
0x1fbe   : > { %v7096_v15 = vpop.f32.mrf.mxu0  ;;  %v7131_v18 = vpop.f32.mrf.mxu1 }
0x1fc0   : > { %v7097_v20 = vpop.f32.mrf.mxu0  ;;  %v7132_v21 = vpop.f32.mrf.mxu1 }
0x1fc1   : > { %v7098_v35 = vadd.f32 %v7097_v20, %v7096_v15  ;;  %v7133_v30 = vadd.f32 %v7132_v21, %v7131_v18 }
0x1fc3   : > { %v6113_v29 = vadd.f32 %v7098_v35, %v6043_v34 }
0x1fc5   : > { %v6183_v36 = vadd.f32 %v7133_v30, %v6113_v29 }
0x1fc7   : > { %v6186_v37 = vadd.f32 %v6183_v36, %v9226_v50  ;;  %v6584_v50 = vld [vmem:[%s10454_s15] ss:$0 sm:$0xff] }
0x1fc9   : > { %v6189_v38 = vsel %vm560_vm0, %v6186_v37, 0.0 }
0x1fca   : > { %6190 = vadd.xlane.f32.xlu0 %v6189_v38 }
0x2053   : > { %v6191_v39 = vpop.xlane.xlu0 %6190 }
0x2054   : > { %v6192_v40 = vmul.f32 0.015625, %v6191_v39 }
0x2056   : > { %v6193_v28 = vsub.f32 %v6186_v37, %v6192_v40 }
0x2058   : > { %v6194_v41 = vmul.f32 %v6193_v28, %v6193_v28 }
0x205a   : > { %v6195_v42 = vsel %vm560_vm0, %v6194_v41, 0.0 }
0x205b   : > { %6196 = vadd.xlane.f32.xlu1 %v6195_v42 }
0x20e4   : > { %v6197_v43 = vpop.xlane.xlu1 %6196 }
0x20e5   : > { %v6198_v44 = vmul.f32 0.015625, %v6197_v43 }
0x20e7   : > { %v6199_v23 = vadd.f32 1e-05, %v6198_v44 }
0x20e9   : > { %7785 = vrsqrt.f32 %v6199_v23 }
0x20f6   : > { %v7786_v24 = vpop.eup %7785 }
0x20f7   : > { %v6201_v0 = vmul.f32 %v7786_v24, %v6193_v28 }
0x20f9   : > { %v6208_v8 = vmul.f32 %v6584_v50, %v6201_v0 }
0x20fb   : > { %v6215_v45 = vadd.f32 %v6585_v1, %v6208_v8 }
0x20fd   : > { %6216 = vst.msk [vmem:[%s539_s0] sm:$0xff] %vm560_vm0, %v6215_v45 }
0x20fe   : > { %7801 = shalt.err (!%p7798_p3)
}
0x20ff   : > { %s7802_s27 = scalar_lea.hbm %s6229_s2, 128  ;;  %s7806_s26 = scalar_lea.hbm %s10456_s17, 256 }
0x2100   : > { %p7803_p4 = scmp.ne.s32.totalorder %s6229_s2, %s7802_s27  ;;  %p7807_p9 = scmp.lt.s32.totalorder %s6229_s2, %s10456_s17 }
0x2101   : > { %p7808_p10 = scmp.lt.s32.totalorder %s7806_s26, %s7802_s27 }
0x2102   : > { %p7804_p7 = pnand %p7803_p4, %p7981_p5 }
0x2103   : > { %p7809_p11 = por %p7808_p10, %p7807_p9 }
0x2104   : > { %p7805_p8 = pneg %p7804_p7 }
0x2106   : > { %p7810_p12 = pnand %p7809_p11, %p7805_p8 }
0x2108   : > { %7813 = shalt.err (!%p7810_p12)
}
0x2109   : > { %7710 = dma.vmem_to_hbm [thread:$0]  (%p7981_p5), %s6232_s19, 128, %s6229_s2, %s6218_s3  }
0x210a PF: > { %s10480_s24 = sld [smem:[#allocation7_spill]] }
0x210b   : > { %s10481_s22 = sld [smem:[#allocation5_spill]] }
0x2110   : > { %p7716_p13 = scmp.ge.s32.totalorder %s10480_s24, 2 }
0x2111   : > { %s6243_s30 = sand.u32 1, %s10481_s22  }
0x2112   : > { %p7713_p0 = pnand %p7716_p13, %p7985_p6  ;;  %s6244_s28 = scalar_lea.sflag [#allocation3], %s6243_s30 }
0x2114   : > { %p7714_p1 = pneg %p7713_p0 }
0x2116   : > { %7831 = dma.done.wait (%p7714_p1), %s6244_s28, 128  }
0x2117   : > { %7833 = vsyncadd (%p7714_p1), %s6244_s28, 4294967168  ;;  %s10483_s27 = sld [smem:[#allocation8_spill]]  ;;  %s10486_s24 = smov %s7840_s25 }
0x2118   : > { %s10484_s20 = sld [smem:[#allocation6_spill]] }
0x2119   : > { %s10485_s26 = sld [smem:[#allocation9_spill]] }
0x211d   : > { %p27_p2 = scmp.ge.s32.totalorder %s10483_s27, 4  }
0x211e   : > { %s10487_s25 = smov %s10484_s20 }
0x211f   :  { %29 = sbr.rel (!%p27_p2) target bundleno = 8 (0x8), region = 172 }
0x2124   :  { %6249 = vsyncpa [#allocation3], 1 }
0x2125   :  { %6251 = vsyncpa [#allocation3 + $0x1], 1 }

</bundles_post_ra>
